<compile_context>
chip_gen: v5e
topology: v5e:2x2
jax: 0.10.0
libtpu: 0.0.40
codegen_flags: <defaults>
</compile_context>

<pallas_src>
import math

import jax
import jax.numpy as jnp
from jax.experimental import pallas as pl
from jax.experimental.pallas import tpu as pltpu


# ----------------------------------------------------------------------------- packing
class _SlabBuilder:
    """Row-stacks many small weights into one slab (one DMA), zero-padded to a fixed
    lane width; records (row_offset, true_rows, true_cols) for static in-kernel slicing."""

    def __init__(self, width, dtype, row_align=8):
        self.width = width
        self.dtype = dtype
        self.row_align = row_align
        self.parts = []
        self.index = {}
        self.offset = 0

    def add(self, name, arr):
        arr = jnp.asarray(arr, jnp.float32)
        if arr.ndim == 1:
            arr = arr.reshape(1, -1)
        r, c = int(arr.shape[0]), int(arr.shape[1])
        assert c <= self.width, (name, c, self.width)
        rp = -(-r // self.row_align) * self.row_align
        buf = jnp.zeros((rp, self.width), jnp.float32).at[:r, :c].set(arr)
        self.parts.append(buf)
        self.index[name] = (self.offset, r, c)
        self.offset += rp

    def finalize(self):
        slab = jnp.concatenate(self.parts, axis=0).astype(self.dtype)
        return slab, self.index


def _round_up(x, m):
    return -(-x // m) * m


# ----------------------------------------------------------------------------- kernels
def _gelu(x):
    # TODO(synk): torch nn.GELU / F.gelu default to the exact erf form; Mosaic has no erf
    # lowering, so the tanh approximation is used (max abs err ~1e-3).
    return 0.5 * x * (1.0 + jnp.tanh(0.7978845608028654 * (x + 0.044715 * x * x * x)))


def _make_stage1_kernel(meta):
    """x_cat -> initial_proj -> transformer(seq_len==1, fused attn) -> h_trans ->
    fused 4-way DNG projection; emits [h_trans | nh | d_score | n_attn | g_attn]."""
    E, D, L = meta["input_dim"], meta["d_model"], meta["num_layers"]
    wdx, wwx, vx = meta["wd1"], meta["ww1"], meta["vec1"]

    def kernel(row_ref, wd_ref, ww_ref, vec_ref, out_ref):
        def V(name):
            off, _, c = vx[name]
            return vec_ref[off:off + 1, :c]

        def _mat(ref, idx, name, x):
            off, r, c = idx[name]
            w = ref[off:off + r, :]
            y = jnp.dot(x.astype(w.dtype), w, preferred_element_type=jnp.float32)
            return y if c == w.shape[1] else y[:, :c]

        def matD(x, name):
            return _mat(wd_ref, wdx, name, x)

        def matW(x, name):
            return _mat(ww_ref, wwx, name, x)

        def ln(y, gname, bname):
            inv = 1.0 / y.shape[-1]
            mu = jnp.sum(y, axis=-1, keepdims=True) * inv
            ex2 = jnp.sum(y * y, axis=-1, keepdims=True) * inv
            var = ex2 - mu * mu
            return (y - mu) * jax.lax.rsqrt(var + 1e-5) * V(gname) + V(bname)

        x = row_ref[:, 0:2 * E]
        valid = row_ref[:, 4 * E + 10:4 * E + 11]

        h0 = _gelu(ln(matD(x, "ip_w") + V("ip_b"), "ip_g", "ip_be"))

        src = ln(h0, "norm_g", "norm_b")
        # TODO(synk): switch to lax.fori_loop over layer-stacked slab rows if num_layers
        # grows beyond ~2 (static unrolling does not bound vreg live ranges).
        for l in range(L):
            attn = matD(src, f"attn_w_{l}") + V(f"attn_b_{l}")
            src = ln(src + attn, f"ln1_g_{l}", f"ln1_b_{l}")
            ff = _gelu(matW(src, f"ff1_w_{l}") + V(f"ff1_b_{l}"))
            ff = matD(ff, f"ff2_w_{l}") + V(f"ff2_b_{l}")
            src = ln(src + ff, f"ln2_g_{l}", f"ln2_b_{l}")
        h_trans = 0.8 * src + 0.2 * h0

        # fused [direct_layer | neighborhood_attn | cosine_sim | graph_attn] projection
        proj = matW(h_trans, "dng_proj_w") + V("dng_proj_b")                   # [BB, 4D]
        d_score = _gelu(ln(proj[:, 0:D], "dl_g", "dl_be"))
        h_cos = jnp.tanh(ln(proj[:, 2 * D:3 * D], "cos_g", "cos_be"))
        nh = h_cos / jnp.maximum(
            jnp.sqrt(jnp.sum(h_cos * h_cos, axis=-1, keepdims=True)), 1e-12)   # F.normalize
        nh = nh * valid  # padded rows contribute nothing to the cross-batch similarity

        out_ref[:, 0:D] = h_trans
        out_ref[:, D:2 * D] = nh
        out_ref[:, 2 * D:3 * D] = d_score
        out_ref[:, 3 * D:4 * D] = proj[:, D:2 * D]       # fused neighborhood attention
        out_ref[:, 4 * D:5 * D] = proj[:, 3 * D:4 * D]   # fused graph attention

    return kernel


def _make_stage2_kernel(meta):
    """Exact cross-batch cosine weighting + DNG combine + bilinear + refinement +
    weighting + autoencoder + heads/ensemble/bias."""
    E, D = meta["input_dim"], meta["d_model"]
    wdx, vx = meta["wd2"], meta["vec2"]

    def kernel(row_ref, s1_ref, full_ref, wd_ref, vec_ref, out_ref, z_ref):
        def V(name):
            off, _, c = vx[name]
            return vec_ref[off:off + 1, :c]

        def matD(x, name):
            off, r, c = wdx[name]
            w = wd_ref[off:off + r, :]
            y = jnp.dot(x.astype(w.dtype), w, preferred_element_type=jnp.float32)
            return y if c == w.shape[1] else y[:, :c]

        def ln(y, gname, bname):
            inv = 1.0 / y.shape[-1]
            mu = jnp.sum(y, axis=-1, keepdims=True) * inv
            ex2 = jnp.sum(y * y, axis=-1, keepdims=True) * inv
            var = ex2 - mu * mu
            return (y - mu) * jax.lax.rsqrt(var + 1e-5) * V(gname) + V(bname)

        # ---- per-row features
        u_emb = row_ref[:, 0:E]
        i_emb = row_ref[:, E:2 * E]
        u_mf = row_ref[:, 2 * E:3 * E]
        i_mf = row_ref[:, 3 * E:4 * E]
        item_pop = row_ref[:, 4 * E:4 * E + 1]
        bias_feats = row_ref[:, 4 * E + 1:4 * E + 9]
        base_bias = row_ref[:, 4 * E + 9:4 * E + 10]

        # ---- stage-1 products for this block
        h_trans = s1_ref[:, 0:D]
        nh = s1_ref[:, D:2 * D]
        d_score = s1_ref[:, 2 * D:3 * D]
        n_attn = s1_ref[:, 3 * D:4 * D]
        g_attn = s1_ref[:, 4 * D:5 * D]

        # full (padded) batch, resident: exact cross-batch cosine-similarity weighting
        h_trans_all = full_ref[:, 0:D]
        nh_all = full_ref[:, D:2 * D]
        sim = jax.lax.dot_general(nh, nh_all, (((1,), (1,)), ((), ())),
                                  preferred_element_type=jnp.float32)          # [BB, B]
        sim_weighted = (jnp.dot(sim, h_trans_all, preferred_element_type=jnp.float32)
                        / (jnp.sum(sim, axis=-1, keepdims=True) + 1e-8))

        n_score = _gelu(ln(matD(n_attn + 0.2 * sim_weighted, "nbl_w") + V("nbl_b"),
                           "nbl_g", "nbl_be"))
        g_score = _gelu(ln(matD(g_attn, "gl_w") + V("gl_b"), "gl_g", "gl_be"))

        # merged dng_attention / dng_combine on the lane-concatenated [B, 3D] value
        dng_cat = jnp.concatenate([d_score, n_score, g_score], axis=1)
        logits = matD(dng_cat, "da_w") + V("da_b")                              # [BB, 3]
        logits = logits - jnp.max(logits, axis=-1, keepdims=True)
        e = jnp.exp(logits)
        cw = e / jnp.sum(e, axis=-1, keepdims=True)
        weighted = jnp.concatenate([d_score * (1.2 * cw[:, 0:1]),
                                    n_score * cw[:, 1:2],
                                    g_score * cw[:, 2:3]], axis=1)
        h_combined = _gelu(ln(matD(weighted, "dc_w") + V("dc_b"), "dc_g", "dc_be"))

        # feature_interaction (nn.Bilinear D,D->D) with NO identity-expansion GEMMs:
        #   z[b, i*D + j] = h_combined[b, i] * h_trans[b, j];  h_inter = z @ fi_w.reshape(D*D, D)
        for i in range(D):
            z_ref[:, i * D:(i + 1) * D] = h_combined[:, i:i + 1] * h_trans
        h_inter = matD(z_ref[...], "fi_w") + V("fi_b")

        h_refined = _gelu(ln(matD(h_combined + 0.2 * h_inter, "rf_w") + V("rf_b"),
                             "rf_g", "rf_be"))
        h = h_refined + 0.7 * h_combined + 0.3 * h_trans

        # weighting layer
        h_weighted = _gelu(ln(matD(h, "wl_w") + V("wl_b"), "wl_g", "wl_be"))
        h = 0.7 * h_weighted + 0.3 * h

        # autoencoder
        e1 = _gelu(ln(matD(h, "ae_e1_w") + V("ae_e1_b"), "ae_e1_g", "ae_e1_be"))
        h_enc = _gelu(ln(matD(e1, "ae_e2_w") + V("ae_e2_b"), "ae_e2_g", "ae_e2_be"))
        d1 = _gelu(ln(matD(h_enc, "ae_d1_w") + V("ae_d1_b"), "ae_d1_g", "ae_d1_be"))
        h_dec = _gelu(ln(matD(d1, "ae_d2_w") + V("ae_d2_b"), "ae_d2_g", "ae_d2_be"))
        h = 0.8 * h_dec + 0.2 * h

        # heads (softmaxed ensemble weights folded at prepare time); 1-lane heads on the VPU
        h1 = _gelu(matD(h, "f1a_w") + V("f1a_b"))
        o1 = jnp.sum(h1 * V("f1b_w"), axis=-1, keepdims=True) + V("f1b_b")      # * ew0
        o2 = jnp.sum(h * V("f2_w"), axis=-1, keepdims=True) + V("f2_b")         # * ew1
        mf_out = jnp.sum(u_mf * i_mf, axis=-1, keepdims=True)                   # * ew2 folded
        o4 = jnp.sum(u_emb * i_emb, axis=-1, keepdims=True) * V("dd_scale")     # 1.5 * ew3

        # nn.Bilinear(input_dim, input_dim, 1): one GEMM + row-dot
        direct_sim = (jnp.sum(matD(u_emb, "ds_w") * i_emb, axis=-1, keepdims=True)
                      + V("ds_b"))
        pop_h = _gelu(item_pop * V("pb1_w") + V("pb1_b"))                       # K=1 outer prod
        pop_score = jax.nn.sigmoid(jnp.sum(pop_h * V("pb2_w"), axis=-1, keepdims=True)
                                   + V("pb2_b"))
        inter_bias = jnp.sum(bias_feats * V("bi_w"), axis=-1, keepdims=True) + V("bi_b")
        bias_term = base_bias + inter_bias + direct_sim

        out_ref[...] = o1 + o2 + mf_out + o4 + bias_term + 0.15 * pop_score

    return kernel


# ----------------------------------------------------------------------------- params
def init_params(key, *, num_users, num_items, input_dim, d_model, d_ff, num_layers):
    keys = iter(jax.random.split(key, 128))

    def nxt():
        return next(keys)

    def dense(fan_in, fan_out):
        s = 1.0 / math.sqrt(fan_in)
        w = jax.random.uniform(nxt(), (fan_in, fan_out), jnp.float32, -s, s)
        b = jax.random.uniform(nxt(), (1, fan_out), jnp.float32, -s, s)
        return w, b

    def ln(d):
        return jnp.ones((1, d), jnp.float32), jnp.zeros((1, d), jnp.float32)

    p = {}
    p["user_embedding"] = 0.01 * jax.random.normal(nxt(), (num_users, input_dim), jnp.float32)
    p["item_embedding"] = 0.01 * jax.random.normal(nxt(), (num_items, input_dim), jnp.float32)
    p["user_embedding_mf"] = jax.random.uniform(nxt(), (num_users, input_dim), jnp.float32, -0.05, 0.05)
    p["item_embedding_mf"] = jax.random.uniform(nxt(), (num_items, input_dim), jnp.float32, -0.05, 0.05)
    p["item_popularity"] = 0.1 + 0.01 * jax.random.normal(nxt(), (num_items, 1), jnp.float32)
    p["user_bias"] = jnp.zeros((num_users, 1), jnp.float32)
    p["item_bias"] = jnp.zeros((num_items, 1), jnp.float32)
    p["global_bias"] = jnp.zeros((1, 1), jnp.float32)
    p["user_bias_factors"] = 0.005 * jax.random.normal(nxt(), (num_users, 4), jnp.float32)
    p["item_bias_factors"] = 0.005 * jax.random.normal(nxt(), (num_items, 4), jnp.float32)
    p["bi_w"], p["bi_b"] = dense(8, 1)
    # direct_similarity: nn.Bilinear(input_dim, input_dim, 1) stored as [in1, in2, out]
    # (PyTorch stores [out, in1, in2]; importing a checkpoint needs a transpose).
    s = 1.0 / math.sqrt(input_dim)
    p["ds_w"] = jax.random.uniform(nxt(), (input_dim, input_dim, 1), jnp.float32, -s, s)
    p["ds_b"] = jax.random.uniform(nxt(), (1, 1), jnp.float32, -s, s)
    p["ip_w"], p["ip_b"] = dense(input_dim * 2, d_model)
    p["ip_g"], p["ip_be"] = ln(d_model)
    p["norm_g"], p["norm_b"] = ln(d_model)
    layers = []
    for _ in range(num_layers):
        L = {}
        L["wv"], L["bv"] = dense(d_model, d_model)   # self-attn V proj (only V/out matter at S=1)
        L["wo"], L["bo"] = dense(d_model, d_model)   # self-attn out proj
        L["ln1_g"], L["ln1_b"] = ln(d_model)
        L["ff1_w"], L["ff1_b"] = dense(d_model, d_ff)
        L["ff2_w"], L["ff2_b"] = dense(d_ff, d_model)
        L["ln2_g"], L["ln2_b"] = ln(d_model)
        layers.append(L)
    p["tr_layers"] = layers
    p["dl_w"], p["dl_b"] = dense(d_model, d_model); p["dl_g"], p["dl_be"] = ln(d_model)
    p["na_wv"], p["na_bv"] = dense(d_model, d_model)
    p["na_wo"], p["na_bo"] = dense(d_model, d_model)
    p["cos_w"], p["cos_b"] = dense(d_model, d_model); p["cos_g"], p["cos_be"] = ln(d_model)
    p["nbl_w"], p["nbl_b"] = dense(d_model, d_model); p["nbl_g"], p["nbl_be"] = ln(d_model)
    p["ga_wv"], p["ga_bv"] = dense(d_model, d_model)
    p["ga_wo"], p["ga_bo"] = dense(d_model, d_model)
    p["gl_w"], p["gl_b"] = dense(d_model, d_model); p["gl_g"], p["gl_be"] = ln(d_model)
    p["dc_w"], p["dc_b"] = dense(d_model * 3, d_model); p["dc_g"], p["dc_be"] = ln(d_model)
    p["da_w"], p["da_b"] = dense(d_model * 3, 3)
    p["rf_w"], p["rf_b"] = dense(d_model, d_model); p["rf_g"], p["rf_be"] = ln(d_model)
    # feature_interaction: nn.Bilinear(d_model, d_model, d_model) stored as [in1, in2, out]
    s = 1.0 / math.sqrt(d_model)
    p["fi_w"] = jax.random.uniform(nxt(), (d_model, d_model, d_model), jnp.float32, -s, s)
    p["fi_b"] = jax.random.uniform(nxt(), (1, d_model), jnp.float32, -s, s)
    p["wl_w"], p["wl_b"] = dense(d_model, d_model); p["wl_g"], p["wl_be"] = ln(d_model)
    p["ae_e1_w"], p["ae_e1_b"] = dense(d_model, d_model // 2); p["ae_e1_g"], p["ae_e1_be"] = ln(d_model // 2)
    p["ae_e2_w"], p["ae_e2_b"] = dense(d_model // 2, d_model // 4); p["ae_e2_g"], p["ae_e2_be"] = ln(d_model // 4)
    p["ae_d1_w"], p["ae_d1_b"] = dense(d_model // 4, d_model // 2); p["ae_d1_g"], p["ae_d1_be"] = ln(d_model // 2)
    p["ae_d2_w"], p["ae_d2_b"] = dense(d_model // 2, d_model); p["ae_d2_g"], p["ae_d2_be"] = ln(d_model)
    p["f1a_w"], p["f1a_b"] = dense(d_model, d_model // 2)
    p["f1b_w"], p["f1b_b"] = dense(d_model // 2, 1)
    p["f2_w"], p["f2_b"] = dense(d_model, 1)
    p["pb1_w"], p["pb1_b"] = dense(1, 8)
    p["pb2_w"], p["pb2_b"] = dense(8, 1)
    p["ens"] = jnp.ones((4,), jnp.float32) / 4.0
    return p


def prepare_params(p):
    """One-time inference prep: fuse the seq_len==1 attention linear pairs, concatenate the
    parallel DNG projections, fold the softmaxed ensemble weights, and pack everything
    into a handful of bf16/f32 slabs with static (offset, rows, cols) metadata."""
    E = int(p["user_embedding"].shape[1])
    D = int(p["ip_w"].shape[1])
    DFF = int(p["tr_layers"][0]["ff1_w"].shape[1])
    L = len(p["tr_layers"])
    WIDE = max(4 * D, DFF)
    ew = jax.nn.softmax(p["ens"])

    def fuse_attn(wv, bv, wo, bo):
        # out_proj(v_proj(x)) == x @ (Wv Wo) + (bv Wo + bo)   (exact for seq_len == 1)
        return wv @ wo, bv @ wo + bo

    # ---- stage-1 slabs (initial proj + transformer + fused DNG projections)
    wd1 = _SlabBuilder(D, jnp.bfloat16)
    ww1 = _SlabBuilder(WIDE, jnp.bfloat16)
    v1 = _SlabBuilder(WIDE, jnp.float32)

    wd1.add("ip_w", p["ip_w"])
    v1.add("ip_b", p["ip_b"]); v1.add("ip_g", p["ip_g"]); v1.add("ip_be", p["ip_be"])
    v1.add("norm_g", p["norm_g"]); v1.add("norm_b", p["norm_b"])
    for l, Lp in enumerate(p["tr_layers"]):
        aw, ab = fuse_attn(Lp["wv"], Lp["bv"], Lp["wo"], Lp["bo"])
        wd1.add(f"attn_w_{l}", aw); v1.add(f"attn_b_{l}", ab)
        v1.add(f"ln1_g_{l}", Lp["ln1_g"]); v1.add(f"ln1_b_{l}", Lp["ln1_b"])
        ww1.add(f"ff1_w_{l}", Lp["ff1_w"]); v1.add(f"ff1_b_{l}", Lp["ff1_b"])
        wd1.add(f"ff2_w_{l}", Lp["ff2_w"]); v1.add(f"ff2_b_{l}", Lp["ff2_b"])
        v1.add(f"ln2_g_{l}", Lp["ln2_g"]); v1.add(f"ln2_b_{l}", Lp["ln2_b"])
    na_w, na_b = fuse_attn(p["na_wv"], p["na_bv"], p["na_wo"], p["na_bo"])
    ga_w, ga_b = fuse_attn(p["ga_wv"], p["ga_bv"], p["ga_wo"], p["ga_bo"])
    ww1.add("dng_proj_w", jnp.concatenate([p["dl_w"], na_w, p["cos_w"], ga_w], axis=1))
    v1.add("dng_proj_b", jnp.concatenate([p["dl_b"], na_b, p["cos_b"], ga_b], axis=1))
    v1.add("dl_g", p["dl_g"]); v1.add("dl_be", p["dl_be"])
    v1.add("cos_g", p["cos_g"]); v1.add("cos_be", p["cos_be"])

    # ---- stage-2 slabs (DNG combine + bilinear + refinement + AE + heads)
    wd2 = _SlabBuilder(D, jnp.bfloat16)
    v2 = _SlabBuilder(max(D, E, 8), jnp.float32)

    wd2.add("nbl_w", p["nbl_w"])
    v2.add("nbl_b", p["nbl_b"]); v2.add("nbl_g", p["nbl_g"]); v2.add("nbl_be", p["nbl_be"])
    wd2.add("gl_w", p["gl_w"])
    v2.add("gl_b", p["gl_b"]); v2.add("gl_g", p["gl_g"]); v2.add("gl_be", p["gl_be"])
    wd2.add("da_w", p["da_w"]); v2.add("da_b", p["da_b"])
    wd2.add("dc_w", p["dc_w"])
    v2.add("dc_b", p["dc_b"]); v2.add("dc_g", p["dc_g"]); v2.add("dc_be", p["dc_be"])
    wd2.add("fi_w", p["fi_w"].reshape(D * D, D)); v2.add("fi_b", p["fi_b"])
    wd2.add("rf_w", p["rf_w"])
    v2.add("rf_b", p["rf_b"]); v2.add("rf_g", p["rf_g"]); v2.add("rf_be", p["rf_be"])
    wd2.add("wl_w", p["wl_w"])
    v2.add("wl_b", p["wl_b"]); v2.add("wl_g", p["wl_g"]); v2.add("wl_be", p["wl_be"])
    for k in ("ae_e1", "ae_e2", "ae_d1", "ae_d2"):
        wd2.add(k + "_w", p[k + "_w"])
        v2.add(k + "_b", p[k + "_b"]); v2.add(k + "_g", p[k + "_g"]); v2.add(k + "_be", p[k + "_be"])
    wd2.add("f1a_w", p["f1a_w"]); v2.add("f1a_b", p["f1a_b"])
    v2.add("f1b_w", (p["f1b_w"] * ew[0]).reshape(1, -1)); v2.add("f1b_b", p["f1b_b"] * ew[0])
    v2.add("f2_w", (p["f2_w"] * ew[1]).reshape(1, -1)); v2.add("f2_b", p["f2_b"] * ew[1])
    v2.add("pb1_w", p["pb1_w"]); v2.add("pb1_b", p["pb1_b"])
    v2.add("pb2_w", p["pb2_w"].reshape(1, -1)); v2.add("pb2_b", p["pb2_b"])
    v2.add("bi_w", p["bi_w"].reshape(1, -1)); v2.add("bi_b", p["bi_b"])
    wd2.add("ds_w", p["ds_w"][:, :, 0]); v2.add("ds_b", p["ds_b"])
    v2.add("dd_scale", jnp.reshape(1.5 * ew[3], (1, 1)))

    wd1_s, wd1_i = wd1.finalize()
    ww1_s, ww1_i = ww1.finalize()
    v1_s, v1_i = v1.finalize()
    wd2_s, wd2_i = wd2.finalize()
    v2_s, v2_i = v2.finalize()

    arrays = {
        "user_embedding": p["user_embedding"],
        "item_embedding": p["item_embedding"],
        "user_embedding_mf_scaled": p["user_embedding_mf"] * ew[2],   # ensemble w2 folded
        "item_embedding_mf": p["item_embedding_mf"],
        "item_popularity": p["item_popularity"],
        "user_bias": p["user_bias"],
        "item_bias": p["item_bias"],
        "global_bias": p["global_bias"],
        "user_bias_factors": p["user_bias_factors"],
        "item_bias_factors": p["item_bias_factors"],
        "wd1": wd1_s, "ww1": ww1_s, "vec1": v1_s, "wd2": wd2_s, "vec2": v2_s,
    }
    meta = {"input_dim": E, "d_model": D, "d_ff": DFF, "num_layers": L,
            "wd1": wd1_i, "ww1": ww1_i, "vec1": v1_i, "wd2": wd2_i, "vec2": v2_i}
    return arrays, meta


# ----------------------------------------------------------------------------- forward
def scoreformer_forward(arrays, meta, user_idx, item_idx, *, block_rows=256):
    E, D = meta["input_dim"], meta["d_model"]

    # embedding gathers + per-row feature slab are the only plain-JAX glue
    u_emb = arrays["user_embedding"][user_idx]
    i_emb = arrays["item_embedding"][item_idx]
    u_mf = arrays["user_embedding_mf_scaled"][user_idx]
    i_mf = arrays["item_embedding_mf"][item_idx]
    item_pop = arrays["item_popularity"][item_idx]
    base_bias = (arrays["user_bias"][user_idx] + arrays["item_bias"][item_idx]
                 + arrays["global_bias"])
    bias_feats = jnp.concatenate([arrays["user_bias_factors"][user_idx],
                                  arrays["item_bias_factors"][item_idx]], axis=1)
    B = user_idx.shape[0]
    valid = jnp.ones((B, 1), jnp.float32)
    row_slab = jnp.concatenate(
        [u_emb, i_emb, u_mf, i_mf, item_pop, bias_feats, base_bias, valid],
        axis=1).astype(jnp.float32)
    Wrow = row_slab.shape[1]

    BB = min(block_rows, _round_up(B, 8))
    B_pad = _round_up(B, BB)
    if B_pad != B:
        row_slab = jnp.zeros((B_pad, Wrow), jnp.float32).at[:B].set(row_slab)
    grid = (B_pad // BB,)

    wd1, ww1, vec1 = arrays["wd1"], arrays["ww1"], arrays["vec1"]
    wd2, vec2 = arrays["wd2"], arrays["vec2"]

    def _vmem_limit(weight_arrays, extra_bytes):
        nbytes = sum(int(a.size) * a.dtype.itemsize for a in weight_arrays)
        return int(min(max(2 * (nbytes + extra_bytes) + (4 << 20), 16 << 20), 64 << 20))

    stage1 = pl.pallas_call(
        _make_stage1_kernel(meta),
        out_shape=jax.ShapeDtypeStruct((B_pad, 5 * D), jnp.float32),
        grid=grid,
        in_specs=[
            pl.BlockSpec((BB, Wrow), lambda b: (b, 0)),
            pl.BlockSpec(wd1.shape, lambda b: (0, 0)),   # weight slabs stay resident
            pl.BlockSpec(ww1.shape, lambda b: (0, 0)),
            pl.BlockSpec(vec1.shape, lambda b: (0, 0)),
        ],
        out_specs=pl.BlockSpec((BB, 5 * D), lambda b: (b, 0)),
        compiler_params=pltpu.CompilerParams(
            dimension_semantics=("parallel",),
            vmem_limit_bytes=_vmem_limit((wd1, ww1, vec1),
                                         4 * BB * (Wrow + 5 * D + 8 * D))),
    )(row_slab, wd1, ww1, vec1)

    # full-batch [h_trans | nh] used for the exact cross-batch cosine similarity
    s1_head = stage1[:, :2 * D]

    # TODO(synk): for very large forward batches the resident [B, 2D] full-batch operand and
    # the [BB, B] sim tile should themselves be blocked (flash-style two-pass over key blocks).
    out = pl.pallas_call(
        _make_stage2_kernel(meta),
        out_shape=jax.ShapeDtypeStruct((B_pad, 1), jnp.float32),
        grid=grid,
        in_specs=[
            pl.BlockSpec((BB, Wrow), lambda b: (b, 0)),
            pl.BlockSpec((BB, 5 * D), lambda b: (b, 0)),
            pl.BlockSpec((B_pad, 2 * D), lambda b: (0, 0)),
            pl.BlockSpec(wd2.shape, lambda b: (0, 0)),
            pl.BlockSpec(vec2.shape, lambda b: (0, 0)),
        ],
        out_specs=pl.BlockSpec((BB, 1), lambda b: (b, 0)),
        scratch_shapes=[pltpu.VMEM((BB, D * D), jnp.float32)],
        compiler_params=pltpu.CompilerParams(
            dimension_semantics=("parallel",),
            vmem_limit_bytes=_vmem_limit(
                (wd2, vec2),
                4 * (B_pad * 2 * D + BB * (Wrow + 5 * D + D * D + B_pad)))),
    )(row_slab, stage1, s1_head, wd2, vec2)

    return out[:B]


# ----------------------------------------------------------------------------- main
if __name__ == "__main__":
    NUM_USERS, NUM_ITEMS = 10, 12
    INPUT_DIM, D_MODEL, NUM_HEADS, D_FF = 16, 32, 4, 64
    NUM_LAYERS, NUM_TARGETS = 1, 1
    B = 8

    key = jax.random.PRNGKey(0)
    pk, uk, ik = jax.random.split(key, 3)
    params = init_params(
        pk,
        num_users=NUM_USERS,
        num_items=NUM_ITEMS,
        input_dim=INPUT_DIM,
        d_model=D_MODEL,
        d_ff=D_FF,
        num_layers=NUM_LAYERS,
    )
    arrays, meta = prepare_params(params)   # one-time inference prep (fusions / slab packing)

    user_indices = jax.random.randint(uk, (B,), 0, NUM_USERS, dtype=jnp.int32)
    item_indices = jax.random.randint(ik, (B,), 0, NUM_ITEMS, dtype=jnp.int32)

    fwd = jax.jit(lambda a, u, i: scoreformer_forward(a, meta, u, i))
    out = fwd(arrays, user_indices, item_indices)
    jax.block_until_ready(out)
    assert out.shape == (B, NUM_TARGETS), out.shape
    assert bool(jnp.all(jnp.isfinite(out)))
    print("KERNEL_OK")
</pallas_src>

<mosaic_0001>
module attributes {stable_mosaic.version = 11 : i64} {
  func.func @kernel(%arg0: i32, %arg1: memref<8x75xf32, #tpu.memory_space<vmem>>, %arg2: memref<128x32xbf16, #tpu.memory_space<vmem>>, %arg3: memref<64x128xbf16, #tpu.memory_space<vmem>>, %arg4: memref<136x128xf32, #tpu.memory_space<vmem>>, %arg5: memref<8x160xf32, #tpu.memory_space<vmem>>) attributes {dimension_semantics = [#tpu.dimension_semantics<parallel>], iteration_bounds = array<i64: 1>, scalar_prefetch = 0 : i64, scratch_operands = 0 : i64, tpu.core_type = #tpu.core_type<tc>, window_params = [{transform_indices = @transform_0, window_bounds = array<i64: 8, 75>}, {pipeline_mode = #tpu.pipeline_mode<synchronous>, transform_indices = @transform_1, window_bounds = array<i64: 128, 32>}, {pipeline_mode = #tpu.pipeline_mode<synchronous>, transform_indices = @transform_2, window_bounds = array<i64: 64, 128>}, {pipeline_mode = #tpu.pipeline_mode<synchronous>, transform_indices = @transform_3, window_bounds = array<i64: 136, 128>}, {transform_indices = @transform_4, window_bounds = array<i64: 8, 160>}]} {
    %c0 = arith.constant 0 : index
    %c0_0 = arith.constant 0 : index
    %0 = vector.load %arg1[%c0, %c0_0] : memref<8x75xf32, #tpu.memory_space<vmem>>, vector<8x32xf32>
    %c0_1 = arith.constant 0 : index
    %c74 = arith.constant 74 : index
    %1 = vector.load %arg1[%c0_1, %c74] : memref<8x75xf32, #tpu.memory_space<vmem>>, vector<8x1xf32>
    %c0_2 = arith.constant 0 : index
    %c0_3 = arith.constant 0 : index
    %2 = vector.load %arg2[%c0_2, %c0_3] : memref<128x32xbf16, #tpu.memory_space<vmem>>, vector<32x32xbf16>
    %3 = arith.truncf %0 : vector<8x32xf32> to vector<8x32xbf16>
    %cst = arith.constant dense<0.000000e+00> : vector<8x32xf32>
    %4 = tpu.matmul %3, %2, %cst {dimension_numbers = #tpu.dot_dimension_numbers<[1], [0], [0], [1], [0, 0, 1, 1], [], []>} : vector<8x32xbf16>, vector<32x32xbf16>, vector<8x32xf32> -> vector<8x32xf32>
    %c0_4 = arith.constant 0 : index
    %c0_5 = arith.constant 0 : index
    %5 = vector.load %arg4[%c0_4, %c0_5] : memref<136x128xf32, #tpu.memory_space<vmem>>, vector<1x32xf32>
    %6 = vector.broadcast %5 : vector<1x32xf32> to vector<8x32xf32>
    %7 = arith.addf %4, %6 : vector<8x32xf32>
    %cst_6 = arith.constant dense<0.000000e+00> : vector<8xf32>
    %8 = vector.multi_reduction <add>, %7, %cst_6 [1] : vector<8x32xf32> to vector<8xf32>
    %9 = vector.shape_cast %8 : vector<8xf32> to vector<8x1xf32>
    %cst_7 = arith.constant 3.125000e-02 : f32
    %10 = vector.broadcast %cst_7 : f32 to vector<8x1xf32>
    %11 = arith.mulf %9, %10 : vector<8x1xf32>
    %12 = arith.mulf %7, %7 : vector<8x32xf32>
    %cst_8 = arith.constant dense<0.000000e+00> : vector<8xf32>
    %13 = vector.multi_reduction <add>, %12, %cst_8 [1] : vector<8x32xf32> to vector<8xf32>
    %14 = vector.shape_cast %13 : vector<8xf32> to vector<8x1xf32>
    %cst_9 = arith.constant 3.125000e-02 : f32
    %15 = vector.broadcast %cst_9 : f32 to vector<8x1xf32>
    %16 = arith.mulf %14, %15 : vector<8x1xf32>
    %17 = arith.mulf %11, %11 : vector<8x1xf32>
    %18 = arith.subf %16, %17 : vector<8x1xf32>
    %19 = vector.broadcast %11 : vector<8x1xf32> to vector<8x32xf32>
    %20 = arith.subf %7, %19 : vector<8x32xf32>
    %cst_10 = arith.constant 9.99999974E-6 : f32
    %21 = vector.broadcast %cst_10 : f32 to vector<8x1xf32>
    %22 = arith.addf %18, %21 : vector<8x1xf32>
    %23 = math.rsqrt %22 : vector<8x1xf32>
    %24 = vector.broadcast %23 : vector<8x1xf32> to vector<8x32xf32>
    %25 = arith.mulf %20, %24 : vector<8x32xf32>
    %c8 = arith.constant 8 : index
    %c0_11 = arith.constant 0 : index
    %26 = vector.load %arg4[%c8, %c0_11] : memref<136x128xf32, #tpu.memory_space<vmem>>, vector<1x32xf32>
    %27 = vector.broadcast %26 : vector<1x32xf32> to vector<8x32xf32>
    %28 = arith.mulf %25, %27 : vector<8x32xf32>
    %c16 = arith.constant 16 : index
    %c0_12 = arith.constant 0 : index
    %29 = vector.load %arg4[%c16, %c0_12] : memref<136x128xf32, #tpu.memory_space<vmem>>, vector<1x32xf32>
    %30 = vector.broadcast %29 : vector<1x32xf32> to vector<8x32xf32>
    %31 = arith.addf %28, %30 : vector<8x32xf32>
    %cst_13 = arith.constant 5.000000e-01 : f32
    %32 = vector.broadcast %cst_13 : f32 to vector<8x32xf32>
    %33 = arith.mulf %32, %31 : vector<8x32xf32>
    %cst_14 = arith.constant 4.471500e-02 : f32
    %34 = vector.broadcast %cst_14 : f32 to vector<8x32xf32>
    %35 = arith.mulf %34, %31 : vector<8x32xf32>
    %36 = arith.mulf %35, %31 : vector<8x32xf32>
    %37 = arith.mulf %36, %31 : vector<8x32xf32>
    %38 = arith.addf %31, %37 : vector<8x32xf32>
    %cst_15 = arith.constant 0.797884583 : f32
    %39 = vector.broadcast %cst_15 : f32 to vector<8x32xf32>
    %40 = arith.mulf %39, %38 : vector<8x32xf32>
    %41 = math.tanh %40 : vector<8x32xf32>
    %cst_16 = arith.constant 1.000000e+00 : f32
    %42 = vector.broadcast %cst_16 : f32 to vector<8x32xf32>
    %43 = arith.addf %42, %41 : vector<8x32xf32>
    %44 = arith.mulf %33, %43 : vector<8x32xf32>
    %cst_17 = arith.constant dense<0.000000e+00> : vector<8xf32>
    %45 = vector.multi_reduction <add>, %44, %cst_17 [1] : vector<8x32xf32> to vector<8xf32>
    %46 = vector.shape_cast %45 : vector<8xf32> to vector<8x1xf32>
    %cst_18 = arith.constant 3.125000e-02 : f32
    %47 = vector.broadcast %cst_18 : f32 to vector<8x1xf32>
    %48 = arith.mulf %46, %47 : vector<8x1xf32>
    %49 = arith.mulf %44, %44 : vector<8x32xf32>
    %cst_19 = arith.constant dense<0.000000e+00> : vector<8xf32>
    %50 = vector.multi_reduction <add>, %49, %cst_19 [1] : vector<8x32xf32> to vector<8xf32>
    %51 = vector.shape_cast %50 : vector<8xf32> to vector<8x1xf32>
    %cst_20 = arith.constant 3.125000e-02 : f32
    %52 = vector.broadcast %cst_20 : f32 to vector<8x1xf32>
    %53 = arith.mulf %51, %52 : vector<8x1xf32>
    %54 = arith.mulf %48, %48 : vector<8x1xf32>
    %55 = arith.subf %53, %54 : vector<8x1xf32>
    %56 = vector.broadcast %48 : vector<8x1xf32> to vector<8x32xf32>
    %57 = arith.subf %44, %56 : vector<8x32xf32>
    %cst_21 = arith.constant 9.99999974E-6 : f32
    %58 = vector.broadcast %cst_21 : f32 to vector<8x1xf32>
    %59 = arith.addf %55, %58 : vector<8x1xf32>
    %60 = math.rsqrt %59 : vector<8x1xf32>
    %61 = vector.broadcast %60 : vector<8x1xf32> to vector<8x32xf32>
    %62 = arith.mulf %57, %61 : vector<8x32xf32>
    %c24 = arith.constant 24 : index
    %c0_22 = arith.constant 0 : index
    %63 = vector.load %arg4[%c24, %c0_22] : memref<136x128xf32, #tpu.memory_space<vmem>>, vector<1x32xf32>
    %64 = vector.broadcast %63 : vector<1x32xf32> to vector<8x32xf32>
    %65 = arith.mulf %62, %64 : vector<8x32xf32>
    %c32 = arith.constant 32 : index
    %c0_23 = arith.constant 0 : index
    %66 = vector.load %arg4[%c32, %c0_23] : memref<136x128xf32, #tpu.memory_space<vmem>>, vector<1x32xf32>
    %67 = vector.broadcast %66 : vector<1x32xf32> to vector<8x32xf32>
    %68 = arith.addf %65, %67 : vector<8x32xf32>
    %c32_24 = arith.constant 32 : index
    %c0_25 = arith.constant 0 : index
    %69 = vector.load %arg2[%c32_24, %c0_25] : memref<128x32xbf16, #tpu.memory_space<vmem>>, vector<32x32xbf16>
    %70 = arith.truncf %68 : vector<8x32xf32> to vector<8x32xbf16>
    %cst_26 = arith.constant dense<0.000000e+00> : vector<8x32xf32>
    %71 = tpu.matmul %70, %69, %cst_26 {dimension_numbers = #tpu.dot_dimension_numbers<[1], [0], [0], [1], [0, 0, 1, 1], [], []>} : vector<8x32xbf16>, vector<32x32xbf16>, vector<8x32xf32> -> vector<8x32xf32>
    %c40 = arith.constant 40 : index
    %c0_27 = arith.constant 0 : index
    %72 = vector.load %arg4[%c40, %c0_27] : memref<136x128xf32, #tpu.memory_space<vmem>>, vector<1x32xf32>
    %73 = vector.broadcast %72 : vector<1x32xf32> to vector<8x32xf32>
    %74 = arith.addf %71, %73 : vector<8x32xf32>
    %75 = arith.addf %68, %74 : vector<8x32xf32>
    %cst_28 = arith.constant dense<0.000000e+00> : vector<8xf32>
    %76 = vector.multi_reduction <add>, %75, %cst_28 [1] : vector<8x32xf32> to vector<8xf32>
    %77 = vector.shape_cast %76 : vector<8xf32> to vector<8x1xf32>
    %cst_29 = arith.constant 3.125000e-02 : f32
    %78 = vector.broadcast %cst_29 : f32 to vector<8x1xf32>
    %79 = arith.mulf %77, %78 : vector<8x1xf32>
    %80 = arith.mulf %75, %75 : vector<8x32xf32>
    %cst_30 = arith.constant dense<0.000000e+00> : vector<8xf32>
    %81 = vector.multi_reduction <add>, %80, %cst_30 [1] : vector<8x32xf32> to vector<8xf32>
    %82 = vector.shape_cast %81 : vector<8xf32> to vector<8x1xf32>
    %cst_31 = arith.constant 3.125000e-02 : f32
    %83 = vector.broadcast %cst_31 : f32 to vector<8x1xf32>
    %84 = arith.mulf %82, %83 : vector<8x1xf32>
    %85 = arith.mulf %79, %79 : vector<8x1xf32>
    %86 = arith.subf %84, %85 : vector<8x1xf32>
    %87 = vector.broadcast %79 : vector<8x1xf32> to vector<8x32xf32>
    %88 = arith.subf %75, %87 : vector<8x32xf32>
    %cst_32 = arith.constant 9.99999974E-6 : f32
    %89 = vector.broadcast %cst_32 : f32 to vector<8x1xf32>
    %90 = arith.addf %86, %89 : vector<8x1xf32>
    %91 = math.rsqrt %90 : vector<8x1xf32>
    %92 = vector.broadcast %91 : vector<8x1xf32> to vector<8x32xf32>
    %93 = arith.mulf %88, %92 : vector<8x32xf32>
    %c48 = arith.constant 48 : index
    %c0_33 = arith.constant 0 : index
    %94 = vector.load %arg4[%c48, %c0_33] : memref<136x128xf32, #tpu.memory_space<vmem>>, vector<1x32xf32>
    %95 = vector.broadcast %94 : vector<1x32xf32> to vector<8x32xf32>
    %96 = arith.mulf %93, %95 : vector<8x32xf32>
    %c56 = arith.constant 56 : index
    %c0_34 = arith.constant 0 : index
    %97 = vector.load %arg4[%c56, %c0_34] : memref<136x128xf32, #tpu.memory_space<vmem>>, vector<1x32xf32>
    %98 = vector.broadcast %97 : vector<1x32xf32> to vector<8x32xf32>
    %99 = arith.addf %96, %98 : vector<8x32xf32>
    %c0_35 = arith.constant 0 : index
    %c0_36 = arith.constant 0 : index
    %100 = vector.load %arg3[%c0_35, %c0_36] : memref<64x128xbf16, #tpu.memory_space<vmem>>, vector<32x128xbf16>
    %101 = arith.truncf %99 : vector<8x32xf32> to vector<8x32xbf16>
    %cst_37 = arith.constant dense<0.000000e+00> : vector<8x128xf32>
    %102 = tpu.matmul %101, %100, %cst_37 {dimension_numbers = #tpu.dot_dimension_numbers<[1], [0], [0], [1], [0, 0, 1, 1], [], []>} : vector<8x32xbf16>, vector<32x128xbf16>, vector<8x128xf32> -> vector<8x128xf32>
    %103 = vector.extract_strided_slice %102 {offsets = [0, 0], sizes = [8, 64], strides = [1, 1]} : vector<8x128xf32> to vector<8x64xf32>
    %c64 = arith.constant 64 : index
    %c0_38 = arith.constant 0 : index
    %104 = vector.load %arg4[%c64, %c0_38] : memref<136x128xf32, #tpu.memory_space<vmem>>, vector<1x64xf32>
    %105 = vector.broadcast %104 : vector<1x64xf32> to vector<8x64xf32>
    %106 = arith.addf %103, %105 : vector<8x64xf32>
    %cst_39 = arith.constant 5.000000e-01 : f32
    %107 = vector.broadcast %cst_39 : f32 to vector<8x64xf32>
    %108 = arith.mulf %107, %106 : vector<8x64xf32>
    %cst_40 = arith.constant 4.471500e-02 : f32
    %109 = vector.broadcast %cst_40 : f32 to vector<8x64xf32>
    %110 = arith.mulf %109, %106 : vector<8x64xf32>
    %111 = arith.mulf %110, %106 : vector<8x64xf32>
    %112 = arith.mulf %111, %106 : vector<8x64xf32>
    %113 = arith.addf %106, %112 : vector<8x64xf32>
    %cst_41 = arith.constant 0.797884583 : f32
    %114 = vector.broadcast %cst_41 : f32 to vector<8x64xf32>
    %115 = arith.mulf %114, %113 : vector<8x64xf32>
    %116 = math.tanh %115 : vector<8x64xf32>
    %cst_42 = arith.constant 1.000000e+00 : f32
    %117 = vector.broadcast %cst_42 : f32 to vector<8x64xf32>
    %118 = arith.addf %117, %116 : vector<8x64xf32>
    %119 = arith.mulf %108, %118 : vector<8x64xf32>
    %c64_43 = arith.constant 64 : index
    %c0_44 = arith.constant 0 : index
    %120 = vector.load %arg2[%c64_43, %c0_44] : memref<128x32xbf16, #tpu.memory_space<vmem>>, vector<64x32xbf16>
    %121 = arith.truncf %119 : vector<8x64xf32> to vector<8x64xbf16>
    %cst_45 = arith.constant dense<0.000000e+00> : vector<8x32xf32>
    %122 = tpu.matmul %121, %120, %cst_45 {dimension_numbers = #tpu.dot_dimension_numbers<[1], [0], [0], [1], [0, 0, 1, 1], [], []>} : vector<8x64xbf16>, vector<64x32xbf16>, vector<8x32xf32> -> vector<8x32xf32>
    %c72 = arith.constant 72 : index
    %c0_46 = arith.constant 0 : index
    %123 = vector.load %arg4[%c72, %c0_46] : memref<136x128xf32, #tpu.memory_space<vmem>>, vector<1x32xf32>
    %124 = vector.broadcast %123 : vector<1x32xf32> to vector<8x32xf32>
    %125 = arith.addf %122, %124 : vector<8x32xf32>
    %126 = arith.addf %99, %125 : vector<8x32xf32>
    %cst_47 = arith.constant dense<0.000000e+00> : vector<8xf32>
    %127 = vector.multi_reduction <add>, %126, %cst_47 [1] : vector<8x32xf32> to vector<8xf32>
    %128 = vector.shape_cast %127 : vector<8xf32> to vector<8x1xf32>
    %cst_48 = arith.constant 3.125000e-02 : f32
    %129 = vector.broadcast %cst_48 : f32 to vector<8x1xf32>
    %130 = arith.mulf %128, %129 : vector<8x1xf32>
    %131 = arith.mulf %126, %126 : vector<8x32xf32>
    %cst_49 = arith.constant dense<0.000000e+00> : vector<8xf32>
    %132 = vector.multi_reduction <add>, %131, %cst_49 [1] : vector<8x32xf32> to vector<8xf32>
    %133 = vector.shape_cast %132 : vector<8xf32> to vector<8x1xf32>
    %cst_50 = arith.constant 3.125000e-02 : f32
    %134 = vector.broadcast %cst_50 : f32 to vector<8x1xf32>
    %135 = arith.mulf %133, %134 : vector<8x1xf32>
    %136 = arith.mulf %130, %130 : vector<8x1xf32>
    %137 = arith.subf %135, %136 : vector<8x1xf32>
    %138 = vector.broadcast %130 : vector<8x1xf32> to vector<8x32xf32>
    %139 = arith.subf %126, %138 : vector<8x32xf32>
    %cst_51 = arith.constant 9.99999974E-6 : f32
    %140 = vector.broadcast %cst_51 : f32 to vector<8x1xf32>
    %141 = arith.addf %137, %140 : vector<8x1xf32>
    %142 = math.rsqrt %141 : vector<8x1xf32>
    %143 = vector.broadcast %142 : vector<8x1xf32> to vector<8x32xf32>
    %144 = arith.mulf %139, %143 : vector<8x32xf32>
    %c80 = arith.constant 80 : index
    %c0_52 = arith.constant 0 : index
    %145 = vector.load %arg4[%c80, %c0_52] : memref<136x128xf32, #tpu.memory_space<vmem>>, vector<1x32xf32>
    %146 = vector.broadcast %145 : vector<1x32xf32> to vector<8x32xf32>
    %147 = arith.mulf %144, %146 : vector<8x32xf32>
    %c88 = arith.constant 88 : index
    %c0_53 = arith.constant 0 : index
    %148 = vector.load %arg4[%c88, %c0_53] : memref<136x128xf32, #tpu.memory_space<vmem>>, vector<1x32xf32>
    %149 = vector.broadcast %148 : vector<1x32xf32> to vector<8x32xf32>
    %150 = arith.addf %147, %149 : vector<8x32xf32>
    %cst_54 = arith.constant 8.000000e-01 : f32
    %151 = vector.broadcast %cst_54 : f32 to vector<8x32xf32>
    %152 = arith.mulf %151, %150 : vector<8x32xf32>
    %cst_55 = arith.constant 2.000000e-01 : f32
    %153 = vector.broadcast %cst_55 : f32 to vector<8x32xf32>
    %154 = arith.mulf %153, %44 : vector<8x32xf32>
    %155 = arith.addf %152, %154 : vector<8x32xf32>
    %c32_56 = arith.constant 32 : index
    %c0_57 = arith.constant 0 : index
    %156 = vector.load %arg3[%c32_56, %c0_57] : memref<64x128xbf16, #tpu.memory_space<vmem>>, vector<32x128xbf16>
    %157 = arith.truncf %155 : vector<8x32xf32> to vector<8x32xbf16>
    %cst_58 = arith.constant dense<0.000000e+00> : vector<8x128xf32>
    %158 = tpu.matmul %157, %156, %cst_58 {dimension_numbers = #tpu.dot_dimension_numbers<[1], [0], [0], [1], [0, 0, 1, 1], [], []>} : vector<8x32xbf16>, vector<32x128xbf16>, vector<8x128xf32> -> vector<8x128xf32>
    %c96 = arith.constant 96 : index
    %c0_59 = arith.constant 0 : index
    %159 = vector.load %arg4[%c96, %c0_59] : memref<136x128xf32, #tpu.memory_space<vmem>>, vector<1x128xf32>
    %160 = vector.broadcast %159 : vector<1x128xf32> to vector<8x128xf32>
    %161 = arith.addf %158, %160 : vector<8x128xf32>
    %162 = vector.extract_strided_slice %161 {offsets = [0, 0], sizes = [8, 32], strides = [1, 1]} : vector<8x128xf32> to vector<8x32xf32>
    %cst_60 = arith.constant dense<0.000000e+00> : vector<8xf32>
    %163 = vector.multi_reduction <add>, %162, %cst_60 [1] : vector<8x32xf32> to vector<8xf32>
    %164 = vector.shape_cast %163 : vector<8xf32> to vector<8x1xf32>
    %cst_61 = arith.constant 3.125000e-02 : f32
    %165 = vector.broadcast %cst_61 : f32 to vector<8x1xf32>
    %166 = arith.mulf %164, %165 : vector<8x1xf32>
    %167 = arith.mulf %162, %162 : vector<8x32xf32>
    %cst_62 = arith.constant dense<0.000000e+00> : vector<8xf32>
    %168 = vector.multi_reduction <add>, %167, %cst_62 [1] : vector<8x32xf32> to vector<8xf32>
    %169 = vector.shape_cast %168 : vector<8xf32> to vector<8x1xf32>
    %cst_63 = arith.constant 3.125000e-02 : f32
    %170 = vector.broadcast %cst_63 : f32 to vector<8x1xf32>
    %171 = arith.mulf %169, %170 : vector<8x1xf32>
    %172 = arith.mulf %166, %166 : vector<8x1xf32>
    %173 = arith.subf %171, %172 : vector<8x1xf32>
    %174 = vector.broadcast %166 : vector<8x1xf32> to vector<8x32xf32>
    %175 = arith.subf %162, %174 : vector<8x32xf32>
    %cst_64 = arith.constant 9.99999974E-6 : f32
    %176 = vector.broadcast %cst_64 : f32 to vector<8x1xf32>
    %177 = arith.addf %173, %176 : vector<8x1xf32>
    %178 = math.rsqrt %177 : vector<8x1xf32>
    %179 = vector.broadcast %178 : vector<8x1xf32> to vector<8x32xf32>
    %180 = arith.mulf %175, %179 : vector<8x32xf32>
    %c104 = arith.constant 104 : index
    %c0_65 = arith.constant 0 : index
    %181 = vector.load %arg4[%c104, %c0_65] : memref<136x128xf32, #tpu.memory_space<vmem>>, vector<1x32xf32>
    %182 = vector.broadcast %181 : vector<1x32xf32> to vector<8x32xf32>
    %183 = arith.mulf %180, %182 : vector<8x32xf32>
    %c112 = arith.constant 112 : index
    %c0_66 = arith.constant 0 : index
    %184 = vector.load %arg4[%c112, %c0_66] : memref<136x128xf32, #tpu.memory_space<vmem>>, vector<1x32xf32>
    %185 = vector.broadcast %184 : vector<1x32xf32> to vector<8x32xf32>
    %186 = arith.addf %183, %185 : vector<8x32xf32>
    %cst_67 = arith.constant 5.000000e-01 : f32
    %187 = vector.broadcast %cst_67 : f32 to vector<8x32xf32>
    %188 = arith.mulf %187, %186 : vector<8x32xf32>
    %cst_68 = arith.constant 4.471500e-02 : f32
    %189 = vector.broadcast %cst_68 : f32 to vector<8x32xf32>
    %190 = arith.mulf %189, %186 : vector<8x32xf32>
    %191 = arith.mulf %190, %186 : vector<8x32xf32>
    %192 = arith.mulf %191, %186 : vector<8x32xf32>
    %193 = arith.addf %186, %192 : vector<8x32xf32>
    %cst_69 = arith.constant 0.797884583 : f32
    %194 = vector.broadcast %cst_69 : f32 to vector<8x32xf32>
    %195 = arith.mulf %194, %193 : vector<8x32xf32>
    %196 = math.tanh %195 : vector<8x32xf32>
    %cst_70 = arith.constant 1.000000e+00 : f32
    %197 = vector.broadcast %cst_70 : f32 to vector<8x32xf32>
    %198 = arith.addf %197, %196 : vector<8x32xf32>
    %199 = arith.mulf %188, %198 : vector<8x32xf32>
    %200 = vector.extract_strided_slice %161 {offsets = [0, 64], sizes = [8, 32], strides = [1, 1]} : vector<8x128xf32> to vector<8x32xf32>
    %cst_71 = arith.constant dense<0.000000e+00> : vector<8xf32>
    %201 = vector.multi_reduction <add>, %200, %cst_71 [1] : vector<8x32xf32> to vector<8xf32>
    %202 = vector.shape_cast %201 : vector<8xf32> to vector<8x1xf32>
    %cst_72 = arith.constant 3.125000e-02 : f32
    %203 = vector.broadcast %cst_72 : f32 to vector<8x1xf32>
    %204 = arith.mulf %202, %203 : vector<8x1xf32>
    %205 = arith.mulf %200, %200 : vector<8x32xf32>
    %cst_73 = arith.constant dense<0.000000e+00> : vector<8xf32>
    %206 = vector.multi_reduction <add>, %205, %cst_73 [1] : vector<8x32xf32> to vector<8xf32>
    %207 = vector.shape_cast %206 : vector<8xf32> to vector<8x1xf32>
    %cst_74 = arith.constant 3.125000e-02 : f32
    %208 = vector.broadcast %cst_74 : f32 to vector<8x1xf32>
    %209 = arith.mulf %207, %208 : vector<8x1xf32>
    %210 = arith.mulf %204, %204 : vector<8x1xf32>
    %211 = arith.subf %209, %210 : vector<8x1xf32>
    %212 = vector.broadcast %204 : vector<8x1xf32> to vector<8x32xf32>
    %213 = arith.subf %200, %212 : vector<8x32xf32>
    %cst_75 = arith.constant 9.99999974E-6 : f32
    %214 = vector.broadcast %cst_75 : f32 to vector<8x1xf32>
    %215 = arith.addf %211, %214 : vector<8x1xf32>
    %216 = math.rsqrt %215 : vector<8x1xf32>
    %217 = vector.broadcast %216 : vector<8x1xf32> to vector<8x32xf32>
    %218 = arith.mulf %213, %217 : vector<8x32xf32>
    %c120 = arith.constant 120 : index
    %c0_76 = arith.constant 0 : index
    %219 = vector.load %arg4[%c120, %c0_76] : memref<136x128xf32, #tpu.memory_space<vmem>>, vector<1x32xf32>
    %220 = vector.broadcast %219 : vector<1x32xf32> to vector<8x32xf32>
    %221 = arith.mulf %218, %220 : vector<8x32xf32>
    %c128 = arith.constant 128 : index
    %c0_77 = arith.constant 0 : index
    %222 = vector.load %arg4[%c128, %c0_77] : memref<136x128xf32, #tpu.memory_space<vmem>>, vector<1x32xf32>
    %223 = vector.broadcast %222 : vector<1x32xf32> to vector<8x32xf32>
    %224 = arith.addf %221, %223 : vector<8x32xf32>
    %225 = math.tanh %224 : vector<8x32xf32>
    %226 = arith.mulf %225, %225 : vector<8x32xf32>
    %cst_78 = arith.constant dense<0.000000e+00> : vector<8xf32>
    %227 = vector.multi_reduction <add>, %226, %cst_78 [1] : vector<8x32xf32> to vector<8xf32>
    %228 = vector.shape_cast %227 : vector<8xf32> to vector<8x1xf32>
    %229 = math.sqrt %228 : vector<8x1xf32>
    %cst_79 = arith.constant 9.99999996E-13 : f32
    %230 = vector.broadcast %cst_79 : f32 to vector<8x1xf32>
    %231 = arith.maximumf %229, %230 : vector<8x1xf32>
    %232 = vector.broadcast %231 : vector<8x1xf32> to vector<8x32xf32>
    %233 = arith.divf %225, %232 : vector<8x32xf32>
    %234 = vector.broadcast %1 : vector<8x1xf32> to vector<8x32xf32>
    %235 = arith.mulf %233, %234 : vector<8x32xf32>
    %c0_80 = arith.constant 0 : index
    %c0_81 = arith.constant 0 : index
    %236 = vector.load %arg5[%c0_80, %c0_81] : memref<8x160xf32, #tpu.memory_space<vmem>>, vector<8x32xf32>
    tpu.vector_store %arg5[%c0_80, %c0_81], %155 {strides = array<i32>} : memref<8x160xf32, #tpu.memory_space<vmem>>, vector<8x32xf32>,
    %c0_82 = arith.constant 0 : index
    %c32_83 = arith.constant 32 : index
    %237 = vector.load %arg5[%c0_82, %c32_83] : memref<8x160xf32, #tpu.memory_space<vmem>>, vector<8x32xf32>
    tpu.vector_store %arg5[%c0_82, %c32_83], %235 {strides = array<i32>} : memref<8x160xf32, #tpu.memory_space<vmem>>, vector<8x32xf32>,
    %c0_84 = arith.constant 0 : index
    %c64_85 = arith.constant 64 : index
    %238 = vector.load %arg5[%c0_84, %c64_85] : memref<8x160xf32, #tpu.memory_space<vmem>>, vector<8x32xf32>
    tpu.vector_store %arg5[%c0_84, %c64_85], %199 {strides = array<i32>} : memref<8x160xf32, #tpu.memory_space<vmem>>, vector<8x32xf32>,
    %239 = vector.extract_strided_slice %161 {offsets = [0, 32], sizes = [8, 32], strides = [1, 1]} : vector<8x128xf32> to vector<8x32xf32>
    %c0_86 = arith.constant 0 : index
    %c96_87 = arith.constant 96 : index
    %240 = vector.load %arg5[%c0_86, %c96_87] : memref<8x160xf32, #tpu.memory_space<vmem>>, vector<8x32xf32>
    tpu.vector_store %arg5[%c0_86, %c96_87], %239 {strides = array<i32>} : memref<8x160xf32, #tpu.memory_space<vmem>>, vector<8x32xf32>,
    %241 = vector.extract_strided_slice %161 {offsets = [0, 96], sizes = [8, 32], strides = [1, 1]} : vector<8x128xf32> to vector<8x32xf32>
    %c0_88 = arith.constant 0 : index
    %c128_89 = arith.constant 128 : index
    %242 = vector.load %arg5[%c0_88, %c128_89] : memref<8x160xf32, #tpu.memory_space<vmem>>, vector<8x32xf32>
    tpu.vector_store %arg5[%c0_88, %c128_89], %241 {strides = array<i32>} : memref<8x160xf32, #tpu.memory_space<vmem>>, vector<8x32xf32>,
    return
  }
  func.func @transform_0(%arg0: i32) -> (i32, i32) {
    %c0_i32 = arith.constant 0 : i32
    %c0_i32_0 = arith.constant 0 : i32
    return %arg0, %c0_i32 : i32, i32
  }
  func.func @transform_1(%arg0: i32) -> (i32, i32) {
    %c0_i32 = arith.constant 0 : i32
    %c0_i32_0 = arith.constant 0 : i32
    %c0_i32_1 = arith.constant 0 : i32
    return %c0_i32, %c0_i32_0 : i32, i32
  }
  func.func @transform_2(%arg0: i32) -> (i32, i32) {
    %c0_i32 = arith.constant 0 : i32
    %c0_i32_0 = arith.constant 0 : i32
    %c0_i32_1 = arith.constant 0 : i32
    return %c0_i32, %c0_i32_0 : i32, i32
  }
  func.func @transform_3(%arg0: i32) -> (i32, i32) {
    %c0_i32 = arith.constant 0 : i32
    %c0_i32_0 = arith.constant 0 : i32
    %c0_i32_1 = arith.constant 0 : i32
    return %c0_i32, %c0_i32_0 : i32, i32
  }
  func.func @transform_4(%arg0: i32) -> (i32, i32) {
    %c0_i32 = arith.constant 0 : i32
    %c0_i32_0 = arith.constant 0 : i32
    return %arg0, %c0_i32 : i32, i32
  }
}

module attributes {stable_mosaic.version = 11 : i64} {
  func.func @kernel(%arg0: i32, %arg1: memref<8x75xf32, #tpu.memory_space<vmem>>, %arg2: memref<8x160xf32, #tpu.memory_space<vmem>>, %arg3: memref<8x64xf32, #tpu.memory_space<vmem>>, %arg4: memref<1464x32xbf16, #tpu.memory_space<vmem>>, %arg5: memref<336x32xf32, #tpu.memory_space<vmem>>, %arg6: memref<8x1xf32, #tpu.memory_space<vmem>>, %arg7: memref<8x1024xf32, #tpu.memory_space<vmem>>) attributes {dimension_semantics = [#tpu.dimension_semantics<parallel>], iteration_bounds = array<i64: 1>, scalar_prefetch = 0 : i64, scratch_operands = 1 : i64, tpu.core_type = #tpu.core_type<tc>, window_params = [{transform_indices = @transform_0, window_bounds = array<i64: 8, 75>}, {transform_indices = @transform_1, window_bounds = array<i64: 8, 160>}, {pipeline_mode = #tpu.pipeline_mode<synchronous>, transform_indices = @transform_2, window_bounds = array<i64: 8, 64>}, {pipeline_mode = #tpu.pipeline_mode<synchronous>, transform_indices = @transform_3, window_bounds = array<i64: 1464, 32>}, {pipeline_mode = #tpu.pipeline_mode<synchronous>, transform_indices = @transform_4, window_bounds = array<i64: 336, 32>}, {transform_indices = @transform_5, window_bounds = array<i64: 8, 1>}]} {
    %c0 = arith.constant 0 : index
    %c0_0 = arith.constant 0 : index
    %0 = vector.load %arg1[%c0, %c0_0] : memref<8x75xf32, #tpu.memory_space<vmem>>, vector<8x16xf32>
    %c0_1 = arith.constant 0 : index
    %c16 = arith.constant 16 : index
    %1 = vector.load %arg1[%c0_1, %c16] : memref<8x75xf32, #tpu.memory_space<vmem>>, vector<8x16xf32>
    %c0_2 = arith.constant 0 : index
    %c32 = arith.constant 32 : index
    %2 = vector.load %arg1[%c0_2, %c32] : memref<8x75xf32, #tpu.memory_space<vmem>>, vector<8x16xf32>
    %c0_3 = arith.constant 0 : index
    %c48 = arith.constant 48 : index
    %3 = vector.load %arg1[%c0_3, %c48] : memref<8x75xf32, #tpu.memory_space<vmem>>, vector<8x16xf32>
    %c0_4 = arith.constant 0 : index
    %c64 = arith.constant 64 : index
    %4 = vector.load %arg1[%c0_4, %c64] : memref<8x75xf32, #tpu.memory_space<vmem>>, vector<8x1xf32>
    %c0_5 = arith.constant 0 : index
    %c65 = arith.constant 65 : index
    %5 = vector.load %arg1[%c0_5, %c65] : memref<8x75xf32, #tpu.memory_space<vmem>>, vector<8x8xf32>
    %c0_6 = arith.constant 0 : index
    %c73 = arith.constant 73 : index
    %6 = vector.load %arg1[%c0_6, %c73] : memref<8x75xf32, #tpu.memory_space<vmem>>, vector<8x1xf32>
    %c0_7 = arith.constant 0 : index
    %c0_8 = arith.constant 0 : index
    %7 = vector.load %arg2[%c0_7, %c0_8] : memref<8x160xf32, #tpu.memory_space<vmem>>, vector<8x32xf32>
    %c0_9 = arith.constant 0 : index
    %c32_10 = arith.constant 32 : index
    %8 = vector.load %arg2[%c0_9, %c32_10] : memref<8x160xf32, #tpu.memory_space<vmem>>, vector<8x32xf32>
    %c0_11 = arith.constant 0 : index
    %c64_12 = arith.constant 64 : index
    %9 = vector.load %arg2[%c0_11, %c64_12] : memref<8x160xf32, #tpu.memory_space<vmem>>, vector<8x32xf32>
    %c0_13 = arith.constant 0 : index
    %c96 = arith.constant 96 : index
    %10 = vector.load %arg2[%c0_13, %c96] : memref<8x160xf32, #tpu.memory_space<vmem>>, vector<8x32xf32>
    %c0_14 = arith.constant 0 : index
    %c128 = arith.constant 128 : index
    %11 = vector.load %arg2[%c0_14, %c128] : memref<8x160xf32, #tpu.memory_space<vmem>>, vector<8x32xf32>
    %c0_15 = arith.constant 0 : index
    %c0_16 = arith.constant 0 : index
    %12 = vector.load %arg3[%c0_15, %c0_16] : memref<8x64xf32, #tpu.memory_space<vmem>>, vector<8x32xf32>
    %c0_17 = arith.constant 0 : index
    %c32_18 = arith.constant 32 : index
    %13 = vector.load %arg3[%c0_17, %c32_18] : memref<8x64xf32, #tpu.memory_space<vmem>>, vector<8x32xf32>
    %cst = arith.constant dense<0.000000e+00> : vector<8x8xf32>
    %14 = tpu.matmul %8, %13, %cst {dimension_numbers = #tpu.dot_dimension_numbers<[1], [1], [0], [0], [0, 0, 1, 0], [], []>} : vector<8x32xf32>, vector<8x32xf32>, vector<8x8xf32> -> vector<8x8xf32>
    %cst_19 = arith.constant dense<0.000000e+00> : vector<8x32xf32>
    %15 = tpu.matmul %14, %12, %cst_19 {dimension_numbers = #tpu.dot_dimension_numbers<[1], [0], [0], [1], [0, 0, 1, 1], [], []>} : vector<8x8xf32>, vector<8x32xf32>, vector<8x32xf32> -> vector<8x32xf32>
    %cst_20 = arith.constant dense<0.000000e+00> : vector<8xf32>
    %16 = vector.multi_reduction <add>, %14, %cst_20 [1] : vector<8x8xf32> to vector<8xf32>
    %17 = vector.shape_cast %16 : vector<8xf32> to vector<8x1xf32>
    %cst_21 = arith.constant 9.99999993E-9 : f32
    %18 = vector.broadcast %cst_21 : f32 to vector<8x1xf32>
    %19 = arith.addf %17, %18 : vector<8x1xf32>
    %20 = vector.broadcast %19 : vector<8x1xf32> to vector<8x32xf32>
    %21 = arith.divf %15, %20 : vector<8x32xf32>
    %cst_22 = arith.constant 2.000000e-01 : f32
    %22 = vector.broadcast %cst_22 : f32 to vector<8x32xf32>
    %23 = arith.mulf %22, %21 : vector<8x32xf32>
    %24 = arith.addf %10, %23 : vector<8x32xf32>
    %c0_23 = arith.constant 0 : index
    %c0_24 = arith.constant 0 : index
    %25 = vector.load %arg4[%c0_23, %c0_24] : memref<1464x32xbf16, #tpu.memory_space<vmem>>, vector<32x32xbf16>
    %26 = arith.truncf %24 : vector<8x32xf32> to vector<8x32xbf16>
    %cst_25 = arith.constant dense<0.000000e+00> : vector<8x32xf32>
    %27 = tpu.matmul %26, %25, %cst_25 {dimension_numbers = #tpu.dot_dimension_numbers<[1], [0], [0], [1], [0, 0, 1, 1], [], []>} : vector<8x32xbf16>, vector<32x32xbf16>, vector<8x32xf32> -> vector<8x32xf32>
    %c0_26 = arith.constant 0 : index
    %c0_27 = arith.constant 0 : index
    %28 = vector.load %arg5[%c0_26, %c0_27] : memref<336x32xf32, #tpu.memory_space<vmem>>, vector<1x32xf32>
    %29 = vector.broadcast %28 : vector<1x32xf32> to vector<8x32xf32>
    %30 = arith.addf %27, %29 : vector<8x32xf32>
    %cst_28 = arith.constant dense<0.000000e+00> : vector<8xf32>
    %31 = vector.multi_reduction <add>, %30, %cst_28 [1] : vector<8x32xf32> to vector<8xf32>
    %32 = vector.shape_cast %31 : vector<8xf32> to vector<8x1xf32>
    %cst_29 = arith.constant 3.125000e-02 : f32
    %33 = vector.broadcast %cst_29 : f32 to vector<8x1xf32>
    %34 = arith.mulf %32, %33 : vector<8x1xf32>
    %35 = arith.mulf %30, %30 : vector<8x32xf32>
    %cst_30 = arith.constant dense<0.000000e+00> : vector<8xf32>
    %36 = vector.multi_reduction <add>, %35, %cst_30 [1] : vector<8x32xf32> to vector<8xf32>
    %37 = vector.shape_cast %36 : vector<8xf32> to vector<8x1xf32>
    %cst_31 = arith.constant 3.125000e-02 : f32
    %38 = vector.broadcast %cst_31 : f32 to vector<8x1xf32>
    %39 = arith.mulf %37, %38 : vector<8x1xf32>
    %40 = arith.mulf %34, %34 : vector<8x1xf32>
    %41 = arith.subf %39, %40 : vector<8x1xf32>
    %42 = vector.broadcast %34 : vector<8x1xf32> to vector<8x32xf32>
    %43 = arith.subf %30, %42 : vector<8x32xf32>
    %cst_32 = arith.constant 9.99999974E-6 : f32
    %44 = vector.broadcast %cst_32 : f32 to vector<8x1xf32>
    %45 = arith.addf %41, %44 : vector<8x1xf32>
    %46 = math.rsqrt %45 : vector<8x1xf32>
    %47 = vector.broadcast %46 : vector<8x1xf32> to vector<8x32xf32>
    %48 = arith.mulf %43, %47 : vector<8x32xf32>
    %c8 = arith.constant 8 : index
    %c0_33 = arith.constant 0 : index
    %49 = vector.load %arg5[%c8, %c0_33] : memref<336x32xf32, #tpu.memory_space<vmem>>, vector<1x32xf32>
    %50 = vector.broadcast %49 : vector<1x32xf32> to vector<8x32xf32>
    %51 = arith.mulf %48, %50 : vector<8x32xf32>
    %c16_34 = arith.constant 16 : index
    %c0_35 = arith.constant 0 : index
    %52 = vector.load %arg5[%c16_34, %c0_35] : memref<336x32xf32, #tpu.memory_space<vmem>>, vector<1x32xf32>
    %53 = vector.broadcast %52 : vector<1x32xf32> to vector<8x32xf32>
    %54 = arith.addf %51, %53 : vector<8x32xf32>
    %cst_36 = arith.constant 5.000000e-01 : f32
    %55 = vector.broadcast %cst_36 : f32 to vector<8x32xf32>
    %56 = arith.mulf %55, %54 : vector<8x32xf32>
    %cst_37 = arith.constant 4.471500e-02 : f32
    %57 = vector.broadcast %cst_37 : f32 to vector<8x32xf32>
    %58 = arith.mulf %57, %54 : vector<8x32xf32>
    %59 = arith.mulf %58, %54 : vector<8x32xf32>
    %60 = arith.mulf %59, %54 : vector<8x32xf32>
    %61 = arith.addf %54, %60 : vector<8x32xf32>
    %cst_38 = arith.constant 0.797884583 : f32
    %62 = vector.broadcast %cst_38 : f32 to vector<8x32xf32>
    %63 = arith.mulf %62, %61 : vector<8x32xf32>
    %64 = math.tanh %63 : vector<8x32xf32>
    %cst_39 = arith.constant 1.000000e+00 : f32
    %65 = vector.broadcast %cst_39 : f32 to vector<8x32xf32>
    %66 = arith.addf %65, %64 : vector<8x32xf32>
    %67 = arith.mulf %56, %66 : vector<8x32xf32>
    %c32_40 = arith.constant 32 : index
    %c0_41 = arith.constant 0 : index
    %68 = vector.load %arg4[%c32_40, %c0_41] : memref<1464x32xbf16, #tpu.memory_space<vmem>>, vector<32x32xbf16>
    %69 = arith.truncf %11 : vector<8x32xf32> to vector<8x32xbf16>
    %cst_42 = arith.constant dense<0.000000e+00> : vector<8x32xf32>
    %70 = tpu.matmul %69, %68, %cst_42 {dimension_numbers = #tpu.dot_dimension_numbers<[1], [0], [0], [1], [0, 0, 1, 1], [], []>} : vector<8x32xbf16>, vector<32x32xbf16>, vector<8x32xf32> -> vector<8x32xf32>
    %c24 = arith.constant 24 : index
    %c0_43 = arith.constant 0 : index
    %71 = vector.load %arg5[%c24, %c0_43] : memref<336x32xf32, #tpu.memory_space<vmem>>, vector<1x32xf32>
    %72 = vector.broadcast %71 : vector<1x32xf32> to vector<8x32xf32>
    %73 = arith.addf %70, %72 : vector<8x32xf32>
    %cst_44 = arith.constant dense<0.000000e+00> : vector<8xf32>
    %74 = vector.multi_reduction <add>, %73, %cst_44 [1] : vector<8x32xf32> to vector<8xf32>
    %75 = vector.shape_cast %74 : vector<8xf32> to vector<8x1xf32>
    %cst_45 = arith.constant 3.125000e-02 : f32
    %76 = vector.broadcast %cst_45 : f32 to vector<8x1xf32>
    %77 = arith.mulf %75, %76 : vector<8x1xf32>
    %78 = arith.mulf %73, %73 : vector<8x32xf32>
    %cst_46 = arith.constant dense<0.000000e+00> : vector<8xf32>
    %79 = vector.multi_reduction <add>, %78, %cst_46 [1] : vector<8x32xf32> to vector<8xf32>
    %80 = vector.shape_cast %79 : vector<8xf32> to vector<8x1xf32>
    %cst_47 = arith.constant 3.125000e-02 : f32
    %81 = vector.broadcast %cst_47 : f32 to vector<8x1xf32>
    %82 = arith.mulf %80, %81 : vector<8x1xf32>
    %83 = arith.mulf %77, %77 : vector<8x1xf32>
    %84 = arith.subf %82, %83 : vector<8x1xf32>
    %85 = vector.broadcast %77 : vector<8x1xf32> to vector<8x32xf32>
    %86 = arith.subf %73, %85 : vector<8x32xf32>
    %cst_48 = arith.constant 9.99999974E-6 : f32
    %87 = vector.broadcast %cst_48 : f32 to vector<8x1xf32>
    %88 = arith.addf %84, %87 : vector<8x1xf32>
    %89 = math.rsqrt %88 : vector<8x1xf32>
    %90 = vector.broadcast %89 : vector<8x1xf32> to vector<8x32xf32>
    %91 = arith.mulf %86, %90 : vector<8x32xf32>
    %c32_49 = arith.constant 32 : index
    %c0_50 = arith.constant 0 : index
    %92 = vector.load %arg5[%c32_49, %c0_50] : memref<336x32xf32, #tpu.memory_space<vmem>>, vector<1x32xf32>
    %93 = vector.broadcast %92 : vector<1x32xf32> to vector<8x32xf32>
    %94 = arith.mulf %91, %93 : vector<8x32xf32>
    %c40 = arith.constant 40 : index
    %c0_51 = arith.constant 0 : index
    %95 = vector.load %arg5[%c40, %c0_51] : memref<336x32xf32, #tpu.memory_space<vmem>>, vector<1x32xf32>
    %96 = vector.broadcast %95 : vector<1x32xf32> to vector<8x32xf32>
    %97 = arith.addf %94, %96 : vector<8x32xf32>
    %cst_52 = arith.constant 5.000000e-01 : f32
    %98 = vector.broadcast %cst_52 : f32 to vector<8x32xf32>
    %99 = arith.mulf %98, %97 : vector<8x32xf32>
    %cst_53 = arith.constant 4.471500e-02 : f32
    %100 = vector.broadcast %cst_53 : f32 to vector<8x32xf32>
    %101 = arith.mulf %100, %97 : vector<8x32xf32>
    %102 = arith.mulf %101, %97 : vector<8x32xf32>
    %103 = arith.mulf %102, %97 : vector<8x32xf32>
    %104 = arith.addf %97, %103 : vector<8x32xf32>
    %cst_54 = arith.constant 0.797884583 : f32
    %105 = vector.broadcast %cst_54 : f32 to vector<8x32xf32>
    %106 = arith.mulf %105, %104 : vector<8x32xf32>
    %107 = math.tanh %106 : vector<8x32xf32>
    %cst_55 = arith.constant 1.000000e+00 : f32
    %108 = vector.broadcast %cst_55 : f32 to vector<8x32xf32>
    %109 = arith.addf %108, %107 : vector<8x32xf32>
    %110 = arith.mulf %99, %109 : vector<8x32xf32>
    %111 = tpu.concatenate %9, %67, %110 in 1 : vector<8x32xf32>, vector<8x32xf32>, vector<8x32xf32> -> vector<8x96xf32>
    %c64_56 = arith.constant 64 : index
    %c0_57 = arith.constant 0 : index
    %112 = vector.load %arg4[%c64_56, %c0_57] : memref<1464x32xbf16, #tpu.memory_space<vmem>>, vector<96x32xbf16>
    %113 = arith.truncf %111 : vector<8x96xf32> to vector<8x96xbf16>
    %cst_58 = arith.constant dense<0.000000e+00> : vector<8x32xf32>
    %114 = tpu.matmul %113, %112, %cst_58 {dimension_numbers = #tpu.dot_dimension_numbers<[1], [0], [0], [1], [0, 0, 1, 1], [], []>} : vector<8x96xbf16>, vector<96x32xbf16>, vector<8x32xf32> -> vector<8x32xf32>
    %115 = vector.extract_strided_slice %114 {offsets = [0, 0], sizes = [8, 3], strides = [1, 1]} : vector<8x32xf32> to vector<8x3xf32>
    %c48_59 = arith.constant 48 : index
    %c0_60 = arith.constant 0 : index
    %116 = vector.load %arg5[%c48_59, %c0_60] : memref<336x32xf32, #tpu.memory_space<vmem>>, vector<1x3xf32>
    %117 = vector.broadcast %116 : vector<1x3xf32> to vector<8x3xf32>
    %118 = arith.addf %115, %117 : vector<8x3xf32>
    %cst_61 = arith.constant dense<0xFF800000> : vector<8xf32>
    %119 = vector.multi_reduction <maximumf>, %118, %cst_61 [1] : vector<8x3xf32> to vector<8xf32>
    %120 = vector.shape_cast %119 : vector<8xf32> to vector<8x1xf32>
    %121 = vector.broadcast %120 : vector<8x1xf32> to vector<8x3xf32>
    %122 = arith.subf %118, %121 : vector<8x3xf32>
    %123 = math.exp %122 : vector<8x3xf32>
    %cst_62 = arith.constant dense<0.000000e+00> : vector<8xf32>
    %124 = vector.multi_reduction <add>, %123, %cst_62 [1] : vector<8x3xf32> to vector<8xf32>
    %125 = vector.shape_cast %124 : vector<8xf32> to vector<8x1xf32>
    %126 = vector.broadcast %125 : vector<8x1xf32> to vector<8x3xf32>
    %127 = arith.divf %123, %126 : vector<8x3xf32>
    %128 = vector.extract_strided_slice %127 {offsets = [0, 0], sizes = [8, 1], strides = [1, 1]} : vector<8x3xf32> to vector<8x1xf32>
    %cst_63 = arith.constant 1.200000e+00 : f32
    %129 = vector.broadcast %cst_63 : f32 to vector<8x1xf32>
    %130 = arith.mulf %129, %128 : vector<8x1xf32>
    %131 = vector.broadcast %130 : vector<8x1xf32> to vector<8x32xf32>
    %132 = arith.mulf %9, %131 : vector<8x32xf32>
    %133 = vector.extract_strided_slice %127 {offsets = [0, 1], sizes = [8, 1], strides = [1, 1]} : vector<8x3xf32> to vector<8x1xf32>
    %134 = vector.broadcast %133 : vector<8x1xf32> to vector<8x32xf32>
    %135 = arith.mulf %67, %134 : vector<8x32xf32>
    %136 = vector.extract_strided_slice %127 {offsets = [0, 2], sizes = [8, 1], strides = [1, 1]} : vector<8x3xf32> to vector<8x1xf32>
    %137 = vector.broadcast %136 : vector<8x1xf32> to vector<8x32xf32>
    %138 = arith.mulf %110, %137 : vector<8x32xf32>
    %139 = tpu.concatenate %132, %135, %138 in 1 : vector<8x32xf32>, vector<8x32xf32>, vector<8x32xf32> -> vector<8x96xf32>
    %c160 = arith.constant 160 : index
    %c0_64 = arith.constant 0 : index
    %140 = vector.load %arg4[%c160, %c0_64] : memref<1464x32xbf16, #tpu.memory_space<vmem>>, vector<96x32xbf16>
    %141 = arith.truncf %139 : vector<8x96xf32> to vector<8x96xbf16>
    %cst_65 = arith.constant dense<0.000000e+00> : vector<8x32xf32>
    %142 = tpu.matmul %141, %140, %cst_65 {dimension_numbers = #tpu.dot_dimension_numbers<[1], [0], [0], [1], [0, 0, 1, 1], [], []>} : vector<8x96xbf16>, vector<96x32xbf16>, vector<8x32xf32> -> vector<8x32xf32>
    %c56 = arith.constant 56 : index
    %c0_66 = arith.constant 0 : index
    %143 = vector.load %arg5[%c56, %c0_66] : memref<336x32xf32, #tpu.memory_space<vmem>>, vector<1x32xf32>
    %144 = vector.broadcast %143 : vector<1x32xf32> to vector<8x32xf32>
    %145 = arith.addf %142, %144 : vector<8x32xf32>
    %cst_67 = arith.constant dense<0.000000e+00> : vector<8xf32>
    %146 = vector.multi_reduction <add>, %145, %cst_67 [1] : vector<8x32xf32> to vector<8xf32>
    %147 = vector.shape_cast %146 : vector<8xf32> to vector<8x1xf32>
    %cst_68 = arith.constant 3.125000e-02 : f32
    %148 = vector.broadcast %cst_68 : f32 to vector<8x1xf32>
    %149 = arith.mulf %147, %148 : vector<8x1xf32>
    %150 = arith.mulf %145, %145 : vector<8x32xf32>
    %cst_69 = arith.constant dense<0.000000e+00> : vector<8xf32>
    %151 = vector.multi_reduction <add>, %150, %cst_69 [1] : vector<8x32xf32> to vector<8xf32>
    %152 = vector.shape_cast %151 : vector<8xf32> to vector<8x1xf32>
    %cst_70 = arith.constant 3.125000e-02 : f32
    %153 = vector.broadcast %cst_70 : f32 to vector<8x1xf32>
    %154 = arith.mulf %152, %153 : vector<8x1xf32>
    %155 = arith.mulf %149, %149 : vector<8x1xf32>
    %156 = arith.subf %154, %155 : vector<8x1xf32>
    %157 = vector.broadcast %149 : vector<8x1xf32> to vector<8x32xf32>
    %158 = arith.subf %145, %157 : vector<8x32xf32>
    %cst_71 = arith.constant 9.99999974E-6 : f32
    %159 = vector.broadcast %cst_71 : f32 to vector<8x1xf32>
    %160 = arith.addf %156, %159 : vector<8x1xf32>
    %161 = math.rsqrt %160 : vector<8x1xf32>
    %162 = vector.broadcast %161 : vector<8x1xf32> to vector<8x32xf32>
    %163 = arith.mulf %158, %162 : vector<8x32xf32>
    %c64_72 = arith.constant 64 : index
    %c0_73 = arith.constant 0 : index
    %164 = vector.load %arg5[%c64_72, %c0_73] : memref<336x32xf32, #tpu.memory_space<vmem>>, vector<1x32xf32>
    %165 = vector.broadcast %164 : vector<1x32xf32> to vector<8x32xf32>
    %166 = arith.mulf %163, %165 : vector<8x32xf32>
    %c72 = arith.constant 72 : index
    %c0_74 = arith.constant 0 : index
    %167 = vector.load %arg5[%c72, %c0_74] : memref<336x32xf32, #tpu.memory_space<vmem>>, vector<1x32xf32>
    %168 = vector.broadcast %167 : vector<1x32xf32> to vector<8x32xf32>
    %169 = arith.addf %166, %168 : vector<8x32xf32>
    %cst_75 = arith.constant 5.000000e-01 : f32
    %170 = vector.broadcast %cst_75 : f32 to vector<8x32xf32>
    %171 = arith.mulf %170, %169 : vector<8x32xf32>
    %cst_76 = arith.constant 4.471500e-02 : f32
    %172 = vector.broadcast %cst_76 : f32 to vector<8x32xf32>
    %173 = arith.mulf %172, %169 : vector<8x32xf32>
    %174 = arith.mulf %173, %169 : vector<8x32xf32>
    %175 = arith.mulf %174, %169 : vector<8x32xf32>
    %176 = arith.addf %169, %175 : vector<8x32xf32>
    %cst_77 = arith.constant 0.797884583 : f32
    %177 = vector.broadcast %cst_77 : f32 to vector<8x32xf32>
    %178 = arith.mulf %177, %176 : vector<8x32xf32>
    %179 = math.tanh %178 : vector<8x32xf32>
    %cst_78 = arith.constant 1.000000e+00 : f32
    %180 = vector.broadcast %cst_78 : f32 to vector<8x32xf32>
    %181 = arith.addf %180, %179 : vector<8x32xf32>
    %182 = arith.mulf %171, %181 : vector<8x32xf32>
    %183 = vector.extract_strided_slice %182 {offsets = [0, 0], sizes = [8, 1], strides = [1, 1]} : vector<8x32xf32> to vector<8x1xf32>
    %184 = vector.broadcast %183 : vector<8x1xf32> to vector<8x32xf32>
    %185 = arith.mulf %184, %7 : vector<8x32xf32>
    %c0_79 = arith.constant 0 : index
    %c0_80 = arith.constant 0 : index
    %186 = vector.load %arg7[%c0_79, %c0_80] : memref<8x1024xf32, #tpu.memory_space<vmem>>, vector<8x32xf32>
    tpu.vector_store %arg7[%c0_79, %c0_80], %185 {strides = array<i32>} : memref<8x1024xf32, #tpu.memory_space<vmem>>, vector<8x32xf32>,
    %187 = vector.extract_strided_slice %182 {offsets = [0, 1], sizes = [8, 1], strides = [1, 1]} : vector<8x32xf32> to vector<8x1xf32>
    %188 = vector.broadcast %187 : vector<8x1xf32> to vector<8x32xf32>
    %189 = arith.mulf %188, %7 : vector<8x32xf32>
    %c0_81 = arith.constant 0 : index
    %c32_82 = arith.constant 32 : index
    %190 = vector.load %arg7[%c0_81, %c32_82] : memref<8x1024xf32, #tpu.memory_space<vmem>>, vector<8x32xf32>
    tpu.vector_store %arg7[%c0_81, %c32_82], %189 {strides = array<i32>} : memref<8x1024xf32, #tpu.memory_space<vmem>>, vector<8x32xf32>,
    %191 = vector.extract_strided_slice %182 {offsets = [0, 2], sizes = [8, 1], strides = [1, 1]} : vector<8x32xf32> to vector<8x1xf32>
    %192 = vector.broadcast %191 : vector<8x1xf32> to vector<8x32xf32>
    %193 = arith.mulf %192, %7 : vector<8x32xf32>
    %c0_83 = arith.constant 0 : index
    %c64_84 = arith.constant 64 : index
    %194 = vector.load %arg7[%c0_83, %c64_84] : memref<8x1024xf32, #tpu.memory_space<vmem>>, vector<8x32xf32>
    tpu.vector_store %arg7[%c0_83, %c64_84], %193 {strides = array<i32>} : memref<8x1024xf32, #tpu.memory_space<vmem>>, vector<8x32xf32>,
    %195 = vector.extract_strided_slice %182 {offsets = [0, 3], sizes = [8, 1], strides = [1, 1]} : vector<8x32xf32> to vector<8x1xf32>
    %196 = vector.broadcast %195 : vector<8x1xf32> to vector<8x32xf32>
    %197 = arith.mulf %196, %7 : vector<8x32xf32>
    %c0_85 = arith.constant 0 : index
    %c96_86 = arith.constant 96 : index
    %198 = vector.load %arg7[%c0_85, %c96_86] : memref<8x1024xf32, #tpu.memory_space<vmem>>, vector<8x32xf32>
    tpu.vector_store %arg7[%c0_85, %c96_86], %197 {strides = array<i32>} : memref<8x1024xf32, #tpu.memory_space<vmem>>, vector<8x32xf32>,
    %199 = vector.extract_strided_slice %182 {offsets = [0, 4], sizes = [8, 1], strides = [1, 1]} : vector<8x32xf32> to vector<8x1xf32>
    %200 = vector.broadcast %199 : vector<8x1xf32> to vector<8x32xf32>
    %201 = arith.mulf %200, %7 : vector<8x32xf32>
    %c0_87 = arith.constant 0 : index
    %c128_88 = arith.constant 128 : index
    %202 = vector.load %arg7[%c0_87, %c128_88] : memref<8x1024xf32, #tpu.memory_space<vmem>>, vector<8x32xf32>
    tpu.vector_store %arg7[%c0_87, %c128_88], %201 {strides = array<i32>} : memref<8x1024xf32, #tpu.memory_space<vmem>>, vector<8x32xf32>,
    %203 = vector.extract_strided_slice %182 {offsets = [0, 5], sizes = [8, 1], strides = [1, 1]} : vector<8x32xf32> to vector<8x1xf32>
    %204 = vector.broadcast %203 : vector<8x1xf32> to vector<8x32xf32>
    %205 = arith.mulf %204, %7 : vector<8x32xf32>
    %c0_89 = arith.constant 0 : index
    %c160_90 = arith.constant 160 : index
    %206 = vector.load %arg7[%c0_89, %c160_90] : memref<8x1024xf32, #tpu.memory_space<vmem>>, vector<8x32xf32>
    tpu.vector_store %arg7[%c0_89, %c160_90], %205 {strides = array<i32>} : memref<8x1024xf32, #tpu.memory_space<vmem>>, vector<8x32xf32>,
    %207 = vector.extract_strided_slice %182 {offsets = [0, 6], sizes = [8, 1], strides = [1, 1]} : vector<8x32xf32> to vector<8x1xf32>
    %208 = vector.broadcast %207 : vector<8x1xf32> to vector<8x32xf32>
    %209 = arith.mulf %208, %7 : vector<8x32xf32>
    %c0_91 = arith.constant 0 : index
    %c192 = arith.constant 192 : index
    %210 = vector.load %arg7[%c0_91, %c192] : memref<8x1024xf32, #tpu.memory_space<vmem>>, vector<8x32xf32>
    tpu.vector_store %arg7[%c0_91, %c192], %209 {strides = array<i32>} : memref<8x1024xf32, #tpu.memory_space<vmem>>, vector<8x32xf32>,
    %211 = vector.extract_strided_slice %182 {offsets = [0, 7], sizes = [8, 1], strides = [1, 1]} : vector<8x32xf32> to vector<8x1xf32>
    %212 = vector.broadcast %211 : vector<8x1xf32> to vector<8x32xf32>
    %213 = arith.mulf %212, %7 : vector<8x32xf32>
    %c0_92 = arith.constant 0 : index
    %c224 = arith.constant 224 : index
    %214 = vector.load %arg7[%c0_92, %c224] : memref<8x1024xf32, #tpu.memory_space<vmem>>, vector<8x32xf32>
    tpu.vector_store %arg7[%c0_92, %c224], %213 {strides = array<i32>} : memref<8x1024xf32, #tpu.memory_space<vmem>>, vector<8x32xf32>,
    %215 = vector.extract_strided_slice %182 {offsets = [0, 8], sizes = [8, 1], strides = [1, 1]} : vector<8x32xf32> to vector<8x1xf32>
    %216 = vector.broadcast %215 : vector<8x1xf32> to vector<8x32xf32>
    %217 = arith.mulf %216, %7 : vector<8x32xf32>
    %c0_93 = arith.constant 0 : index
    %c256 = arith.constant 256 : index
    %218 = vector.load %arg7[%c0_93, %c256] : memref<8x1024xf32, #tpu.memory_space<vmem>>, vector<8x32xf32>
    tpu.vector_store %arg7[%c0_93, %c256], %217 {strides = array<i32>} : memref<8x1024xf32, #tpu.memory_space<vmem>>, vector<8x32xf32>,
    %219 = vector.extract_strided_slice %182 {offsets = [0, 9], sizes = [8, 1], strides = [1, 1]} : vector<8x32xf32> to vector<8x1xf32>
    %220 = vector.broadcast %219 : vector<8x1xf32> to vector<8x32xf32>
    %221 = arith.mulf %220, %7 : vector<8x32xf32>
    %c0_94 = arith.constant 0 : index
    %c288 = arith.constant 288 : index
    %222 = vector.load %arg7[%c0_94, %c288] : memref<8x1024xf32, #tpu.memory_space<vmem>>, vector<8x32xf32>
    tpu.vector_store %arg7[%c0_94, %c288], %221 {strides = array<i32>} : memref<8x1024xf32, #tpu.memory_space<vmem>>, vector<8x32xf32>,
    %223 = vector.extract_strided_slice %182 {offsets = [0, 10], sizes = [8, 1], strides = [1, 1]} : vector<8x32xf32> to vector<8x1xf32>
    %224 = vector.broadcast %223 : vector<8x1xf32> to vector<8x32xf32>
    %225 = arith.mulf %224, %7 : vector<8x32xf32>
    %c0_95 = arith.constant 0 : index
    %c320 = arith.constant 320 : index
    %226 = vector.load %arg7[%c0_95, %c320] : memref<8x1024xf32, #tpu.memory_space<vmem>>, vector<8x32xf32>
    tpu.vector_store %arg7[%c0_95, %c320], %225 {strides = array<i32>} : memref<8x1024xf32, #tpu.memory_space<vmem>>, vector<8x32xf32>,
    %227 = vector.extract_strided_slice %182 {offsets = [0, 11], sizes = [8, 1], strides = [1, 1]} : vector<8x32xf32> to vector<8x1xf32>
    %228 = vector.broadcast %227 : vector<8x1xf32> to vector<8x32xf32>
    %229 = arith.mulf %228, %7 : vector<8x32xf32>
    %c0_96 = arith.constant 0 : index
    %c352 = arith.constant 352 : index
    %230 = vector.load %arg7[%c0_96, %c352] : memref<8x1024xf32, #tpu.memory_space<vmem>>, vector<8x32xf32>
    tpu.vector_store %arg7[%c0_96, %c352], %229 {strides = array<i32>} : memref<8x1024xf32, #tpu.memory_space<vmem>>, vector<8x32xf32>,
    %231 = vector.extract_strided_slice %182 {offsets = [0, 12], sizes = [8, 1], strides = [1, 1]} : vector<8x32xf32> to vector<8x1xf32>
    %232 = vector.broadcast %231 : vector<8x1xf32> to vector<8x32xf32>
    %233 = arith.mulf %232, %7 : vector<8x32xf32>
    %c0_97 = arith.constant 0 : index
    %c384 = arith.constant 384 : index
    %234 = vector.load %arg7[%c0_97, %c384] : memref<8x1024xf32, #tpu.memory_space<vmem>>, vector<8x32xf32>
    tpu.vector_store %arg7[%c0_97, %c384], %233 {strides = array<i32>} : memref<8x1024xf32, #tpu.memory_space<vmem>>, vector<8x32xf32>,
    %235 = vector.extract_strided_slice %182 {offsets = [0, 13], sizes = [8, 1], strides = [1, 1]} : vector<8x32xf32> to vector<8x1xf32>
    %236 = vector.broadcast %235 : vector<8x1xf32> to vector<8x32xf32>
    %237 = arith.mulf %236, %7 : vector<8x32xf32>
    %c0_98 = arith.constant 0 : index
    %c416 = arith.constant 416 : index
    %238 = vector.load %arg7[%c0_98, %c416] : memref<8x1024xf32, #tpu.memory_space<vmem>>, vector<8x32xf32>
    tpu.vector_store %arg7[%c0_98, %c416], %237 {strides = array<i32>} : memref<8x1024xf32, #tpu.memory_space<vmem>>, vector<8x32xf32>,
    %239 = vector.extract_strided_slice %182 {offsets = [0, 14], sizes = [8, 1], strides = [1, 1]} : vector<8x32xf32> to vector<8x1xf32>
    %240 = vector.broadcast %239 : vector<8x1xf32> to vector<8x32xf32>
    %241 = arith.mulf %240, %7 : vector<8x32xf32>
    %c0_99 = arith.constant 0 : index
    %c448 = arith.constant 448 : index
    %242 = vector.load %arg7[%c0_99, %c448] : memref<8x1024xf32, #tpu.memory_space<vmem>>, vector<8x32xf32>
    tpu.vector_store %arg7[%c0_99, %c448], %241 {strides = array<i32>} : memref<8x1024xf32, #tpu.memory_space<vmem>>, vector<8x32xf32>,
    %243 = vector.extract_strided_slice %182 {offsets = [0, 15], sizes = [8, 1], strides = [1, 1]} : vector<8x32xf32> to vector<8x1xf32>
    %244 = vector.broadcast %243 : vector<8x1xf32> to vector<8x32xf32>
    %245 = arith.mulf %244, %7 : vector<8x32xf32>
    %c0_100 = arith.constant 0 : index
    %c480 = arith.constant 480 : index
    %246 = vector.load %arg7[%c0_100, %c480] : memref<8x1024xf32, #tpu.memory_space<vmem>>, vector<8x32xf32>
    tpu.vector_store %arg7[%c0_100, %c480], %245 {strides = array<i32>} : memref<8x1024xf32, #tpu.memory_space<vmem>>, vector<8x32xf32>,
    %247 = vector.extract_strided_slice %182 {offsets = [0, 16], sizes = [8, 1], strides = [1, 1]} : vector<8x32xf32> to vector<8x1xf32>
    %248 = vector.broadcast %247 : vector<8x1xf32> to vector<8x32xf32>
    %249 = arith.mulf %248, %7 : vector<8x32xf32>
    %c0_101 = arith.constant 0 : index
    %c512 = arith.constant 512 : index
    %250 = vector.load %arg7[%c0_101, %c512] : memref<8x1024xf32, #tpu.memory_space<vmem>>, vector<8x32xf32>
    tpu.vector_store %arg7[%c0_101, %c512], %249 {strides = array<i32>} : memref<8x1024xf32, #tpu.memory_space<vmem>>, vector<8x32xf32>,
    %251 = vector.extract_strided_slice %182 {offsets = [0, 17], sizes = [8, 1], strides = [1, 1]} : vector<8x32xf32> to vector<8x1xf32>
    %252 = vector.broadcast %251 : vector<8x1xf32> to vector<8x32xf32>
    %253 = arith.mulf %252, %7 : vector<8x32xf32>
    %c0_102 = arith.constant 0 : index
    %c544 = arith.constant 544 : index
    %254 = vector.load %arg7[%c0_102, %c544] : memref<8x1024xf32, #tpu.memory_space<vmem>>, vector<8x32xf32>
    tpu.vector_store %arg7[%c0_102, %c544], %253 {strides = array<i32>} : memref<8x1024xf32, #tpu.memory_space<vmem>>, vector<8x32xf32>,
    %255 = vector.extract_strided_slice %182 {offsets = [0, 18], sizes = [8, 1], strides = [1, 1]} : vector<8x32xf32> to vector<8x1xf32>
    %256 = vector.broadcast %255 : vector<8x1xf32> to vector<8x32xf32>
    %257 = arith.mulf %256, %7 : vector<8x32xf32>
    %c0_103 = arith.constant 0 : index
    %c576 = arith.constant 576 : index
    %258 = vector.load %arg7[%c0_103, %c576] : memref<8x1024xf32, #tpu.memory_space<vmem>>, vector<8x32xf32>
    tpu.vector_store %arg7[%c0_103, %c576], %257 {strides = array<i32>} : memref<8x1024xf32, #tpu.memory_space<vmem>>, vector<8x32xf32>,
    %259 = vector.extract_strided_slice %182 {offsets = [0, 19], sizes = [8, 1], strides = [1, 1]} : vector<8x32xf32> to vector<8x1xf32>
    %260 = vector.broadcast %259 : vector<8x1xf32> to vector<8x32xf32>
    %261 = arith.mulf %260, %7 : vector<8x32xf32>
    %c0_104 = arith.constant 0 : index
    %c608 = arith.constant 608 : index
    %262 = vector.load %arg7[%c0_104, %c608] : memref<8x1024xf32, #tpu.memory_space<vmem>>, vector<8x32xf32>
    tpu.vector_store %arg7[%c0_104, %c608], %261 {strides = array<i32>} : memref<8x1024xf32, #tpu.memory_space<vmem>>, vector<8x32xf32>,
    %263 = vector.extract_strided_slice %182 {offsets = [0, 20], sizes = [8, 1], strides = [1, 1]} : vector<8x32xf32> to vector<8x1xf32>
    %264 = vector.broadcast %263 : vector<8x1xf32> to vector<8x32xf32>
    %265 = arith.mulf %264, %7 : vector<8x32xf32>
    %c0_105 = arith.constant 0 : index
    %c640 = arith.constant 640 : index
    %266 = vector.load %arg7[%c0_105, %c640] : memref<8x1024xf32, #tpu.memory_space<vmem>>, vector<8x32xf32>
    tpu.vector_store %arg7[%c0_105, %c640], %265 {strides = array<i32>} : memref<8x1024xf32, #tpu.memory_space<vmem>>, vector<8x32xf32>,
    %267 = vector.extract_strided_slice %182 {offsets = [0, 21], sizes = [8, 1], strides = [1, 1]} : vector<8x32xf32> to vector<8x1xf32>
    %268 = vector.broadcast %267 : vector<8x1xf32> to vector<8x32xf32>
    %269 = arith.mulf %268, %7 : vector<8x32xf32>
    %c0_106 = arith.constant 0 : index
    %c672 = arith.constant 672 : index
    %270 = vector.load %arg7[%c0_106, %c672] : memref<8x1024xf32, #tpu.memory_space<vmem>>, vector<8x32xf32>
    tpu.vector_store %arg7[%c0_106, %c672], %269 {strides = array<i32>} : memref<8x1024xf32, #tpu.memory_space<vmem>>, vector<8x32xf32>,
    %271 = vector.extract_strided_slice %182 {offsets = [0, 22], sizes = [8, 1], strides = [1, 1]} : vector<8x32xf32> to vector<8x1xf32>
    %272 = vector.broadcast %271 : vector<8x1xf32> to vector<8x32xf32>
    %273 = arith.mulf %272, %7 : vector<8x32xf32>
    %c0_107 = arith.constant 0 : index
    %c704 = arith.constant 704 : index
    %274 = vector.load %arg7[%c0_107, %c704] : memref<8x1024xf32, #tpu.memory_space<vmem>>, vector<8x32xf32>
    tpu.vector_store %arg7[%c0_107, %c704], %273 {strides = array<i32>} : memref<8x1024xf32, #tpu.memory_space<vmem>>, vector<8x32xf32>,
    %275 = vector.extract_strided_slice %182 {offsets = [0, 23], sizes = [8, 1], strides = [1, 1]} : vector<8x32xf32> to vector<8x1xf32>
    %276 = vector.broadcast %275 : vector<8x1xf32> to vector<8x32xf32>
    %277 = arith.mulf %276, %7 : vector<8x32xf32>
    %c0_108 = arith.constant 0 : index
    %c736 = arith.constant 736 : index
    %278 = vector.load %arg7[%c0_108, %c736] : memref<8x1024xf32, #tpu.memory_space<vmem>>, vector<8x32xf32>
    tpu.vector_store %arg7[%c0_108, %c736], %277 {strides = array<i32>} : memref<8x1024xf32, #tpu.memory_space<vmem>>, vector<8x32xf32>,
    %279 = vector.extract_strided_slice %182 {offsets = [0, 24], sizes = [8, 1], strides = [1, 1]} : vector<8x32xf32> to vector<8x1xf32>
    %280 = vector.broadcast %279 : vector<8x1xf32> to vector<8x32xf32>
    %281 = arith.mulf %280, %7 : vector<8x32xf32>
    %c0_109 = arith.constant 0 : index
    %c768 = arith.constant 768 : index
    %282 = vector.load %arg7[%c0_109, %c768] : memref<8x1024xf32, #tpu.memory_space<vmem>>, vector<8x32xf32>
    tpu.vector_store %arg7[%c0_109, %c768], %281 {strides = array<i32>} : memref<8x1024xf32, #tpu.memory_space<vmem>>, vector<8x32xf32>,
    %283 = vector.extract_strided_slice %182 {offsets = [0, 25], sizes = [8, 1], strides = [1, 1]} : vector<8x32xf32> to vector<8x1xf32>
    %284 = vector.broadcast %283 : vector<8x1xf32> to vector<8x32xf32>
    %285 = arith.mulf %284, %7 : vector<8x32xf32>
    %c0_110 = arith.constant 0 : index
    %c800 = arith.constant 800 : index
    %286 = vector.load %arg7[%c0_110, %c800] : memref<8x1024xf32, #tpu.memory_space<vmem>>, vector<8x32xf32>
    tpu.vector_store %arg7[%c0_110, %c800], %285 {strides = array<i32>} : memref<8x1024xf32, #tpu.memory_space<vmem>>, vector<8x32xf32>,
    %287 = vector.extract_strided_slice %182 {offsets = [0, 26], sizes = [8, 1], strides = [1, 1]} : vector<8x32xf32> to vector<8x1xf32>
    %288 = vector.broadcast %287 : vector<8x1xf32> to vector<8x32xf32>
    %289 = arith.mulf %288, %7 : vector<8x32xf32>
    %c0_111 = arith.constant 0 : index
    %c832 = arith.constant 832 : index
    %290 = vector.load %arg7[%c0_111, %c832] : memref<8x1024xf32, #tpu.memory_space<vmem>>, vector<8x32xf32>
    tpu.vector_store %arg7[%c0_111, %c832], %289 {strides = array<i32>} : memref<8x1024xf32, #tpu.memory_space<vmem>>, vector<8x32xf32>,
    %291 = vector.extract_strided_slice %182 {offsets = [0, 27], sizes = [8, 1], strides = [1, 1]} : vector<8x32xf32> to vector<8x1xf32>
    %292 = vector.broadcast %291 : vector<8x1xf32> to vector<8x32xf32>
    %293 = arith.mulf %292, %7 : vector<8x32xf32>
    %c0_112 = arith.constant 0 : index
    %c864 = arith.constant 864 : index
    %294 = vector.load %arg7[%c0_112, %c864] : memref<8x1024xf32, #tpu.memory_space<vmem>>, vector<8x32xf32>
    tpu.vector_store %arg7[%c0_112, %c864], %293 {strides = array<i32>} : memref<8x1024xf32, #tpu.memory_space<vmem>>, vector<8x32xf32>,
    %295 = vector.extract_strided_slice %182 {offsets = [0, 28], sizes = [8, 1], strides = [1, 1]} : vector<8x32xf32> to vector<8x1xf32>
    %296 = vector.broadcast %295 : vector<8x1xf32> to vector<8x32xf32>
    %297 = arith.mulf %296, %7 : vector<8x32xf32>
    %c0_113 = arith.constant 0 : index
    %c896 = arith.constant 896 : index
    %298 = vector.load %arg7[%c0_113, %c896] : memref<8x1024xf32, #tpu.memory_space<vmem>>, vector<8x32xf32>
    tpu.vector_store %arg7[%c0_113, %c896], %297 {strides = array<i32>} : memref<8x1024xf32, #tpu.memory_space<vmem>>, vector<8x32xf32>,
    %299 = vector.extract_strided_slice %182 {offsets = [0, 29], sizes = [8, 1], strides = [1, 1]} : vector<8x32xf32> to vector<8x1xf32>
    %300 = vector.broadcast %299 : vector<8x1xf32> to vector<8x32xf32>
    %301 = arith.mulf %300, %7 : vector<8x32xf32>
    %c0_114 = arith.constant 0 : index
    %c928 = arith.constant 928 : index
    %302 = vector.load %arg7[%c0_114, %c928] : memref<8x1024xf32, #tpu.memory_space<vmem>>, vector<8x32xf32>
    tpu.vector_store %arg7[%c0_114, %c928], %301 {strides = array<i32>} : memref<8x1024xf32, #tpu.memory_space<vmem>>, vector<8x32xf32>,
    %303 = vector.extract_strided_slice %182 {offsets = [0, 30], sizes = [8, 1], strides = [1, 1]} : vector<8x32xf32> to vector<8x1xf32>
    %304 = vector.broadcast %303 : vector<8x1xf32> to vector<8x32xf32>
    %305 = arith.mulf %304, %7 : vector<8x32xf32>
    %c0_115 = arith.constant 0 : index
    %c960 = arith.constant 960 : index
    %306 = vector.load %arg7[%c0_115, %c960] : memref<8x1024xf32, #tpu.memory_space<vmem>>, vector<8x32xf32>
    tpu.vector_store %arg7[%c0_115, %c960], %305 {strides = array<i32>} : memref<8x1024xf32, #tpu.memory_space<vmem>>, vector<8x32xf32>,
    %307 = vector.extract_strided_slice %182 {offsets = [0, 31], sizes = [8, 1], strides = [1, 1]} : vector<8x32xf32> to vector<8x1xf32>
    %308 = vector.broadcast %307 : vector<8x1xf32> to vector<8x32xf32>
    %309 = arith.mulf %308, %7 : vector<8x32xf32>
    %c0_116 = arith.constant 0 : index
    %c992 = arith.constant 992 : index
    %310 = vector.load %arg7[%c0_116, %c992] : memref<8x1024xf32, #tpu.memory_space<vmem>>, vector<8x32xf32>
    tpu.vector_store %arg7[%c0_116, %c992], %309 {strides = array<i32>} : memref<8x1024xf32, #tpu.memory_space<vmem>>, vector<8x32xf32>,
    %c0_117 = arith.constant 0 : index
    %c0_118 = arith.constant 0 : index
    %311 = vector.load %arg7[%c0_117, %c0_118] : memref<8x1024xf32, #tpu.memory_space<vmem>>, vector<8x1024xf32>
    %c256_119 = arith.constant 256 : index
    %c0_120 = arith.constant 0 : index
    %312 = vector.load %arg4[%c256_119, %c0_120] : memref<1464x32xbf16, #tpu.memory_space<vmem>>, vector<1024x32xbf16>
    %313 = arith.truncf %311 : vector<8x1024xf32> to vector<8x1024xbf16>
    %cst_121 = arith.constant dense<0.000000e+00> : vector<8x32xf32>
    %314 = tpu.matmul %313, %312, %cst_121 {dimension_numbers = #tpu.dot_dimension_numbers<[1], [0], [0], [1], [0, 0, 1, 1], [], []>} : vector<8x1024xbf16>, vector<1024x32xbf16>, vector<8x32xf32> -> vector<8x32xf32>
    %c80 = arith.constant 80 : index
    %c0_122 = arith.constant 0 : index
    %315 = vector.load %arg5[%c80, %c0_122] : memref<336x32xf32, #tpu.memory_space<vmem>>, vector<1x32xf32>
    %316 = vector.broadcast %315 : vector<1x32xf32> to vector<8x32xf32>
    %317 = arith.addf %314, %316 : vector<8x32xf32>
    %cst_123 = arith.constant 2.000000e-01 : f32
    %318 = vector.broadcast %cst_123 : f32 to vector<8x32xf32>
    %319 = arith.mulf %318, %317 : vector<8x32xf32>
    %320 = arith.addf %182, %319 : vector<8x32xf32>
    %c1280 = arith.constant 1280 : index
    %c0_124 = arith.constant 0 : index
    %321 = vector.load %arg4[%c1280, %c0_124] : memref<1464x32xbf16, #tpu.memory_space<vmem>>, vector<32x32xbf16>
    %322 = arith.truncf %320 : vector<8x32xf32> to vector<8x32xbf16>
    %cst_125 = arith.constant dense<0.000000e+00> : vector<8x32xf32>
    %323 = tpu.matmul %322, %321, %cst_125 {dimension_numbers = #tpu.dot_dimension_numbers<[1], [0], [0], [1], [0, 0, 1, 1], [], []>} : vector<8x32xbf16>, vector<32x32xbf16>, vector<8x32xf32> -> vector<8x32xf32>
    %c88 = arith.constant 88 : index
    %c0_126 = arith.constant 0 : index
    %324 = vector.load %arg5[%c88, %c0_126] : memref<336x32xf32, #tpu.memory_space<vmem>>, vector<1x32xf32>
    %325 = vector.broadcast %324 : vector<1x32xf32> to vector<8x32xf32>
    %326 = arith.addf %323, %325 : vector<8x32xf32>
    %cst_127 = arith.constant dense<0.000000e+00> : vector<8xf32>
    %327 = vector.multi_reduction <add>, %326, %cst_127 [1] : vector<8x32xf32> to vector<8xf32>
    %328 = vector.shape_cast %327 : vector<8xf32> to vector<8x1xf32>
    %cst_128 = arith.constant 3.125000e-02 : f32
    %329 = vector.broadcast %cst_128 : f32 to vector<8x1xf32>
    %330 = arith.mulf %328, %329 : vector<8x1xf32>
    %331 = arith.mulf %326, %326 : vector<8x32xf32>
    %cst_129 = arith.constant dense<0.000000e+00> : vector<8xf32>
    %332 = vector.multi_reduction <add>, %331, %cst_129 [1] : vector<8x32xf32> to vector<8xf32>
    %333 = vector.shape_cast %332 : vector<8xf32> to vector<8x1xf32>
    %cst_130 = arith.constant 3.125000e-02 : f32
    %334 = vector.broadcast %cst_130 : f32 to vector<8x1xf32>
    %335 = arith.mulf %333, %334 : vector<8x1xf32>
    %336 = arith.mulf %330, %330 : vector<8x1xf32>
    %337 = arith.subf %335, %336 : vector<8x1xf32>
    %338 = vector.broadcast %330 : vector<8x1xf32> to vector<8x32xf32>
    %339 = arith.subf %326, %338 : vector<8x32xf32>
    %cst_131 = arith.constant 9.99999974E-6 : f32
    %340 = vector.broadcast %cst_131 : f32 to vector<8x1xf32>
    %341 = arith.addf %337, %340 : vector<8x1xf32>
    %342 = math.rsqrt %341 : vector<8x1xf32>
    %343 = vector.broadcast %342 : vector<8x1xf32> to vector<8x32xf32>
    %344 = arith.mulf %339, %343 : vector<8x32xf32>
    %c96_132 = arith.constant 96 : index
    %c0_133 = arith.constant 0 : index
    %345 = vector.load %arg5[%c96_132, %c0_133] : memref<336x32xf32, #tpu.memory_space<vmem>>, vector<1x32xf32>
    %346 = vector.broadcast %345 : vector<1x32xf32> to vector<8x32xf32>
    %347 = arith.mulf %344, %346 : vector<8x32xf32>
    %c104 = arith.constant 104 : index
    %c0_134 = arith.constant 0 : index
    %348 = vector.load %arg5[%c104, %c0_134] : memref<336x32xf32, #tpu.memory_space<vmem>>, vector<1x32xf32>
    %349 = vector.broadcast %348 : vector<1x32xf32> to vector<8x32xf32>
    %350 = arith.addf %347, %349 : vector<8x32xf32>
    %cst_135 = arith.constant 5.000000e-01 : f32
    %351 = vector.broadcast %cst_135 : f32 to vector<8x32xf32>
    %352 = arith.mulf %351, %350 : vector<8x32xf32>
    %cst_136 = arith.constant 4.471500e-02 : f32
    %353 = vector.broadcast %cst_136 : f32 to vector<8x32xf32>
    %354 = arith.mulf %353, %350 : vector<8x32xf32>
    %355 = arith.mulf %354, %350 : vector<8x32xf32>
    %356 = arith.mulf %355, %350 : vector<8x32xf32>
    %357 = arith.addf %350, %356 : vector<8x32xf32>
    %cst_137 = arith.constant 0.797884583 : f32
    %358 = vector.broadcast %cst_137 : f32 to vector<8x32xf32>
    %359 = arith.mulf %358, %357 : vector<8x32xf32>
    %360 = math.tanh %359 : vector<8x32xf32>
    %cst_138 = arith.constant 1.000000e+00 : f32
    %361 = vector.broadcast %cst_138 : f32 to vector<8x32xf32>
    %362 = arith.addf %361, %360 : vector<8x32xf32>
    %363 = arith.mulf %352, %362 : vector<8x32xf32>
    %cst_139 = arith.constant 0.699999988 : f32
    %364 = vector.broadcast %cst_139 : f32 to vector<8x32xf32>
    %365 = arith.mulf %364, %182 : vector<8x32xf32>
    %366 = arith.addf %363, %365 : vector<8x32xf32>
    %cst_140 = arith.constant 3.000000e-01 : f32
    %367 = vector.broadcast %cst_140 : f32 to vector<8x32xf32>
    %368 = arith.mulf %367, %7 : vector<8x32xf32>
    %369 = arith.addf %366, %368 : vector<8x32xf32>
    %c1312 = arith.constant 1312 : index
    %c0_141 = arith.constant 0 : index
    %370 = vector.load %arg4[%c1312, %c0_141] : memref<1464x32xbf16, #tpu.memory_space<vmem>>, vector<32x32xbf16>
    %371 = arith.truncf %369 : vector<8x32xf32> to vector<8x32xbf16>
    %cst_142 = arith.constant dense<0.000000e+00> : vector<8x32xf32>
    %372 = tpu.matmul %371, %370, %cst_142 {dimension_numbers = #tpu.dot_dimension_numbers<[1], [0], [0], [1], [0, 0, 1, 1], [], []>} : vector<8x32xbf16>, vector<32x32xbf16>, vector<8x32xf32> -> vector<8x32xf32>
    %c112 = arith.constant 112 : index
    %c0_143 = arith.constant 0 : index
    %373 = vector.load %arg5[%c112, %c0_143] : memref<336x32xf32, #tpu.memory_space<vmem>>, vector<1x32xf32>
    %374 = vector.broadcast %373 : vector<1x32xf32> to vector<8x32xf32>
    %375 = arith.addf %372, %374 : vector<8x32xf32>
    %cst_144 = arith.constant dense<0.000000e+00> : vector<8xf32>
    %376 = vector.multi_reduction <add>, %375, %cst_144 [1] : vector<8x32xf32> to vector<8xf32>
    %377 = vector.shape_cast %376 : vector<8xf32> to vector<8x1xf32>
    %cst_145 = arith.constant 3.125000e-02 : f32
    %378 = vector.broadcast %cst_145 : f32 to vector<8x1xf32>
    %379 = arith.mulf %377, %378 : vector<8x1xf32>
    %380 = arith.mulf %375, %375 : vector<8x32xf32>
    %cst_146 = arith.constant dense<0.000000e+00> : vector<8xf32>
    %381 = vector.multi_reduction <add>, %380, %cst_146 [1] : vector<8x32xf32> to vector<8xf32>
    %382 = vector.shape_cast %381 : vector<8xf32> to vector<8x1xf32>
    %cst_147 = arith.constant 3.125000e-02 : f32
    %383 = vector.broadcast %cst_147 : f32 to vector<8x1xf32>
    %384 = arith.mulf %382, %383 : vector<8x1xf32>
    %385 = arith.mulf %379, %379 : vector<8x1xf32>
    %386 = arith.subf %384, %385 : vector<8x1xf32>
    %387 = vector.broadcast %379 : vector<8x1xf32> to vector<8x32xf32>
    %388 = arith.subf %375, %387 : vector<8x32xf32>
    %cst_148 = arith.constant 9.99999974E-6 : f32
    %389 = vector.broadcast %cst_148 : f32 to vector<8x1xf32>
    %390 = arith.addf %386, %389 : vector<8x1xf32>
    %391 = math.rsqrt %390 : vector<8x1xf32>
    %392 = vector.broadcast %391 : vector<8x1xf32> to vector<8x32xf32>
    %393 = arith.mulf %388, %392 : vector<8x32xf32>
    %c120 = arith.constant 120 : index
    %c0_149 = arith.constant 0 : index
    %394 = vector.load %arg5[%c120, %c0_149] : memref<336x32xf32, #tpu.memory_space<vmem>>, vector<1x32xf32>
    %395 = vector.broadcast %394 : vector<1x32xf32> to vector<8x32xf32>
    %396 = arith.mulf %393, %395 : vector<8x32xf32>
    %c128_150 = arith.constant 128 : index
    %c0_151 = arith.constant 0 : index
    %397 = vector.load %arg5[%c128_150, %c0_151] : memref<336x32xf32, #tpu.memory_space<vmem>>, vector<1x32xf32>
    %398 = vector.broadcast %397 : vector<1x32xf32> to vector<8x32xf32>
    %399 = arith.addf %396, %398 : vector<8x32xf32>
    %cst_152 = arith.constant 5.000000e-01 : f32
    %400 = vector.broadcast %cst_152 : f32 to vector<8x32xf32>
    %401 = arith.mulf %400, %399 : vector<8x32xf32>
    %cst_153 = arith.constant 4.471500e-02 : f32
    %402 = vector.broadcast %cst_153 : f32 to vector<8x32xf32>
    %403 = arith.mulf %402, %399 : vector<8x32xf32>
    %404 = arith.mulf %403, %399 : vector<8x32xf32>
    %405 = arith.mulf %404, %399 : vector<8x32xf32>
    %406 = arith.addf %399, %405 : vector<8x32xf32>
    %cst_154 = arith.constant 0.797884583 : f32
    %407 = vector.broadcast %cst_154 : f32 to vector<8x32xf32>
    %408 = arith.mulf %407, %406 : vector<8x32xf32>
    %409 = math.tanh %408 : vector<8x32xf32>
    %cst_155 = arith.constant 1.000000e+00 : f32
    %410 = vector.broadcast %cst_155 : f32 to vector<8x32xf32>
    %411 = arith.addf %410, %409 : vector<8x32xf32>
    %412 = arith.mulf %401, %411 : vector<8x32xf32>
    %cst_156 = arith.constant 0.699999988 : f32
    %413 = vector.broadcast %cst_156 : f32 to vector<8x32xf32>
    %414 = arith.mulf %413, %412 : vector<8x32xf32>
    %cst_157 = arith.constant 3.000000e-01 : f32
    %415 = vector.broadcast %cst_157 : f32 to vector<8x32xf32>
    %416 = arith.mulf %415, %369 : vector<8x32xf32>
    %417 = arith.addf %414, %416 : vector<8x32xf32>
    %c1344 = arith.constant 1344 : index
    %c0_158 = arith.constant 0 : index
    %418 = vector.load %arg4[%c1344, %c0_158] : memref<1464x32xbf16, #tpu.memory_space<vmem>>, vector<32x32xbf16>
    %419 = arith.truncf %417 : vector<8x32xf32> to vector<8x32xbf16>
    %cst_159 = arith.constant dense<0.000000e+00> : vector<8x32xf32>
    %420 = tpu.matmul %419, %418, %cst_159 {dimension_numbers = #tpu.dot_dimension_numbers<[1], [0], [0], [1], [0, 0, 1, 1], [], []>} : vector<8x32xbf16>, vector<32x32xbf16>, vector<8x32xf32> -> vector<8x32xf32>
    %421 = vector.extract_strided_slice %420 {offsets = [0, 0], sizes = [8, 16], strides = [1, 1]} : vector<8x32xf32> to vector<8x16xf32>
    %c136 = arith.constant 136 : index
    %c0_160 = arith.constant 0 : index
    %422 = vector.load %arg5[%c136, %c0_160] : memref<336x32xf32, #tpu.memory_space<vmem>>, vector<1x16xf32>
    %423 = vector.broadcast %422 : vector<1x16xf32> to vector<8x16xf32>
    %424 = arith.addf %421, %423 : vector<8x16xf32>
    %cst_161 = arith.constant dense<0.000000e+00> : vector<8xf32>
    %425 = vector.multi_reduction <add>, %424, %cst_161 [1] : vector<8x16xf32> to vector<8xf32>
    %426 = vector.shape_cast %425 : vector<8xf32> to vector<8x1xf32>
    %cst_162 = arith.constant 6.250000e-02 : f32
    %427 = vector.broadcast %cst_162 : f32 to vector<8x1xf32>
    %428 = arith.mulf %426, %427 : vector<8x1xf32>
    %429 = arith.mulf %424, %424 : vector<8x16xf32>
    %cst_163 = arith.constant dense<0.000000e+00> : vector<8xf32>
    %430 = vector.multi_reduction <add>, %429, %cst_163 [1] : vector<8x16xf32> to vector<8xf32>
    %431 = vector.shape_cast %430 : vector<8xf32> to vector<8x1xf32>
    %cst_164 = arith.constant 6.250000e-02 : f32
    %432 = vector.broadcast %cst_164 : f32 to vector<8x1xf32>
    %433 = arith.mulf %431, %432 : vector<8x1xf32>
    %434 = arith.mulf %428, %428 : vector<8x1xf32>
    %435 = arith.subf %433, %434 : vector<8x1xf32>
    %436 = vector.broadcast %428 : vector<8x1xf32> to vector<8x16xf32>
    %437 = arith.subf %424, %436 : vector<8x16xf32>
    %cst_165 = arith.constant 9.99999974E-6 : f32
    %438 = vector.broadcast %cst_165 : f32 to vector<8x1xf32>
    %439 = arith.addf %435, %438 : vector<8x1xf32>
    %440 = math.rsqrt %439 : vector<8x1xf32>
    %441 = vector.broadcast %440 : vector<8x1xf32> to vector<8x16xf32>
    %442 = arith.mulf %437, %441 : vector<8x16xf32>
    %c144 = arith.constant 144 : index
    %c0_166 = arith.constant 0 : index
    %443 = vector.load %arg5[%c144, %c0_166] : memref<336x32xf32, #tpu.memory_space<vmem>>, vector<1x16xf32>
    %444 = vector.broadcast %443 : vector<1x16xf32> to vector<8x16xf32>
    %445 = arith.mulf %442, %444 : vector<8x16xf32>
    %c152 = arith.constant 152 : index
    %c0_167 = arith.constant 0 : index
    %446 = vector.load %arg5[%c152, %c0_167] : memref<336x32xf32, #tpu.memory_space<vmem>>, vector<1x16xf32>
    %447 = vector.broadcast %446 : vector<1x16xf32> to vector<8x16xf32>
    %448 = arith.addf %445, %447 : vector<8x16xf32>
    %cst_168 = arith.constant 5.000000e-01 : f32
    %449 = vector.broadcast %cst_168 : f32 to vector<8x16xf32>
    %450 = arith.mulf %449, %448 : vector<8x16xf32>
    %cst_169 = arith.constant 4.471500e-02 : f32
    %451 = vector.broadcast %cst_169 : f32 to vector<8x16xf32>
    %452 = arith.mulf %451, %448 : vector<8x16xf32>
    %453 = arith.mulf %452, %448 : vector<8x16xf32>
    %454 = arith.mulf %453, %448 : vector<8x16xf32>
    %455 = arith.addf %448, %454 : vector<8x16xf32>
    %cst_170 = arith.constant 0.797884583 : f32
    %456 = vector.broadcast %cst_170 : f32 to vector<8x16xf32>
    %457 = arith.mulf %456, %455 : vector<8x16xf32>
    %458 = math.tanh %457 : vector<8x16xf32>
    %cst_171 = arith.constant 1.000000e+00 : f32
    %459 = vector.broadcast %cst_171 : f32 to vector<8x16xf32>
    %460 = arith.addf %459, %458 : vector<8x16xf32>
    %461 = arith.mulf %450, %460 : vector<8x16xf32>
    %c1376 = arith.constant 1376 : index
    %c0_172 = arith.constant 0 : index
    %462 = vector.load %arg4[%c1376, %c0_172] : memref<1464x32xbf16, #tpu.memory_space<vmem>>, vector<16x32xbf16>
    %463 = arith.truncf %461 : vector<8x16xf32> to vector<8x16xbf16>
    %cst_173 = arith.constant dense<0.000000e+00> : vector<8x32xf32>
    %464 = tpu.matmul %463, %462, %cst_173 {dimension_numbers = #tpu.dot_dimension_numbers<[1], [0], [0], [1], [0, 0, 1, 1], [], []>} : vector<8x16xbf16>, vector<16x32xbf16>, vector<8x32xf32> -> vector<8x32xf32>
    %465 = vector.extract_strided_slice %464 {offsets = [0, 0], sizes = [8, 8], strides = [1, 1]} : vector<8x32xf32> to vector<8x8xf32>
    %c160_174 = arith.constant 160 : index
    %c0_175 = arith.constant 0 : index
    %466 = vector.load %arg5[%c160_174, %c0_175] : memref<336x32xf32, #tpu.memory_space<vmem>>, vector<1x8xf32>
    %467 = vector.broadcast %466 : vector<1x8xf32> to vector<8x8xf32>
    %468 = arith.addf %465, %467 : vector<8x8xf32>
    %cst_176 = arith.constant dense<0.000000e+00> : vector<8xf32>
    %469 = vector.multi_reduction <add>, %468, %cst_176 [1] : vector<8x8xf32> to vector<8xf32>
    %470 = vector.shape_cast %469 : vector<8xf32> to vector<8x1xf32>
    %cst_177 = arith.constant 1.250000e-01 : f32
    %471 = vector.broadcast %cst_177 : f32 to vector<8x1xf32>
    %472 = arith.mulf %470, %471 : vector<8x1xf32>
    %473 = arith.mulf %468, %468 : vector<8x8xf32>
    %cst_178 = arith.constant dense<0.000000e+00> : vector<8xf32>
    %474 = vector.multi_reduction <add>, %473, %cst_178 [1] : vector<8x8xf32> to vector<8xf32>
    %475 = vector.shape_cast %474 : vector<8xf32> to vector<8x1xf32>
    %cst_179 = arith.constant 1.250000e-01 : f32
    %476 = vector.broadcast %cst_179 : f32 to vector<8x1xf32>
    %477 = arith.mulf %475, %476 : vector<8x1xf32>
    %478 = arith.mulf %472, %472 : vector<8x1xf32>
    %479 = arith.subf %477, %478 : vector<8x1xf32>
    %480 = vector.broadcast %472 : vector<8x1xf32> to vector<8x8xf32>
    %481 = arith.subf %468, %480 : vector<8x8xf32>
    %cst_180 = arith.constant 9.99999974E-6 : f32
    %482 = vector.broadcast %cst_180 : f32 to vector<8x1xf32>
    %483 = arith.addf %479, %482 : vector<8x1xf32>
    %484 = math.rsqrt %483 : vector<8x1xf32>
    %485 = vector.broadcast %484 : vector<8x1xf32> to vector<8x8xf32>
    %486 = arith.mulf %481, %485 : vector<8x8xf32>
    %c168 = arith.constant 168 : index
    %c0_181 = arith.constant 0 : index
    %487 = vector.load %arg5[%c168, %c0_181] : memref<336x32xf32, #tpu.memory_space<vmem>>, vector<1x8xf32>
    %488 = vector.broadcast %487 : vector<1x8xf32> to vector<8x8xf32>
    %489 = arith.mulf %486, %488 : vector<8x8xf32>
    %c176 = arith.constant 176 : index
    %c0_182 = arith.constant 0 : index
    %490 = vector.load %arg5[%c176, %c0_182] : memref<336x32xf32, #tpu.memory_space<vmem>>, vector<1x8xf32>
    %491 = vector.broadcast %490 : vector<1x8xf32> to vector<8x8xf32>
    %492 = arith.addf %489, %491 : vector<8x8xf32>
    %cst_183 = arith.constant 5.000000e-01 : f32
    %493 = vector.broadcast %cst_183 : f32 to vector<8x8xf32>
    %494 = arith.mulf %493, %492 : vector<8x8xf32>
    %cst_184 = arith.constant 4.471500e-02 : f32
    %495 = vector.broadcast %cst_184 : f32 to vector<8x8xf32>
    %496 = arith.mulf %495, %492 : vector<8x8xf32>
    %497 = arith.mulf %496, %492 : vector<8x8xf32>
    %498 = arith.mulf %497, %492 : vector<8x8xf32>
    %499 = arith.addf %492, %498 : vector<8x8xf32>
    %cst_185 = arith.constant 0.797884583 : f32
    %500 = vector.broadcast %cst_185 : f32 to vector<8x8xf32>
    %501 = arith.mulf %500, %499 : vector<8x8xf32>
    %502 = math.tanh %501 : vector<8x8xf32>
    %cst_186 = arith.constant 1.000000e+00 : f32
    %503 = vector.broadcast %cst_186 : f32 to vector<8x8xf32>
    %504 = arith.addf %503, %502 : vector<8x8xf32>
    %505 = arith.mulf %494, %504 : vector<8x8xf32>
    %c1392 = arith.constant 1392 : index
    %c0_187 = arith.constant 0 : index
    %506 = vector.load %arg4[%c1392, %c0_187] : memref<1464x32xbf16, #tpu.memory_space<vmem>>, vector<8x32xbf16>
    %507 = arith.truncf %505 : vector<8x8xf32> to vector<8x8xbf16>
    %cst_188 = arith.constant dense<0.000000e+00> : vector<8x32xf32>
    %508 = tpu.matmul %507, %506, %cst_188 {dimension_numbers = #tpu.dot_dimension_numbers<[1], [0], [0], [1], [0, 0, 1, 1], [], []>} : vector<8x8xbf16>, vector<8x32xbf16>, vector<8x32xf32> -> vector<8x32xf32>
    %509 = vector.extract_strided_slice %508 {offsets = [0, 0], sizes = [8, 16], strides = [1, 1]} : vector<8x32xf32> to vector<8x16xf32>
    %c184 = arith.constant 184 : index
    %c0_189 = arith.constant 0 : index
    %510 = vector.load %arg5[%c184, %c0_189] : memref<336x32xf32, #tpu.memory_space<vmem>>, vector<1x16xf32>
    %511 = vector.broadcast %510 : vector<1x16xf32> to vector<8x16xf32>
    %512 = arith.addf %509, %511 : vector<8x16xf32>
    %cst_190 = arith.constant dense<0.000000e+00> : vector<8xf32>
    %513 = vector.multi_reduction <add>, %512, %cst_190 [1] : vector<8x16xf32> to vector<8xf32>
    %514 = vector.shape_cast %513 : vector<8xf32> to vector<8x1xf32>
    %cst_191 = arith.constant 6.250000e-02 : f32
    %515 = vector.broadcast %cst_191 : f32 to vector<8x1xf32>
    %516 = arith.mulf %514, %515 : vector<8x1xf32>
    %517 = arith.mulf %512, %512 : vector<8x16xf32>
    %cst_192 = arith.constant dense<0.000000e+00> : vector<8xf32>
    %518 = vector.multi_reduction <add>, %517, %cst_192 [1] : vector<8x16xf32> to vector<8xf32>
    %519 = vector.shape_cast %518 : vector<8xf32> to vector<8x1xf32>
    %cst_193 = arith.constant 6.250000e-02 : f32
    %520 = vector.broadcast %cst_193 : f32 to vector<8x1xf32>
    %521 = arith.mulf %519, %520 : vector<8x1xf32>
    %522 = arith.mulf %516, %516 : vector<8x1xf32>
    %523 = arith.subf %521, %522 : vector<8x1xf32>
    %524 = vector.broadcast %516 : vector<8x1xf32> to vector<8x16xf32>
    %525 = arith.subf %512, %524 : vector<8x16xf32>
    %cst_194 = arith.constant 9.99999974E-6 : f32
    %526 = vector.broadcast %cst_194 : f32 to vector<8x1xf32>
    %527 = arith.addf %523, %526 : vector<8x1xf32>
    %528 = math.rsqrt %527 : vector<8x1xf32>
    %529 = vector.broadcast %528 : vector<8x1xf32> to vector<8x16xf32>
    %530 = arith.mulf %525, %529 : vector<8x16xf32>
    %c192_195 = arith.constant 192 : index
    %c0_196 = arith.constant 0 : index
    %531 = vector.load %arg5[%c192_195, %c0_196] : memref<336x32xf32, #tpu.memory_space<vmem>>, vector<1x16xf32>
    %532 = vector.broadcast %531 : vector<1x16xf32> to vector<8x16xf32>
    %533 = arith.mulf %530, %532 : vector<8x16xf32>
    %c200 = arith.constant 200 : index
    %c0_197 = arith.constant 0 : index
    %534 = vector.load %arg5[%c200, %c0_197] : memref<336x32xf32, #tpu.memory_space<vmem>>, vector<1x16xf32>
    %535 = vector.broadcast %534 : vector<1x16xf32> to vector<8x16xf32>
    %536 = arith.addf %533, %535 : vector<8x16xf32>
    %cst_198 = arith.constant 5.000000e-01 : f32
    %537 = vector.broadcast %cst_198 : f32 to vector<8x16xf32>
    %538 = arith.mulf %537, %536 : vector<8x16xf32>
    %cst_199 = arith.constant 4.471500e-02 : f32
    %539 = vector.broadcast %cst_199 : f32 to vector<8x16xf32>
    %540 = arith.mulf %539, %536 : vector<8x16xf32>
    %541 = arith.mulf %540, %536 : vector<8x16xf32>
    %542 = arith.mulf %541, %536 : vector<8x16xf32>
    %543 = arith.addf %536, %542 : vector<8x16xf32>
    %cst_200 = arith.constant 0.797884583 : f32
    %544 = vector.broadcast %cst_200 : f32 to vector<8x16xf32>
    %545 = arith.mulf %544, %543 : vector<8x16xf32>
    %546 = math.tanh %545 : vector<8x16xf32>
    %cst_201 = arith.constant 1.000000e+00 : f32
    %547 = vector.broadcast %cst_201 : f32 to vector<8x16xf32>
    %548 = arith.addf %547, %546 : vector<8x16xf32>
    %549 = arith.mulf %538, %548 : vector<8x16xf32>
    %c1400 = arith.constant 1400 : index
    %c0_202 = arith.constant 0 : index
    %550 = vector.load %arg4[%c1400, %c0_202] : memref<1464x32xbf16, #tpu.memory_space<vmem>>, vector<16x32xbf16>
    %551 = arith.truncf %549 : vector<8x16xf32> to vector<8x16xbf16>
    %cst_203 = arith.constant dense<0.000000e+00> : vector<8x32xf32>
    %552 = tpu.matmul %551, %550, %cst_203 {dimension_numbers = #tpu.dot_dimension_numbers<[1], [0], [0], [1], [0, 0, 1, 1], [], []>} : vector<8x16xbf16>, vector<16x32xbf16>, vector<8x32xf32> -> vector<8x32xf32>
    %c208 = arith.constant 208 : index
    %c0_204 = arith.constant 0 : index
    %553 = vector.load %arg5[%c208, %c0_204] : memref<336x32xf32, #tpu.memory_space<vmem>>, vector<1x32xf32>
    %554 = vector.broadcast %553 : vector<1x32xf32> to vector<8x32xf32>
    %555 = arith.addf %552, %554 : vector<8x32xf32>
    %cst_205 = arith.constant dense<0.000000e+00> : vector<8xf32>
    %556 = vector.multi_reduction <add>, %555, %cst_205 [1] : vector<8x32xf32> to vector<8xf32>
    %557 = vector.shape_cast %556 : vector<8xf32> to vector<8x1xf32>
    %cst_206 = arith.constant 3.125000e-02 : f32
    %558 = vector.broadcast %cst_206 : f32 to vector<8x1xf32>
    %559 = arith.mulf %557, %558 : vector<8x1xf32>
    %560 = arith.mulf %555, %555 : vector<8x32xf32>
    %cst_207 = arith.constant dense<0.000000e+00> : vector<8xf32>
    %561 = vector.multi_reduction <add>, %560, %cst_207 [1] : vector<8x32xf32> to vector<8xf32>
    %562 = vector.shape_cast %561 : vector<8xf32> to vector<8x1xf32>
    %cst_208 = arith.constant 3.125000e-02 : f32
    %563 = vector.broadcast %cst_208 : f32 to vector<8x1xf32>
    %564 = arith.mulf %562, %563 : vector<8x1xf32>
    %565 = arith.mulf %559, %559 : vector<8x1xf32>
    %566 = arith.subf %564, %565 : vector<8x1xf32>
    %567 = vector.broadcast %559 : vector<8x1xf32> to vector<8x32xf32>
    %568 = arith.subf %555, %567 : vector<8x32xf32>
    %cst_209 = arith.constant 9.99999974E-6 : f32
    %569 = vector.broadcast %cst_209 : f32 to vector<8x1xf32>
    %570 = arith.addf %566, %569 : vector<8x1xf32>
    %571 = math.rsqrt %570 : vector<8x1xf32>
    %572 = vector.broadcast %571 : vector<8x1xf32> to vector<8x32xf32>
    %573 = arith.mulf %568, %572 : vector<8x32xf32>
    %c216 = arith.constant 216 : index
    %c0_210 = arith.constant 0 : index
    %574 = vector.load %arg5[%c216, %c0_210] : memref<336x32xf32, #tpu.memory_space<vmem>>, vector<1x32xf32>
    %575 = vector.broadcast %574 : vector<1x32xf32> to vector<8x32xf32>
    %576 = arith.mulf %573, %575 : vector<8x32xf32>
    %c224_211 = arith.constant 224 : index
    %c0_212 = arith.constant 0 : index
    %577 = vector.load %arg5[%c224_211, %c0_212] : memref<336x32xf32, #tpu.memory_space<vmem>>, vector<1x32xf32>
    %578 = vector.broadcast %577 : vector<1x32xf32> to vector<8x32xf32>
    %579 = arith.addf %576, %578 : vector<8x32xf32>
    %cst_213 = arith.constant 5.000000e-01 : f32
    %580 = vector.broadcast %cst_213 : f32 to vector<8x32xf32>
    %581 = arith.mulf %580, %579 : vector<8x32xf32>
    %cst_214 = arith.constant 4.471500e-02 : f32
    %582 = vector.broadcast %cst_214 : f32 to vector<8x32xf32>
    %583 = arith.mulf %582, %579 : vector<8x32xf32>
    %584 = arith.mulf %583, %579 : vector<8x32xf32>
    %585 = arith.mulf %584, %579 : vector<8x32xf32>
    %586 = arith.addf %579, %585 : vector<8x32xf32>
    %cst_215 = arith.constant 0.797884583 : f32
    %587 = vector.broadcast %cst_215 : f32 to vector<8x32xf32>
    %588 = arith.mulf %587, %586 : vector<8x32xf32>
    %589 = math.tanh %588 : vector<8x32xf32>
    %cst_216 = arith.constant 1.000000e+00 : f32
    %590 = vector.broadcast %cst_216 : f32 to vector<8x32xf32>
    %591 = arith.addf %590, %589 : vector<8x32xf32>
    %592 = arith.mulf %581, %591 : vector<8x32xf32>
    %cst_217 = arith.constant 8.000000e-01 : f32
    %593 = vector.broadcast %cst_217 : f32 to vector<8x32xf32>
    %594 = arith.mulf %593, %592 : vector<8x32xf32>
    %cst_218 = arith.constant 2.000000e-01 : f32
    %595 = vector.broadcast %cst_218 : f32 to vector<8x32xf32>
    %596 = arith.mulf %595, %417 : vector<8x32xf32>
    %597 = arith.addf %594, %596 : vector<8x32xf32>
    %c1416 = arith.constant 1416 : index
    %c0_219 = arith.constant 0 : index
    %598 = vector.load %arg4[%c1416, %c0_219] : memref<1464x32xbf16, #tpu.memory_space<vmem>>, vector<32x32xbf16>
    %599 = arith.truncf %597 : vector<8x32xf32> to vector<8x32xbf16>
    %cst_220 = arith.constant dense<0.000000e+00> : vector<8x32xf32>
    %600 = tpu.matmul %599, %598, %cst_220 {dimension_numbers = #tpu.dot_dimension_numbers<[1], [0], [0], [1], [0, 0, 1, 1], [], []>} : vector<8x32xbf16>, vector<32x32xbf16>, vector<8x32xf32> -> vector<8x32xf32>
    %601 = vector.extract_strided_slice %600 {offsets = [0, 0], sizes = [8, 16], strides = [1, 1]} : vector<8x32xf32> to vector<8x16xf32>
    %c232 = arith.constant 232 : index
    %c0_221 = arith.constant 0 : index
    %602 = vector.load %arg5[%c232, %c0_221] : memref<336x32xf32, #tpu.memory_space<vmem>>, vector<1x16xf32>
    %603 = vector.broadcast %602 : vector<1x16xf32> to vector<8x16xf32>
    %604 = arith.addf %601, %603 : vector<8x16xf32>
    %cst_222 = arith.constant 5.000000e-01 : f32
    %605 = vector.broadcast %cst_222 : f32 to vector<8x16xf32>
    %606 = arith.mulf %605, %604 : vector<8x16xf32>
    %cst_223 = arith.constant 4.471500e-02 : f32
    %607 = vector.broadcast %cst_223 : f32 to vector<8x16xf32>
    %608 = arith.mulf %607, %604 : vector<8x16xf32>
    %609 = arith.mulf %608, %604 : vector<8x16xf32>
    %610 = arith.mulf %609, %604 : vector<8x16xf32>
    %611 = arith.addf %604, %610 : vector<8x16xf32>
    %cst_224 = arith.constant 0.797884583 : f32
    %612 = vector.broadcast %cst_224 : f32 to vector<8x16xf32>
    %613 = arith.mulf %612, %611 : vector<8x16xf32>
    %614 = math.tanh %613 : vector<8x16xf32>
    %cst_225 = arith.constant 1.000000e+00 : f32
    %615 = vector.broadcast %cst_225 : f32 to vector<8x16xf32>
    %616 = arith.addf %615, %614 : vector<8x16xf32>
    %617 = arith.mulf %606, %616 : vector<8x16xf32>
    %c240 = arith.constant 240 : index
    %c0_226 = arith.constant 0 : index
    %618 = vector.load %arg5[%c240, %c0_226] : memref<336x32xf32, #tpu.memory_space<vmem>>, vector<1x16xf32>
    %619 = vector.broadcast %618 : vector<1x16xf32> to vector<8x16xf32>
    %620 = arith.mulf %617, %619 : vector<8x16xf32>
    %cst_227 = arith.constant dense<0.000000e+00> : vector<8xf32>
    %621 = vector.multi_reduction <add>, %620, %cst_227 [1] : vector<8x16xf32> to vector<8xf32>
    %622 = vector.shape_cast %621 : vector<8xf32> to vector<8x1xf32>
    %c248 = arith.constant 248 : index
    %c0_228 = arith.constant 0 : index
    %623 = vector.load %arg5[%c248, %c0_228] : memref<336x32xf32, #tpu.memory_space<vmem>>, vector<1x1xf32>
    %624 = vector.broadcast %623 : vector<1x1xf32> to vector<8x1xf32>
    %625 = arith.addf %622, %624 : vector<8x1xf32>
    %c256_229 = arith.constant 256 : index
    %c0_230 = arith.constant 0 : index
    %626 = vector.load %arg5[%c256_229, %c0_230] : memref<336x32xf32, #tpu.memory_space<vmem>>, vector<1x32xf32>
    %627 = vector.broadcast %626 : vector<1x32xf32> to vector<8x32xf32>
    %628 = arith.mulf %597, %627 : vector<8x32xf32>
    %cst_231 = arith.constant dense<0.000000e+00> : vector<8xf32>
    %629 = vector.multi_reduction <add>, %628, %cst_231 [1] : vector<8x32xf32> to vector<8xf32>
    %630 = vector.shape_cast %629 : vector<8xf32> to vector<8x1xf32>
    %c264 = arith.constant 264 : index
    %c0_232 = arith.constant 0 : index
    %631 = vector.load %arg5[%c264, %c0_232] : memref<336x32xf32, #tpu.memory_space<vmem>>, vector<1x1xf32>
    %632 = vector.broadcast %631 : vector<1x1xf32> to vector<8x1xf32>
    %633 = arith.addf %630, %632 : vector<8x1xf32>
    %634 = arith.mulf %2, %3 : vector<8x16xf32>
    %cst_233 = arith.constant dense<0.000000e+00> : vector<8xf32>
    %635 = vector.multi_reduction <add>, %634, %cst_233 [1] : vector<8x16xf32> to vector<8xf32>
    %636 = vector.shape_cast %635 : vector<8xf32> to vector<8x1xf32>
    %637 = arith.mulf %0, %1 : vector<8x16xf32>
    %cst_234 = arith.constant dense<0.000000e+00> : vector<8xf32>
    %638 = vector.multi_reduction <add>, %637, %cst_234 [1] : vector<8x16xf32> to vector<8xf32>
    %639 = vector.shape_cast %638 : vector<8xf32> to vector<8x1xf32>
    %c328 = arith.constant 328 : index
    %c0_235 = arith.constant 0 : index
    %640 = vector.load %arg5[%c328, %c0_235] : memref<336x32xf32, #tpu.memory_space<vmem>>, vector<1x1xf32>
    %641 = vector.broadcast %640 : vector<1x1xf32> to vector<8x1xf32>
    %642 = arith.mulf %639, %641 : vector<8x1xf32>
    %c1448 = arith.constant 1448 : index
    %c0_236 = arith.constant 0 : index
    %643 = vector.load %arg4[%c1448, %c0_236] : memref<1464x32xbf16, #tpu.memory_space<vmem>>, vector<16x32xbf16>
    %644 = arith.truncf %0 : vector<8x16xf32> to vector<8x16xbf16>
    %cst_237 = arith.constant dense<0.000000e+00> : vector<8x32xf32>
    %645 = tpu.matmul %644, %643, %cst_237 {dimension_numbers = #tpu.dot_dimension_numbers<[1], [0], [0], [1], [0, 0, 1, 1], [], []>} : vector<8x16xbf16>, vector<16x32xbf16>, vector<8x32xf32> -> vector<8x32xf32>
    %646 = vector.extract_strided_slice %645 {offsets = [0, 0], sizes = [8, 16], strides = [1, 1]} : vector<8x32xf32> to vector<8x16xf32>
    %647 = arith.mulf %646, %1 : vector<8x16xf32>
    %cst_238 = arith.constant dense<0.000000e+00> : vector<8xf32>
    %648 = vector.multi_reduction <add>, %647, %cst_238 [1] : vector<8x16xf32> to vector<8xf32>
    %649 = vector.shape_cast %648 : vector<8xf32> to vector<8x1xf32>
    %c320_239 = arith.constant 320 : index
    %c0_240 = arith.constant 0 : index
    %650 = vector.load %arg5[%c320_239, %c0_240] : memref<336x32xf32, #tpu.memory_space<vmem>>, vector<1x1xf32>
    %651 = vector.broadcast %650 : vector<1x1xf32> to vector<8x1xf32>
    %652 = arith.addf %649, %651 : vector<8x1xf32>
    %c272 = arith.constant 272 : index
    %c0_241 = arith.constant 0 : index
    %653 = vector.load %arg5[%c272, %c0_241] : memref<336x32xf32, #tpu.memory_space<vmem>>, vector<1x8xf32>
    %654 = vector.broadcast %4 : vector<8x1xf32> to vector<8x8xf32>
    %655 = vector.broadcast %653 : vector<1x8xf32> to vector<8x8xf32>
    %656 = arith.mulf %654, %655 : vector<8x8xf32>
    %c280 = arith.constant 280 : index
    %c0_242 = arith.constant 0 : index
    %657 = vector.load %arg5[%c280, %c0_242] : memref<336x32xf32, #tpu.memory_space<vmem>>, vector<1x8xf32>
    %658 = vector.broadcast %657 : vector<1x8xf32> to vector<8x8xf32>
    %659 = arith.addf %656, %658 : vector<8x8xf32>
    %cst_243 = arith.constant 5.000000e-01 : f32
    %660 = vector.broadcast %cst_243 : f32 to vector<8x8xf32>
    %661 = arith.mulf %660, %659 : vector<8x8xf32>
    %cst_244 = arith.constant 4.471500e-02 : f32
    %662 = vector.broadcast %cst_244 : f32 to vector<8x8xf32>
    %663 = arith.mulf %662, %659 : vector<8x8xf32>
    %664 = arith.mulf %663, %659 : vector<8x8xf32>
    %665 = arith.mulf %664, %659 : vector<8x8xf32>
    %666 = arith.addf %659, %665 : vector<8x8xf32>
    %cst_245 = arith.constant 0.797884583 : f32
    %667 = vector.broadcast %cst_245 : f32 to vector<8x8xf32>
    %668 = arith.mulf %667, %666 : vector<8x8xf32>
    %669 = math.tanh %668 : vector<8x8xf32>
    %cst_246 = arith.constant 1.000000e+00 : f32
    %670 = vector.broadcast %cst_246 : f32 to vector<8x8xf32>
    %671 = arith.addf %670, %669 : vector<8x8xf32>
    %672 = arith.mulf %661, %671 : vector<8x8xf32>
    %c288_247 = arith.constant 288 : index
    %c0_248 = arith.constant 0 : index
    %673 = vector.load %arg5[%c288_247, %c0_248] : memref<336x32xf32, #tpu.memory_space<vmem>>, vector<1x8xf32>
    %674 = vector.broadcast %673 : vector<1x8xf32> to vector<8x8xf32>
    %675 = arith.mulf %672, %674 : vector<8x8xf32>
    %cst_249 = arith.constant dense<0.000000e+00> : vector<8xf32>
    %676 = vector.multi_reduction <add>, %675, %cst_249 [1] : vector<8x8xf32> to vector<8xf32>
    %677 = vector.shape_cast %676 : vector<8xf32> to vector<8x1xf32>
    %c296 = arith.constant 296 : index
    %c0_250 = arith.constant 0 : index
    %678 = vector.load %arg5[%c296, %c0_250] : memref<336x32xf32, #tpu.memory_space<vmem>>, vector<1x1xf32>
    %679 = vector.broadcast %678 : vector<1x1xf32> to vector<8x1xf32>
    %680 = arith.addf %677, %679 : vector<8x1xf32>
    %681 = arith.negf %680 : vector<8x1xf32>
    %682 = math.exp %681 : vector<8x1xf32>
    %cst_251 = arith.constant 1.000000e+00 : f32
    %683 = vector.broadcast %cst_251 : f32 to vector<8x1xf32>
    %684 = arith.addf %683, %682 : vector<8x1xf32>
    %685 = arith.divf %683, %684 : vector<8x1xf32>
    %c304 = arith.constant 304 : index
    %c0_252 = arith.constant 0 : index
    %686 = vector.load %arg5[%c304, %c0_252] : memref<336x32xf32, #tpu.memory_space<vmem>>, vector<1x8xf32>
    %687 = vector.broadcast %686 : vector<1x8xf32> to vector<8x8xf32>
    %688 = arith.mulf %5, %687 : vector<8x8xf32>
    %cst_253 = arith.constant dense<0.000000e+00> : vector<8xf32>
    %689 = vector.multi_reduction <add>, %688, %cst_253 [1] : vector<8x8xf32> to vector<8xf32>
    %690 = vector.shape_cast %689 : vector<8xf32> to vector<8x1xf32>
    %c312 = arith.constant 312 : index
    %c0_254 = arith.constant 0 : index
    %691 = vector.load %arg5[%c312, %c0_254] : memref<336x32xf32, #tpu.memory_space<vmem>>, vector<1x1xf32>
    %692 = vector.broadcast %691 : vector<1x1xf32> to vector<8x1xf32>
    %693 = arith.addf %690, %692 : vector<8x1xf32>
    %694 = arith.addf %6, %693 : vector<8x1xf32>
    %695 = arith.addf %694, %652 : vector<8x1xf32>
    %696 = arith.addf %625, %633 : vector<8x1xf32>
    %697 = arith.addf %696, %636 : vector<8x1xf32>
    %698 = arith.addf %697, %642 : vector<8x1xf32>
    %699 = arith.addf %698, %695 : vector<8x1xf32>
    %cst_255 = arith.constant 1.500000e-01 : f32
    %700 = vector.broadcast %cst_255 : f32 to vector<8x1xf32>
    %701 = arith.mulf %700, %685 : vector<8x1xf32>
    %702 = arith.addf %699, %701 : vector<8x1xf32>
    %c0_256 = arith.constant 0 : index
    %c0_257 = arith.constant 0 : index
    %703 = vector.load %arg6[%c0_256, %c0_257] : memref<8x1xf32, #tpu.memory_space<vmem>>, vector<8x1xf32>
    tpu.vector_store %arg6[%c0_256, %c0_257], %702 {strides = array<i32>} : memref<8x1xf32, #tpu.memory_space<vmem>>, vector<8x1xf32>,
    return
  }
  func.func @transform_0(%arg0: i32) -> (i32, i32) {
    %c0_i32 = arith.constant 0 : i32
    %c0_i32_0 = arith.constant 0 : i32
    return %arg0, %c0_i32 : i32, i32
  }
  func.func @transform_1(%arg0: i32) -> (i32, i32) {
    %c0_i32 = arith.constant 0 : i32
    %c0_i32_0 = arith.constant 0 : i32
    return %arg0, %c0_i32 : i32, i32
  }
  func.func @transform_2(%arg0: i32) -> (i32, i32) {
    %c0_i32 = arith.constant 0 : i32
    %c0_i32_0 = arith.constant 0 : i32
    %c0_i32_1 = arith.constant 0 : i32
    return %c0_i32, %c0_i32_0 : i32, i32
  }
  func.func @transform_3(%arg0: i32) -> (i32, i32) {
    %c0_i32 = arith.constant 0 : i32
    %c0_i32_0 = arith.constant 0 : i32
    %c0_i32_1 = arith.constant 0 : i32
    return %c0_i32, %c0_i32_0 : i32, i32
  }
  func.func @transform_4(%arg0: i32) -> (i32, i32) {
    %c0_i32 = arith.constant 0 : i32
    %c0_i32_0 = arith.constant 0 : i32
    %c0_i32_1 = arith.constant 0 : i32
    return %c0_i32, %c0_i32_0 : i32, i32
  }
  func.func @transform_5(%arg0: i32) -> (i32, i32) {
    %c0_i32 = arith.constant 0 : i32
    %c0_i32_0 = arith.constant 0 : i32
    return %arg0, %c0_i32 : i32, i32
  }
}

</mosaic_0001>

<bundles_post_ra>
// kernel: _lambda_.2
= control target key start
LH: loop header
LB: loop body
LE: loop exit
PB: predicated region body
PF: predicated region fallthrough
CT: control target
= control target key end

     0   :  { %vm38_vm0 = vcmask 261120   ;;  %vm270_vm10 = vcmask 523264   ;;  %s618_s13 = smov 64   ;;  %s620_s16 = smov 32   ;;  %s810_s1 = inlined_call_operand.vmem [shape: bf16[128,32], index: 1, kind: input, shape index: {}]   ;;  %s811_s0 = inlined_call_operand.vmem [shape: f32[8,75], index: 0, kind: input, shape index: {}]   ;;  %s812_s3 = inlined_call_operand.vmem [shape: f32[136,128], index: 3, kind: input, shape index: {}]   ;;  %s813_s2 = inlined_call_operand.vmem [shape: bf16[64,128], index: 2, kind: input, shape index: {}]   ;;  %s814_s4 = inlined_call_operand.vmem [shape: f32[8,160], index: 4, kind: output, shape index: {}]  }
   0x1   :  { %v560_v0 = vld [vmem:[%s810_s1 + $0x8] sm:$0xff]  ;;  %v559_v1 = vld [vmem:[%s810_s1] sm:$0xff]  ;;  %v579_v27 = vld [vmem:[%s812_s3 + $0x10] ss:$0 sm:$0xff] }
   0x2   :  { %v656_v2 = vld [vmem:[%s811_s0] sm:$0xff]  ;;  %48 = vmatpush.bf16.msra.mxu0 %v560_v0  ;;  %v578_v25 = vld [vmem:[%s812_s3 + $0x8] ss:$0 sm:$0xff]  ;;  %v562_v44 = vld [vmem:[%s810_s1 + $0x18] sm:$0xff] }
   0x3   :  { %v23_v3 = vpack.c.bf16 %v656_v2, %v656_v2  ;;  %v577_v4 = vld [vmem:[%s812_s3] ss:$0 sm:$0xff]  ;;  %152 = vmatpush.bf16.msra.mxu1 %v562_v44  ;;  %v561_v45 = vld [vmem:[%s810_s1 + $0x10] sm:$0xff]  ;;  %v580_v59 = vld [vmem:[%s812_s3 + $0x18] ss:$0 sm:$0xff] }
   0x4   :  { %v581_v62 = vld [vmem:[%s812_s3 + $0x20] ss:$0 sm:$0xff] }
   0x6   :  { %49 = vmatpush.bf16.msra.mxu0 %v559_v1 }
   0x7   :  { %153 = vmatpush.bf16.msra.mxu1 %v561_v45 }
   0x9   :  { %514 = vmatmul.msk.bf16.vlgmr.msra.gmra.mxu0 %vm38_vm0, %v23_v3  ;;  %v582_v3 = vld [vmem:[%s812_s3 + $0x28] ss:$0 sm:$0xff] }
  0x86   :  { %v51_v5 = vpop.f32.mrf.mxu0 }
  0x87   :  { %v52_v6 = vadd.f32 %v577_v4, %v51_v5 }
  0x89   :  { %v55_v7 = vsel %vm38_vm0, %v52_v6, 0.0  ;;  %v59_v8 = vmul.f32 %v52_v6, %v52_v6 }
  0x8a   :  { %56 = vadd.xlane.f32.xlu0 %v55_v7 }
  0x8b   :  { %v60_v10 = vsel %vm38_vm0, %v59_v8, 0.0 }
  0x8e   :  { %v53_v9 = vpop.f32.mrf.mxu0 }
  0x92   :  { %61 = vadd.xlane.f32.xlu0 %v60_v10 }
  0xfd   :  { %v57_v11 = vpop.xlane.xlu0 %56 }
  0xfe   :  { %v58_v12 = vmul.f32 0.03125, %v57_v11 }
 0x100   :  { %v64_v14 = vmul.f32 %v58_v12, %v58_v12  ;;  %v66_v24 = vsub.f32 %v52_v6, %v58_v12  ;;  %v564_v12 = vld [vmem:[%s813_s2 + $0x8] sm:$0xff] }
 0x101   :  { %216 = vmatpush.bf16.msra.mxu2 %v564_v12 }
 0x105   :  { %v62_v13 = vpop.xlane.xlu0 %61 }
 0x106   :  { %v63_v15 = vmul.f32 0.03125, %v62_v13  ;;  %v563_v13 = vld [vmem:[%s813_s2] sm:$0xff] }
 0x107   :  { %217 = vmatpush.bf16.msra.mxu2 %v563_v13 }
 0x108   :  { %v65_v16 = vsub.f32 %v63_v15, %v64_v14 }
 0x10a   :  { %v67_v17 = vadd.f32 1e-05, %v65_v16 }
 0x10c   :  { %594 = vrsqrt.f32 %v67_v17  ;;  %vm74_vm2 = vweird.f32 %v67_v17 }
 0x112   :  { %v595_v18 = vpop.eup %594 }
 0x113   :  { %v69_v19 = vmul.f32 %v595_v18, %v67_v17  ;;  %vm75_vm1 = vweird.f32 %v595_v18 }
 0x114   :  { %vm76_vm3 = vmor %vm74_vm2, %vm75_vm1 }
 0x115   :  { %v70_v20 = vmul.f32 %v595_v18, %v69_v19 }
 0x117   :  { %v71_v21 = vmul.f32 0.5, %v70_v20 }
 0x119   :  { %v72_v22 = vsub.f32 1.5, %v71_v21 }
 0x11b   :  { %v73_v23 = vmul.f32 %v595_v18, %v72_v22 }
 0x11d   :  { %v77_v26 = vsel %vm76_vm3, %v595_v18, %v73_v23 }
 0x11e   :  { %v78_v28 = vmul.f32 %v77_v26, %v66_v24 }
 0x120   :  { %v81_v29 = vmul.f32 %v578_v25, %v78_v28 }
 0x122   :  { %v84_v30 = vadd.f32 %v579_v27, %v81_v29  ;;  %v583_v27 = vld [vmem:[%s812_s3 + $0x30] ss:$0 sm:$0xff] }
 0x124   :  { %v86_v31 = vmul.f32 0.044715, %v84_v30  ;;  %v85_v37 = vmul.f32 0.5, %v84_v30 }
 0x126   :  { %v87_v32 = vmul.f32 %v86_v31, %v84_v30 }
 0x128   :  { %v88_v33 = vmul.f32 %v87_v32, %v84_v30 }
 0x12a   :  { %v89_v34 = vadd.f32 %v88_v33, %v84_v30  ;;  %v584_v30 = vld [vmem:[%s812_s3 + $0x38] ss:$0 sm:$0xff] }
 0x12c   :  { %v90_v35 = vmul.f32 0.7978846, %v89_v34  ;;  %v568_v34 = vld [vmem:[%s810_s1 + $0x38] sm:$0xff] }
 0x12d   :  { %278 = vmatpush.bf16.msra.mxu3 %v568_v34 }
 0x12e   :  { %596 = vtanh.f32 %v90_v35  ;;  %v567_v35 = vld [vmem:[%s810_s1 + $0x30] sm:$0xff] }
 0x131   :  { %279 = vmatpush.bf16.msra.mxu3 %v567_v35  ;;  %v591_v35 = vld [vmem:[%s812_s3 + $0x78] ss:$0 sm:$0xff] }
 0x134   :  { %v597_v36 = vpop.eup %596 }
 0x135   :  { %v92_v38 = vadd.f32 1.0, %v597_v36  ;;  %v566_v36 = vld [vmem:[%s810_s1 + $0x28] sm:$0xff] }
 0x136   :  { %280 = vmatpush.bf16.msra.mxu3 %v566_v36 }
 0x137   :  { %v672_v39 = vmul.f32 %v92_v38, %v85_v37  ;;  %v565_v37 = vld [vmem:[%s810_s1 + $0x20] sm:$0xff] }
 0x138   :  { %v585_v38 = vld [vmem:[%s812_s3 + $0x40] ss:$0 sm:$0xff] }
 0x139   :  { %v94_v40 = vsel %vm38_vm0, %v672_v39, 0.0  ;;  %v98_v41 = vmul.f32 %v672_v39, %v672_v39 }
 0x13a   :  { %95 = vadd.xlane.f32.xlu1 %v94_v40  ;;  %281 = vmatpush.bf16.msra.mxu3 %v565_v37 }
 0x13b   :  { %v99_v42 = vsel %vm38_vm0, %v98_v41, 0.0 }
 0x142   :  { %100 = vadd.xlane.f32.xlu1 %v99_v42 }
 0x1ad   :  { %v96_v43 = vpop.xlane.xlu1 %95 }
 0x1ae   :  { %v97_v46 = vmul.f32 0.03125, %v96_v43 }
 0x1b0   :  { %v103_v48 = vmul.f32 %v97_v46, %v97_v46  ;;  %v105_v58 = vsub.f32 %v672_v39, %v97_v46 }
 0x1b5   :  { %v101_v47 = vpop.xlane.xlu1 %100 }
 0x1b6   :  { %v102_v49 = vmul.f32 0.03125, %v101_v47 }
 0x1b8   :  { %v104_v50 = vsub.f32 %v102_v49, %v103_v48 }
 0x1ba   :  { %v106_v51 = vadd.f32 1e-05, %v104_v50 }
 0x1bc   :  { %598 = vrsqrt.f32 %v106_v51  ;;  %vm113_vm5 = vweird.f32 %v106_v51 }
 0x1c2   :  { %v599_v52 = vpop.eup %598 }
 0x1c3   :  { %v108_v53 = vmul.f32 %v599_v52, %v106_v51  ;;  %vm114_vm4 = vweird.f32 %v599_v52 }
 0x1c4   :  { %vm115_vm6 = vmor %vm113_vm5, %vm114_vm4 }
 0x1c5   :  { %v109_v54 = vmul.f32 %v599_v52, %v108_v53  ;;  %v586_v53 = vld [vmem:[%s812_s3 + $0x48] ss:$0 sm:$0xff] }
 0x1c7   :  { %v110_v55 = vmul.f32 0.5, %v109_v54 }
 0x1c9   :  { %v111_v56 = vsub.f32 1.5, %v110_v55 }
 0x1cb   :  { %v112_v57 = vmul.f32 %v599_v52, %v111_v56 }
 0x1cd   :  { %v116_v60 = vsel %vm115_vm6, %v599_v52, %v112_v57 }
 0x1ce   :  { %v117_v61 = vmul.f32 %v116_v60, %v105_v58 }
 0x1d0   :  { %v120_v63 = vmul.f32 %v580_v59, %v117_v61  ;;  %v570_v61 = vld [vmem:[%s813_s2 + $0x18] sm:$0xff] }
 0x1d1   :  { %349 = vmatpush.bf16.msrb.mxu0 %v570_v61 }
 0x1d2   :  { %v123_v0 = vadd.f32 %v581_v62, %v120_v63  ;;  %v569_v62 = vld [vmem:[%s813_s2 + $0x10] sm:$0xff] }
 0x1d4   :  { %v128_v1 = vpack.c.bf16 %v123_v0, %v123_v0 }
 0x1d5   :  { %350 = vmatpush.bf16.msrb.mxu0 %v569_v62 }
 0x1d6   :  { %523 = vmatmul.msk.bf16.vlgmr.msra.gmra.mxu1 %vm38_vm0, %v128_v1 }
 0x253   :  { %v155_v4 = vpop.f32.mrf.mxu1 }
 0x254   :  { %v156_v5 = vadd.f32 %v582_v3, %v155_v4 }
 0x256   :  { %v159_v6 = vadd.f32 %v156_v5, %v123_v0 }
 0x258   :  { %v160_v7 = vsel %vm38_vm0, %v159_v6, 0.0  ;;  %v164_v9 = vmul.f32 %v159_v6, %v159_v6 }
 0x259   :  { %161 = vadd.xlane.f32.xlu2 %v160_v7 }
 0x25a   :  { %v165_v10 = vsel %vm38_vm0, %v164_v9, 0.0 }
 0x25b   :  { %v157_v8 = vpop.f32.mrf.mxu1 }
 0x261   :  { %166 = vadd.xlane.f32.xlu2 %v165_v10 }
 0x2cc   :  { %v162_v11 = vpop.xlane.xlu2 %161 }
 0x2cd   :  { %v163_v14 = vmul.f32 0.03125, %v162_v11 }
 0x2cf   :  { %v169_v16 = vmul.f32 %v163_v14, %v163_v14  ;;  %v171_v26 = vsub.f32 %v159_v6, %v163_v14  ;;  %v587_v14 = vld [vmem:[%s812_s3 + $0x50] ss:$0 sm:$0xff] }
 0x2d4   :  { %v167_v15 = vpop.xlane.xlu2 %166 }
 0x2d5   :  { %v168_v17 = vmul.f32 0.03125, %v167_v15 }
 0x2d7   :  { %v170_v18 = vsub.f32 %v168_v17, %v169_v16  ;;  %v588_v17 = vld [vmem:[%s812_s3 + $0x58] ss:$0 sm:$0xff] }
 0x2d9   :  { %v172_v19 = vadd.f32 1e-05, %v170_v18 }
 0x2db   :  { %600 = vrsqrt.f32 %v172_v19  ;;  %vm179_vm8 = vweird.f32 %v172_v19 }
 0x2e1   :  { %v601_v20 = vpop.eup %600 }
 0x2e2   :  { %v174_v21 = vmul.f32 %v601_v20, %v172_v19  ;;  %vm180_vm7 = vweird.f32 %v601_v20 }
 0x2e3   :  { %vm181_vm9 = vmor %vm179_vm8, %vm180_vm7 }
 0x2e4   :  { %v175_v22 = vmul.f32 %v601_v20, %v174_v21  ;;  %v319_v21 = vmul.f32 0.2, %v672_v39 }
 0x2e6   :  { %v176_v23 = vmul.f32 0.5, %v175_v22 }
 0x2e8   :  { %v177_v24 = vsub.f32 1.5, %v176_v23 }
 0x2ea   :  { %v178_v25 = vmul.f32 %v601_v20, %v177_v24  ;;  %v589_v24 = vld [vmem:[%s812_s3 + $0x60] ss:$0 sm:$0xff] }
 0x2ec   :  { %v182_v28 = vsel %vm181_vm9, %v601_v20, %v178_v25 }
 0x2ed   :  { %v183_v29 = vmul.f32 %v182_v28, %v171_v26 }
 0x2ef   :  { %v186_v31 = vmul.f32 %v583_v27, %v183_v29  ;;  %v590_v27 = vld [vmem:[%s812_s3 + $0x80] ss:$0 sm:$0xff]  ;;  %v619_v29 = vmov 74  }
 0x2f0   :  { %575 = vset.pattern.permute.xlu2 %v619_v29  ;;  %576 = vset.pattern.permute.xlu0 %v619_v29 }
 0x2f1   :  { %v189_v32 = vadd.f32 %v584_v30, %v186_v31 }
 0x2f3   :  { %v194_v33 = vpack.c.bf16 %v189_v32, %v189_v32 }
 0x2f5   :  { %532 = vmatmul.msk.bf16.vlgmr.msra.gmra.mxu2 %vm38_vm0, %v194_v33 }
 0x378   :  { %v219_v40 = vpop.f32.mrf.mxu2 }
 0x379   :  { %v225_v41 = vadd.f32 %v585_v38, %v219_v40 }
 0x37b   :  { %v227_v42 = vmul.f32 0.044715, %v225_v41  ;;  %v226_v49 = vmul.f32 0.5, %v225_v41 }
 0x37d   :  { %v228_v43 = vmul.f32 %v227_v42, %v225_v41 }
 0x37f   :  { %v229_v44 = vmul.f32 %v228_v43, %v225_v41 }
 0x380   :  { %v221_v45 = vpop.f32.mrf.mxu2 }
 0x381   :  { %v230_v46 = vadd.f32 %v229_v44, %v225_v41 }
 0x383   :  { %v231_v47 = vmul.f32 0.7978846, %v230_v46 }
 0x385   :  { %602 = vtanh.f32 %v231_v47 }
 0x38b   :  { %v603_v48 = vpop.eup %602 }
 0x38c   :  { %v233_v50 = vadd.f32 1.0, %v603_v48 }
 0x38e   :  { %v234_v51 = vmul.f32 %v233_v50, %v226_v49 }
 0x390   :  { %v243_v52 = vpack.c.bf16 %v234_v51, %v234_v51 }
 0x392   :  { %549 = vmatmul.msk.bf16.vlgmr.msra.gmra.mxu3 %vm270_vm10, %v243_v52  ;;  %vm488_vm10 = vcmask 523520  }
 0x415   :  { %v283_v54 = vpop.f32.mrf.mxu3 }
 0x416   :  { %v284_v55 = vadd.f32 %v586_v53, %v283_v54 }
 0x418   :  { %v287_v56 = vadd.f32 %v284_v55, %v189_v32 }
 0x41a   :  { %v288_v57 = vsel %vm38_vm0, %v287_v56, 0.0  ;;  %v292_v58 = vmul.f32 %v287_v56, %v287_v56 }
 0x41b   :  { %289 = vadd.xlane.f32.xlu0 %v288_v57 }
 0x41c   :  { %v293_v59 = vsel %vm38_vm0, %v292_v58, 0.0 }
 0x41d   :  { %v285_v60 = vpop.f32.mrf.mxu3  ;;  %294 = vadd.xlane.f32.xlu1 %v293_v59 }
 0x48e   :  { %v290_v63 = vpop.xlane.xlu0 %289 }
 0x48f   :  { %v291_v0 = vmul.f32 0.03125, %v290_v63 }
 0x490   :  { %v295_v1 = vpop.xlane.xlu1 %294 }
 0x491   :  { %v297_v3 = vmul.f32 %v291_v0, %v291_v0  ;;  %v296_v4 = vmul.f32 0.03125, %v295_v1  ;;  %v299_v13 = vsub.f32 %v287_v56, %v291_v0 }
 0x493   :  { %v298_v5 = vsub.f32 %v296_v4, %v297_v3 }
 0x495   :  { %v300_v6 = vadd.f32 1e-05, %v298_v5 }
 0x497   :  { %604 = vrsqrt.f32 %v300_v6  ;;  %vm307_vm12 = vweird.f32 %v300_v6 }
 0x49d   :  { %v605_v7 = vpop.eup %604 }
 0x49e   :  { %v302_v8 = vmul.f32 %v605_v7, %v300_v6  ;;  %vm308_vm11 = vweird.f32 %v605_v7 }
 0x49f   :  { %vm309_vm13 = vmor %vm307_vm12, %vm308_vm11  ;;  %vm494_vm11 = vcmask 785920   ;;  %vm496_vm12 = vcmask 1048320  }
 0x4a0   :  { %v303_v9 = vmul.f32 %v605_v7, %v302_v8 }
 0x4a2   :  { %v304_v10 = vmul.f32 0.5, %v303_v9 }
 0x4a4   :  { %v305_v11 = vsub.f32 1.5, %v304_v10 }
 0x4a6   :  { %v306_v12 = vmul.f32 %v605_v7, %v305_v11 }
 0x4a8   :  { %v310_v15 = vsel %vm309_vm13, %v605_v7, %v306_v12 }
 0x4a9   :  { %v311_v16 = vmul.f32 %v310_v15, %v299_v13 }
 0x4ab   :  { %v314_v18 = vmul.f32 %v587_v14, %v311_v16  ;;  %v592_v14 = vld [vmem:[%s812_s3 + $0x68] ss:$0 sm:$0xff]  ;;  %v593_v16 = vld [vmem:[%s812_s3 + $0x70] ss:$0 sm:$0xff]  ;;  %s621_s3 = smov 96  }
 0x4ad   :  { %v317_v19 = vadd.f32 %v588_v17, %v314_v18 }
 0x4af   :  { %v318_v20 = vmul.f32 0.8, %v317_v19 }
 0x4b1   :  { %v320_v22 = vadd.f32 %v319_v21, %v318_v20 }
 0x4b3   :  { %v325_v23 = vpack.c.bf16 %v320_v22, %v320_v22  ;;  %483 = vst.msk [vmem:[%s814_s4] sm:$0xff] %vm38_vm0, %v320_v22 }
 0x4b5   :  { %558 = vmatmul.msk.bf16.vlgmr.msrb.gmra.mxu0 %vm38_vm0, %v325_v23 }
 0x532   :  { %v352_v25 = vpop.f32.mrf.mxu0 }
 0x533   :  { %v752_v26 = vadd.f32 %v589_v24, %v352_v25 }
 0x535   :  { %396 = vrot.lane.b32.xlu2 %v752_v26, %s618_s13  ;;  %v360_v39 = vmul.f32 %v752_v26, %v752_v26  ;;  %v356_v30 = vsel %vm38_vm0, %v752_v26, 0.0 }
 0x537   :  { %404 = vrot.lane.b32.xlu0 %v360_v39, %s618_s13  ;;  %v361_v61 = vsel %vm38_vm0, %v360_v39, 0.0 }
 0x53a   :  { %v354_v28 = vpop.f32.mrf.mxu0 }
 0x53d   :  { %436 = vrot.lane.b32.xlu2 %v590_v27, %s618_s13 }
 0x566   :  { %357 = vadd.xlane.f32.xlu2 %v356_v30 }
 0x57e   :  { %479 = vperm.xlu2 %575, %v656_v2  }
 0x586   :  { %498 = vrot.lane.b32.xlu2 %v752_v26, %s620_s16 }
 0x58f   :  { %v767_v31 = vpop.permute.xlu2 %396 }
 0x590   :  { %v399_v32 = vsel %vm38_vm0, %v767_v31, 0.0 }
 0x591   :  { %400 = vadd.xlane.f32.xlu1 %v399_v32 }
 0x597   :  { %v437_v2 = vpop.permute.xlu2 %436 }
 0x5a9   :  { %v405_v33 = vpop.permute.xlu0 %404 }
 0x5aa   :  { %v407_v34 = vsel %vm38_vm0, %v405_v33, 0.0 }
 0x5ab   :  { %408 = vadd.xlane.f32.xlu1 %v407_v34 }
 0x5c4   :  { %429 = vrot.lane.b32.xlu1 %v591_v35, %s618_s13 }
 0x5d9   :  { %v358_v36 = vpop.xlane.xlu2 %357 }
 0x5da   :  { %v359_v0 = vmul.f32 0.03125, %v358_v36 }
 0x5dc   :  { %v365_v3 = vmul.f32 %v359_v0, %v359_v0  ;;  %v367_v13 = vsub.f32 %v752_v26, %v359_v0 }
 0x5e1   :  { %v776_v37 = vpop.permute.xlu2 %479 }
 0x5e9   :  { %v499_v38 = vpop.permute.xlu2 %498 }
 0x5ea   :  { %501 = vst.msk [vmem:[%s814_s4 + $0x8] sm:$0xff] %vm38_vm0, %v499_v38 }
 0x604   :  { %v401_v40 = vpop.xlane.xlu1 %400 }
 0x605   :  { %v402_v41 = vmul.f32 0.03125, %v401_v40 }
 0x607   :  { %v411_v43 = vmul.f32 %v402_v41, %v402_v41  ;;  %v413_v53 = vsub.f32 %v752_v26, %v402_v41 }
 0x61e   :  { %v409_v42 = vpop.xlane.xlu1 %408 }
 0x61f   :  { %v410_v44 = vmul.f32 0.03125, %v409_v42 }
 0x621   :  { %v412_v45 = vsub.f32 %v410_v44, %v411_v43 }
 0x623   :  { %v414_v46 = vadd.f32 1e-05, %v412_v45 }
 0x625   :  { %606 = vrsqrt.f32 %v414_v46  ;;  %vm421_vm15 = vweird.f32 %v414_v46 }
 0x62b   :  { %v607_v47 = vpop.eup %606 }
 0x62c   :  { %v416_v48 = vmul.f32 %v607_v47, %v414_v46  ;;  %vm422_vm14 = vweird.f32 %v607_v47 }
 0x62d   :  { %vm423_vm1 = vmor %vm421_vm15, %vm422_vm14 }
 0x62e   :  { %v417_v49 = vmul.f32 %v607_v47, %v416_v48 }
 0x630   :  { %v418_v50 = vmul.f32 0.5, %v417_v49 }
 0x632   :  { %v419_v51 = vsub.f32 1.5, %v418_v50 }
 0x634   :  { %v420_v52 = vmul.f32 %v607_v47, %v419_v51 }
 0x636   :  { %v424_v54 = vsel %vm423_vm1, %v607_v47, %v420_v52  ;;  %v430_v55 = vpop.permute.xlu1 %429 }
 0x637   :  { %v425_v56 = vmul.f32 %v424_v54, %v413_v53 }
 0x639   :  { %v432_v57 = vmul.f32 %v430_v55, %v425_v56 }
 0x63b   :  { %v439_v58 = vadd.f32 %v437_v2, %v432_v57 }
 0x63d   :  { %608 = vtanh.f32 %v439_v58 }
 0x643   :  { %v783_v59 = vpop.eup %608 }
 0x644   :  { %v441_v60 = vmul.f32 %v783_v59, %v783_v59 }
 0x646   :  { %443 = vrot.lane.b32.xlu0 %v441_v60, %s618_s13 }
 0x670   :  { %362 = vadd.xlane.f32.xlu0 %v361_v61 }
 0x6b8   :  { %v444_v62 = vpop.permute.xlu0 %443 }
 0x6b9   :  { %v446_v63 = vsel %vm38_vm0, %v444_v62, 0.0 }
 0x6ba   :  { %447 = vadd.xlane.f32.xlu1 %v446_v63 }
 0x6e3   :  { %v363_v1 = vpop.xlane.xlu0 %362 }
 0x6e4   :  { %v364_v4 = vmul.f32 0.03125, %v363_v1 }
 0x6e6   :  { %v366_v5 = vsub.f32 %v364_v4, %v365_v3 }
 0x6e8   :  { %v368_v6 = vadd.f32 1e-05, %v366_v5 }
 0x6ea   :  { %610 = vrsqrt.f32 %v368_v6  ;;  %vm375_vm3 = vweird.f32 %v368_v6 }
 0x6f0   :  { %v611_v7 = vpop.eup %610 }
 0x6f1   :  { %v370_v8 = vmul.f32 %v611_v7, %v368_v6  ;;  %vm376_vm2 = vweird.f32 %v611_v7 }
 0x6f2   :  { %vm377_vm0 = vmor %vm375_vm3, %vm376_vm2 }
 0x6f3   :  { %v371_v9 = vmul.f32 %v611_v7, %v370_v8 }
 0x6f5   :  { %v372_v10 = vmul.f32 0.5, %v371_v9 }
 0x6f7   :  { %v373_v11 = vsub.f32 1.5, %v372_v10 }
 0x6f9   :  { %v374_v12 = vmul.f32 %v611_v7, %v373_v11 }
 0x6fb   :  { %v378_v15 = vsel %vm377_vm0, %v611_v7, %v374_v12 }
 0x6fc   :  { %v379_v17 = vmul.f32 %v378_v15, %v367_v13 }
 0x6fe   :  { %v382_v18 = vmul.f32 %v592_v14, %v379_v17 }
 0x700   :  { %v385_v19 = vadd.f32 %v593_v16, %v382_v18 }
 0x702   :  { %v387_v20 = vmul.f32 0.044715, %v385_v19  ;;  %v386_v26 = vmul.f32 0.5, %v385_v19 }
 0x704   :  { %v388_v21 = vmul.f32 %v387_v20, %v385_v19 }
 0x706   :  { %v389_v22 = vmul.f32 %v388_v21, %v385_v19 }
 0x708   :  { %v390_v23 = vadd.f32 %v389_v22, %v385_v19 }
 0x70a   :  { %v391_v24 = vmul.f32 0.7978846, %v390_v23 }
 0x70c   :  { %612 = vtanh.f32 %v391_v24 }
 0x712   :  { %v613_v25 = vpop.eup %612 }
 0x713   :  { %v393_v39 = vadd.f32 1.0, %v613_v25 }
 0x715   :  { %v394_v27 = vmul.f32 %v393_v39, %v386_v26 }
 0x717   :  { %491 = vrot.lane.b32.xlu1 %v394_v27, %s618_s13 }
 0x72d   :  { %v448_v28 = vpop.xlane.xlu1 %447 }
 0x72e   :  { %614 = vrsqrt.f32 %v448_v28  ;;  %vm456_vm4 = vcmp.eq.f32.partialorder %v448_v28, inf  ;;  %v459_v36 = vand.u32 2147483648, %v448_v28  ;;  %vm458_vm5 = vcmp.eq.f32.partialorder %v448_v28, 0.0 }
 0x734   :  { %v615_v29 = vpop.eup %614 }
 0x735   :  { %v450_v30 = vmul.f32 %v615_v29, %v448_v28 }
 0x737   :  { %v451_v32 = vmul.f32 %v615_v29, %v450_v30 }
 0x739   :  { %v452_v33 = vmul.f32 0.5, %v451_v32 }
 0x73b   :  { %v453_v34 = vsub.f32 1.5, %v452_v33 }
 0x73d   :  { %v454_v35 = vmul.f32 %v615_v29, %v453_v34 }
 0x73f   :  { %v455_v2 = vmul.f32 %v454_v35, %v448_v28 }
 0x741   :  { %v457_v38 = vsel %vm456_vm4, %v448_v28, %v455_v2 }
 0x742   :  { %v460_v40 = vsel %vm458_vm5, %v459_v36, %v457_v38 }
 0x743   :  { %v461_v41 = vmax.f32 %v460_v40, 1e-12 }
 0x745   :  { %616 = vrcp.f32 %v461_v41  ;;  %v473_v45 = vand.u32 2147483648, %v461_v41  ;;  %v471_v47 = vand.u32 2147483647, %v461_v41  ;;  %vm467_vm7 = vweird.f32 %v461_v41 }
 0x747   :  { %v474_v49 = vor.u32 1.1754944e-38, %v473_v45  ;;  %vm472_vm9 = vcmp.eq.f32.partialorder %v471_v47, 8.507059e+37 }
 0x74b   :  { %v617_v42 = vpop.eup %616 }
 0x74c   :  { %v463_v43 = vmul.f32 %v617_v42, %v461_v41  ;;  %vm468_vm6 = vweird.f32 %v617_v42 }
 0x74d   :  { %vm469_vm8 = vmor %vm467_vm7, %vm468_vm6 }
 0x74e   :  { %v464_v44 = vsub.f32 1.0, %v463_v43 }
 0x750   :  { %v465_v46 = vmul.f32 %v617_v42, %v464_v44 }
 0x752   :  { %v466_v48 = vadd.f32 %v617_v42, %v465_v46 }
 0x754   :  { %v470_v50 = vsel %vm469_vm8, %v617_v42, %v466_v48 }
 0x755   :  { %v475_v51 = vsel %vm472_vm9, %v474_v49, %v470_v50 }
 0x756   :  { %v476_v52 = vmul.f32 %v783_v59, %v475_v51 }
 0x758   :  { %v482_v53 = vmul.f32 %v776_v37, %v476_v52 }
 0x75a   :  { %485 = vrot.lane.b32.xlu0 %v482_v53, %s621_s3 }
 0x789   :  { %v492_v55 = vpop.permute.xlu1 %491 }
 0x7cc   :  { %v486_v54 = vpop.permute.xlu0 %485 }
 0x7cd   :  { %489 = vst.msk [vmem:[%s814_s4] sm:$0xff] %vm488_vm10, %v486_v54 }
 0x7ce   :  { %495 = vst.msk [vmem:[%s814_s4] sm:$0xff] %vm494_vm11, %v492_v55 }
 0x7cf   :  { %497 = vst.msk [vmem:[%s814_s4] sm:$0xff] %vm496_vm12, %v767_v31 }

// kernel: _lambda_.3
= control target key start
LH: loop header
LB: loop body
LE: loop exit
PB: predicated region body
PF: predicated region fallthrough
CT: control target
= control target key end

     0   :  { %s2715_s20 = smov 96   ;;  %vm31_vm0 = vcmask 261120   ;;  %vm56_vm1 = vcmask 64512   ;;  %s2716_s7 = smov 32   ;;  %vm268_vm12 = vcmask 523264   ;;  %vm319_vm13 = vcmask 785408   ;;  %s3423_s2 = inlined_call_operand.vmem [shape: f32[8,64], index: 2, kind: input, shape index: {}]   ;;  %s3424_s1 = inlined_call_operand.vmem [shape: f32[8,160], index: 1, kind: input, shape index: {}]   ;;  %s3425_s3 = inlined_call_operand.vmem [shape: bf16[1464,32], index: 3, kind: input, shape index: {}]   ;;  %s3426_s4 = inlined_call_operand.vmem [shape: f32[336,32], index: 4, kind: input, shape index: {}]   ;;  %s3427_s0 = inlined_call_operand.vmem [shape: f32[8,75], index: 0, kind: input, shape index: {}]   ;;  %s3428_s5 = inlined_call_operand.vmem [shape: f32[8,1], index: 5, kind: output, shape index: {}]  }
   0x1   :  { %v24_v0 = vld [vmem:[%s3423_s2] sm:$0xff]  ;;  %v2447_v6 = vld [vmem:[%s3425_s3 + $0x18] sm:$0xff]  ;;  %v2446_v7 = vld [vmem:[%s3425_s3 + $0x10] sm:$0xff]  ;;  %s2717_s2 = smov 64   ;;  %vm339_vm14 = vcmask 23552   ;;  %s2750_s8 = smov 65  }
   0x2   :  { %29 = vrot.lane.b32.xlu0 %v24_v0, %s2715_s20  ;;  %75 = vmatpush.msra.mxu1 %v24_v0  ;;  %v2793_v1 = vld [vmem:[%s3424_s1] sm:$0xff]  ;;  %v23_v8 = vld [vmem:[%s3424_s1 + $0x8] sm:$0xff]  ;;  %v2622_v30 = vld [vmem:[%s3426_s4 + $0x18] ss:$0 sm:$0xff]  ;;  %s2751_s12 = smov 112   ;;  %s2752_s13 = smov 63  }
   0x3   :  { %v186_v9 = vpack.c.bf16 %v23_v8, %v23_v8  ;;  %v2445_v25 = vld [vmem:[%s3425_s3 + $0x8] sm:$0xff]  ;;  %v2444_v26 = vld [vmem:[%s3425_s3] sm:$0xff]  ;;  %s2754_s25 = smov 73  }
   0x4   :  { %136 = vmatpush.bf16.msrb.mxu1 %v2445_v25  ;;  %v2623_v36 = vld [vmem:[%s3426_s4] ss:$0 sm:$0xff] }
   0x8   :  { %137 = vmatpush.bf16.msrb.mxu1 %v2444_v26 }
   0xa   :  { %26 = vrot.lane.b32.xlu0 %v2793_v1, %s2715_s20 }
  0x74   :  { %v30_v2 = vpop.permute.xlu0 %29 }
  0x75   :  { %2064 = vmatpush.xpose.msk.msra.mxu0 %vm31_vm0, %v30_v2 }
  0x79   :  { %210 = vmatpush.bf16.msrb.mxu0 %v2447_v6  ;;  %v2624_v6 = vld [vmem:[%s3426_s4 + $0x8] ss:$0 sm:$0xff] }
  0x7c   :  { %v27_v3 = vpop.permute.xlu0 %26 }
  0x7d   :  { %2065 = vmatmul.msk.f32.vlgmr.msra.gmra.mxu0 %vm31_vm0, %v27_v3 }
  0x7e   :  { %211 = vmatpush.bf16.msrb.mxu0 %v2446_v7 }
  0x85   :  { %2084 = vmatmul.msk.bf16.vlgmr.msrb.gmra.mxu0 %vm31_vm0, %v186_v9  ;;  %v2625_v9 = vld [vmem:[%s3426_s4 + $0x10] ss:$0 sm:$0xff] }
  0xfa   :  { %v53_v4 = vpop.f32.mrf.mxu0 }
  0xfb   :  { %2066 = vmatmul.msk.f32.vlgmr.msra.gmra.mxu1 %vm56_vm1, %v53_v4  ;;  %v80_v5 = vsel %vm56_vm1, %v53_v4, 0.0 }
  0xfc   :  { %81 = vadd.xlane.f32.xlu1 %v80_v5 }
 0x102   :  { %v213_v31 = vpop.f32.mrf.mxu0 }
 0x103   :  { %v2823_v32 = vadd.f32 %v2622_v30, %v213_v31 }
 0x105   :  { %v217_v33 = vsel %vm31_vm0, %v2823_v32, 0.0  ;;  %v221_v42 = vmul.f32 %v2823_v32, %v2823_v32 }
 0x106   :  { %218 = vadd.xlane.f32.xlu0 %v217_v33 }
 0x107   :  { %v222_v44 = vsel %vm31_vm0, %v221_v42, 0.0  ;;  %v2452_v42 = vld [vmem:[%s3425_s3 + $0x40] sm:$0xff] }
 0x10a   :  { %v215_v34 = vpop.f32.mrf.mxu0 }
 0x16f   :  { %v82_v10 = vpop.xlane.xlu1 %81 }
 0x170   :  { %v83_v11 = vadd.f32 1e-08, %v82_v10 }
 0x172   :  { %2664 = vrcp.f32 %v83_v11  ;;  %v95_v15 = vand.u32 2147483648, %v83_v11  ;;  %v93_v17 = vand.u32 2147483647, %v83_v11  ;;  %vm89_vm3 = vweird.f32 %v83_v11 }
 0x174   :  { %v96_v19 = vor.u32 1.1754944e-38, %v95_v15  ;;  %vm94_vm5 = vcmp.eq.f32.partialorder %v93_v17, 8.507059e+37  ;;  %v2626_v17 = vld [vmem:[%s3426_s4 + $0x20] ss:$0 sm:$0xff] }
 0x178   :  { %v2665_v12 = vpop.eup %2664  ;;  %v77_v21 = vpop.f32.mrf.mxu1 }
 0x179   :  { %v85_v13 = vmul.f32 %v2665_v12, %v83_v11  ;;  %vm90_vm2 = vweird.f32 %v2665_v12  ;;  %v219_v47 = vpop.xlane.xlu0 %218 }
 0x17a   :  { %vm91_vm4 = vmor %vm89_vm3, %vm90_vm2  ;;  %v220_v51 = vmul.f32 0.03125, %v219_v47 }
 0x17b   :  { %v86_v14 = vsub.f32 1.0, %v85_v13 }
 0x17c   :  { %v226_v53 = vmul.f32 %v220_v51, %v220_v51  ;;  %v228_v15 = vsub.f32 %v2823_v32, %v220_v51 }
 0x17d   :  { %v87_v16 = vmul.f32 %v2665_v12, %v86_v14  ;;  %v2453_v14 = vld [vmem:[%s3425_s3 + $0x48] sm:$0xff] }
 0x17e   :  { %325 = vmatpush.bf16.msra.mxu1 %v2453_v14 }
 0x17f   :  { %v88_v18 = vadd.f32 %v2665_v12, %v87_v16 }
 0x181   :  { %v92_v20 = vsel %vm91_vm4, %v2665_v12, %v88_v18 }
 0x182   :  { %v97_v22 = vsel %vm94_vm5, %v96_v19, %v92_v20  ;;  %v2627_v19 = vld [vmem:[%s3426_s4 + $0x28] ss:$0 sm:$0xff]  ;;  %326 = vmatpush.bf16.msra.mxu1 %v2452_v42 }
 0x183   :  { %v98_v23 = vmul.f32 %v97_v22, %v77_v21 }
 0x185   :  { %v99_v24 = vmul.f32 0.2, %v98_v23 }
 0x187   :  { %101 = vrot.lane.b32.xlu1 %v99_v24, %s2715_s20 }
 0x1f9   :  { %v102_v27 = vpop.permute.xlu1 %101 }
 0x1fa   :  { %v104_v28 = vadd.f32 %v102_v27, %v2793_v1 }
 0x1fc   :  { %v109_v29 = vpack.c.bf16 %v104_v28, %v104_v28 }
 0x1fe   :  { %113 = vrot.lane.b32.xlu2 %v109_v29, %s2716_s7 }
 0x258   :  { %v114_v35 = vpop.permute.xlu2 %113 }
 0x259   :  { %2075 = vmatmul.msk.bf16.vlgmr.msrb.gmra.mxu1 %vm31_vm0, %v114_v35 }
 0x2d6   :  { %v139_v37 = vpop.f32.mrf.mxu1 }
 0x2d7   :  { %v140_v38 = vadd.f32 %v2623_v36, %v139_v37 }
 0x2d9   :  { %v143_v39 = vsel %vm31_vm0, %v140_v38, 0.0  ;;  %v147_v40 = vmul.f32 %v140_v38, %v140_v38 }
 0x2da   :  { %144 = vadd.xlane.f32.xlu2 %v143_v39 }
 0x2db   :  { %v148_v41 = vsel %vm31_vm0, %v147_v40, 0.0 }
 0x2dc   :  { %149 = vadd.xlane.f32.xlu1 %v148_v41 }
 0x2de   :  { %v141_v43 = vpop.f32.mrf.mxu1 }
 0x2df   :  { %v2451_v43 = vld [vmem:[%s3425_s3 + $0x38] sm:$0xff] }
 0x2e0   :  { %327 = vmatpush.bf16.msra.mxu1 %v2451_v43 }
 0x2e2   :  { %223 = vadd.xlane.f32.xlu2 %v222_v44  ;;  %v2450_v44 = vld [vmem:[%s3425_s3 + $0x30] sm:$0xff] }
 0x2e4   :  { %328 = vmatpush.bf16.msra.mxu1 %v2450_v44 }
 0x34d   :  { %v145_v45 = vpop.xlane.xlu2 %144 }
 0x34e   :  { %v146_v46 = vmul.f32 0.03125, %v145_v45  ;;  %v2449_v45 = vld [vmem:[%s3425_s3 + $0x28] sm:$0xff] }
 0x34f   :  { %v150_v48 = vpop.xlane.xlu1 %149  ;;  %329 = vmatpush.bf16.msra.mxu1 %v2449_v45 }
 0x350   :  { %v152_v49 = vmul.f32 %v146_v46, %v146_v46  ;;  %v151_v50 = vmul.f32 0.03125, %v150_v48  ;;  %v154_v5 = vsub.f32 %v140_v38, %v146_v46  ;;  %v2448_v46 = vld [vmem:[%s3425_s3 + $0x20] sm:$0xff] }
 0x352   :  { %v153_v52 = vsub.f32 %v151_v50, %v152_v49 }
 0x353   :  { %330 = vmatpush.bf16.msra.mxu1 %v2448_v46 }
 0x354   :  { %v155_v54 = vadd.f32 1e-05, %v153_v52 }
 0x355   :  { %v224_v55 = vpop.xlane.xlu2 %223 }
 0x356   :  { %2666 = vrsqrt.f32 %v155_v54  ;;  %v225_v56 = vmul.f32 0.03125, %v224_v55  ;;  %vm162_vm7 = vweird.f32 %v155_v54 }
 0x358   :  { %v227_v57 = vsub.f32 %v225_v56, %v226_v53 }
 0x35a   :  { %v229_v58 = vadd.f32 1e-05, %v227_v57 }
 0x35c   :  { %v2667_v59 = vpop.eup %2666  ;;  %2668 = vrsqrt.f32 %v229_v58  ;;  %vm236_vm9 = vweird.f32 %v229_v58 }
 0x35d   :  { %v157_v60 = vmul.f32 %v2667_v59, %v155_v54  ;;  %vm163_vm6 = vweird.f32 %v2667_v59  ;;  %v2628_v54 = vld [vmem:[%s3426_s4 + $0x30] ss:$0 sm:$0xff] }
 0x35e   :  { %vm164_vm8 = vmor %vm162_vm7, %vm163_vm6 }
 0x35f   :  { %v158_v61 = vmul.f32 %v2667_v59, %v157_v60 }
 0x361   :  { %v159_v62 = vmul.f32 0.5, %v158_v61 }
 0x362   :  { %v2669_v63 = vpop.eup %2668 }
 0x363   :  { %v160_v0 = vsub.f32 1.5, %v159_v62  ;;  %v231_v2 = vmul.f32 %v2669_v63, %v229_v58  ;;  %vm237_vm10 = vweird.f32 %v2669_v63 }
 0x364   :  { %vm238_vm11 = vmor %vm236_vm9, %vm237_vm10  ;;  %vm529_vm9 = vcmask 785920   ;;  %vm540_vm10 = vcmask 1048320  }
 0x365   :  { %v161_v3 = vmul.f32 %v2667_v59, %v160_v0  ;;  %v232_v4 = vmul.f32 %v2669_v63, %v231_v2  ;;  %v2718_v0 = vmov 1   ;;  %v2719_v2 = vmov 0  }
 0x366   :  { %2581 = vset.pattern.permute.xlu1 %v2718_v0  ;;  %2589 = vset.pattern.permute.xlu0 %v2718_v0 }
 0x367   :  { %v165_v7 = vsel %vm164_vm8, %v2667_v59, %v161_v3  ;;  %v233_v8 = vmul.f32 0.5, %v232_v4  ;;  %2582 = vset.pattern.permute.xlu2 %v2719_v2  ;;  %vm518_vm8 = vcmask 523520  }
 0x368   :  { %v166_v10 = vmul.f32 %v165_v7, %v154_v5 }
 0x369   :  { %v234_v11 = vsub.f32 1.5, %v233_v8 }
 0x36a   :  { %v169_v12 = vmul.f32 %v2624_v6, %v166_v10 }
 0x36b   :  { %v235_v13 = vmul.f32 %v2669_v63, %v234_v11 }
 0x36c   :  { %v172_v16 = vadd.f32 %v2625_v9, %v169_v12 }
 0x36d   :  { %v239_v18 = vsel %vm238_vm11, %v2669_v63, %v235_v13 }
 0x36e   :  { %v240_v20 = vmul.f32 %v239_v18, %v228_v15  ;;  %v174_v21 = vmul.f32 0.044715, %v172_v16  ;;  %v173_v34 = vmul.f32 0.5, %v172_v16  ;;  %v2458_v18 = vld [vmem:[%s3425_s3 + $0x70] sm:$0xff] }
 0x370   :  { %v243_v22 = vmul.f32 %v2626_v17, %v240_v20  ;;  %v175_v23 = vmul.f32 %v174_v21, %v172_v16  ;;  %v2459_v17 = vld [vmem:[%s3425_s3 + $0x78] sm:$0xff] }
 0x371   :  { %452 = vmatpush.bf16.msra.mxu0 %v2459_v17  ;;  %v2727_v17 = vmov 7  }
 0x372   :  { %v246_v24 = vadd.f32 %v2627_v19, %v243_v22  ;;  %v176_v25 = vmul.f32 %v175_v23, %v172_v16 }
 0x374   :  { %v177_v26 = vadd.f32 %v176_v25, %v172_v16  ;;  %v248_v27 = vmul.f32 0.044715, %v246_v24  ;;  %v247_v38 = vmul.f32 0.5, %v246_v24  ;;  %v2720_v16 = vmov 2  }
 0x375   :  { %453 = vmatpush.bf16.msra.mxu0 %v2458_v18  ;;  %v2728_v18 = vmov 15  }
 0x376   :  { %v178_v28 = vmul.f32 0.7978846, %v177_v26  ;;  %v249_v29 = vmul.f32 %v248_v27, %v246_v24  ;;  %v2457_v26 = vld [vmem:[%s3425_s3 + $0x68] sm:$0xff]  ;;  %v2456_v27 = vld [vmem:[%s3425_s3 + $0x60] sm:$0xff] }
 0x378   :  { %2670 = vtanh.f32 %v178_v28  ;;  %v250_v30 = vmul.f32 %v249_v29, %v246_v24  ;;  %v2455_v28 = vld [vmem:[%s3425_s3 + $0x58] sm:$0xff]  ;;  %v2454_v29 = vld [vmem:[%s3425_s3 + $0x50] sm:$0xff] }
 0x379   :  { %454 = vmatpush.bf16.msra.mxu0 %v2457_v26  ;;  %v2736_v26 = vmov 27  }
 0x37a   :  { %v251_v31 = vadd.f32 %v250_v30, %v246_v24 }
 0x37c   :  { %v252_v32 = vmul.f32 0.7978846, %v251_v31 }
 0x37d   :  { %455 = vmatpush.bf16.msra.mxu0 %v2456_v27  ;;  %v2737_v27 = vmov 25  }
 0x37e   :  { %v2671_v33 = vpop.eup %2670  ;;  %2672 = vtanh.f32 %v252_v32 }
 0x37f   :  { %v180_v35 = vadd.f32 1.0, %v2671_v33 }
 0x381   :  { %v2852_v36 = vmul.f32 %v180_v35, %v173_v34  ;;  %456 = vmatpush.bf16.msra.mxu0 %v2455_v28  ;;  %v2738_v28 = vmov 23  }
 0x383   :  { %260 = vrot.lane.b32.xlu0 %v2852_v36, %s2716_s7 }
 0x384   :  { %v2673_v37 = vpop.eup %2672 }
 0x385   :  { %v254_v39 = vadd.f32 1.0, %v2673_v37  ;;  %457 = vmatpush.bf16.msra.mxu0 %v2454_v29  ;;  %v2629_v37 = vld [vmem:[%s3426_s4 + $0x38] ss:$0 sm:$0xff]  ;;  %v2739_v29 = vmov 4  }
 0x387   :  { %v2856_v40 = vmul.f32 %v254_v39, %v247_v38 }
 0x389   :  { %v2576_v41 = vpack.i.bf16 %v2856_v40, %v2793_v1 }
 0x38b   :  { %2577 = vrot.lane.b32.xlu2 %v2576_v41, %s2717_s2 }
 0x3e5   :  { %v2578_v47 = vpop.permute.xlu2 %2577 }
 0x3e6   :  { %v2579_v48 = vunpack.i.l.bf16 %v2578_v47  ;;  %v2580_v49 = vunpack.i.h.bf16 %v2578_v47 }
 0x3f5   :  { %v261_v50 = vpop.permute.xlu0 %260 }
 0x3f6   :  { %v267_v51 = vsel %vm31_vm0, %v2579_v48, %v261_v50 }
 0x3f7   :  { %v269_v52 = vsel %vm268_vm12, %v267_v51, %v2580_v49 }
 0x3f8   :  { %v282_v53 = vpack.c.bf16 %v269_v52, %v269_v52 }
 0x3fa   :  { %2109 = vmatmul.msk.bf16.vlgmr.msra.gmra.mxu1 %vm319_vm13, %v282_v53 }
 0x477   :  { %v332_v55 = vpop.f32.mrf.mxu1 }
 0x478   :  { %v338_v56 = vadd.f32 %v2628_v54, %v332_v55  ;;  %v2721_v55 = vmov 3  }
 0x47a   :  { %v340_v57 = vsel %vm339_vm14, %v338_v56, -inf }
 0x47b   :  { %341 = vmax.xlane.f32.xlu1 %v340_v57 }
 0x47f   :  { %v334_v58 = vpop.f32.mrf.mxu1 }
 0x4ee   :  { %v342_v59 = vpop.xlane.xlu1 %341 }
 0x4ef   :  { %v343_v60 = vsub.f32 %v338_v56, %v342_v59  ;;  %v2630_v59 = vld [vmem:[%s3426_s4 + $0x40] ss:$0 sm:$0xff] }
 0x4f1   :  { %v344_v61 = vmul.f32 1.442695, %v343_v60 }
 0x4f3   :  { %2674 = vpow2.f32 %v344_v61  ;;  %v2631_v61 = vld [vmem:[%s3426_s4 + $0x48] ss:$0 sm:$0xff] }
 0x4f9   :  { %v2675_v62 = vpop.eup %2674 }
 0x4fa   :  { %v346_v63 = vsel %vm339_vm14, %v2675_v62, 0.0 }
 0x4fb   :  { %347 = vadd.xlane.f32.xlu0 %v346_v63 }
 0x56e   :  { %v348_v3 = vpop.xlane.xlu0 %347 }
 0x56f   :  { %2676 = vrcp.f32 %v348_v3  ;;  %v360_v7 = vand.u32 2147483648, %v348_v3  ;;  %v358_v9 = vand.u32 2147483647, %v348_v3  ;;  %vm354_vm2 = vweird.f32 %v348_v3 }
 0x571   :  { %v361_v11 = vor.u32 1.1754944e-38, %v360_v7  ;;  %vm359_vm4 = vcmp.eq.f32.partialorder %v358_v9, 8.507059e+37 }
 0x575   :  { %v2677_v4 = vpop.eup %2676 }
 0x576   :  { %v350_v5 = vmul.f32 %v2677_v4, %v348_v3  ;;  %vm355_vm15 = vweird.f32 %v2677_v4 }
 0x577   :  { %vm356_vm3 = vmor %vm354_vm2, %vm355_vm15 }
 0x578   :  { %v351_v6 = vsub.f32 1.0, %v350_v5 }
 0x57a   :  { %v352_v8 = vmul.f32 %v2677_v4, %v351_v6 }
 0x57c   :  { %v353_v10 = vadd.f32 %v2677_v4, %v352_v8 }
 0x57e   :  { %v357_v12 = vsel %vm356_vm3, %v2677_v4, %v353_v10  ;;  %vm1621_vm3 = vcmask 130048  }
 0x57f   :  { %v362_v13 = vsel %vm359_vm4, %v361_v11, %v357_v12  ;;  %v2722_v12 = vmov 9  }
 0x580   :  { %v363_v14 = vmul.f32 %v2675_v62, %v362_v13  ;;  %v2723_v13 = vmov 6  }
 0x582   :  { %373 = vperm.xlu1 %2581, %v363_v14   ;;  %v364_v15 = vmul.f32 1.2, %v363_v14 }
 0x584   :  { %367 = vperm.xlu2 %2582, %v364_v15   ;;  %v2725_v15 = vmov 11  }
 0x58a   :  { %2590 = vset.pattern.permute.xlu1 %v2720_v16 }
 0x58c   :  { %2583 = vset.pattern.permute.xlu2 %v2720_v16  ;;  %v2726_v16 = vmov 10  }
 0x58d   :  { %378 = vperm.xlu2 %2583, %v363_v14   ;;  %v2724_v14 = vmov 5  }
 0x595   :  { %2591 = vset.pattern.permute.xlu2 %v2721_v55 }
 0x5de   :  { %v368_v19 = vpop.permute.xlu2 %367 }
 0x5df   :  { %v370_v21 = vmul.f32 %v368_v19, %v2793_v1  ;;  %v2729_v19 = vmov 13  }
 0x5e7   :  { %v379_v20 = vpop.permute.xlu2 %378 }
 0x5e8   :  { %v381_v22 = vmul.f32 %v379_v20, %v2856_v40  ;;  %v2730_v20 = vmov 14  }
 0x5ea   :  { %v2584_v23 = vpack.i.bf16 %v381_v22, %v370_v21  ;;  %v2731_v21 = vmov 18   ;;  %v2732_v22 = vmov 17  }
 0x5ec   :  { %2585 = vrot.lane.b32.xlu2 %v2584_v23, %s2717_s2  ;;  %v2733_v23 = vmov 21  }
 0x5f4   :  { %v374_v24 = vpop.permute.xlu1 %373 }
 0x5f5   :  { %v376_v25 = vmul.f32 %v374_v24, %v2852_v36  ;;  %v2734_v24 = vmov 22  }
 0x5f7   :  { %387 = vrot.lane.b32.xlu2 %v376_v25, %s2716_s7  ;;  %v2735_v25 = vmov 19  }
 0x646   :  { %v2586_v30 = vpop.permute.xlu2 %2585 }
 0x647   :  { %v2587_v31 = vunpack.i.l.bf16 %v2586_v30  ;;  %v2588_v32 = vunpack.i.h.bf16 %v2586_v30  ;;  %v2740_v30 = vmov 29  }
 0x651   :  { %v388_v33 = vpop.permute.xlu2 %387 }
 0x652   :  { %v394_v34 = vsel %vm31_vm0, %v2587_v31, %v388_v33  ;;  %v2741_v31 = vmov 26   ;;  %v2743_v33 = vmov 31  }
 0x653   :  { %v395_v35 = vsel %vm268_vm12, %v394_v34, %v2588_v32  ;;  %v2742_v32 = vmov 12   ;;  %v2744_v34 = vmov 30  }
 0x654   :  { %v408_v36 = vpack.c.bf16 %v395_v35, %v395_v35  ;;  %v2745_v35 = vmov 20  }
 0x656   :  { %2134 = vmatmul.msk.bf16.vlgmr.msra.gmra.mxu0 %vm319_vm13, %v408_v36  ;;  %v2746_v36 = vmov 16  }
 0x6d3   :  { %v459_v38 = vpop.f32.mrf.mxu0 }
 0x6d4   :  { %v460_v39 = vadd.f32 %v2629_v37, %v459_v38  ;;  %v2747_v38 = vmov 8  }
 0x6d6   :  { %v463_v40 = vsel %vm31_vm0, %v460_v39, 0.0  ;;  %v467_v41 = vmul.f32 %v460_v39, %v460_v39 }
 0x6d7   :  { %464 = vadd.xlane.f32.xlu1 %v463_v40  ;;  %v2748_v40 = vmov 24  }
 0x6d8   :  { %v468_v42 = vsel %vm31_vm0, %v467_v41, 0.0 }
 0x6d9   :  { %469 = vadd.xlane.f32.xlu2 %v468_v42 }
 0x6db   :  { %v461_v43 = vpop.f32.mrf.mxu0 }
 0x74a   :  { %v465_v44 = vpop.xlane.xlu1 %464 }
 0x74b   :  { %v466_v45 = vmul.f32 0.03125, %v465_v44 }
 0x74c   :  { %v470_v46 = vpop.xlane.xlu2 %469 }
 0x74d   :  { %v472_v47 = vmul.f32 %v466_v45, %v466_v45  ;;  %v471_v48 = vmul.f32 0.03125, %v470_v46  ;;  %v474_v58 = vsub.f32 %v460_v39, %v466_v45 }
 0x74f   :  { %v473_v49 = vsub.f32 %v471_v48, %v472_v47 }
 0x751   :  { %v475_v50 = vadd.f32 1e-05, %v473_v49 }
 0x753   :  { %2678 = vrsqrt.f32 %v475_v50  ;;  %vm482_vm6 = vweird.f32 %v475_v50 }
 0x759   :  { %v2679_v51 = vpop.eup %2678 }
 0x75a   :  { %v477_v52 = vmul.f32 %v2679_v51, %v475_v50  ;;  %vm483_vm5 = vweird.f32 %v2679_v51 }
 0x75b   :  { %vm484_vm7 = vmor %vm482_vm6, %vm483_vm5 }
 0x75c   :  { %v478_v53 = vmul.f32 %v2679_v51, %v477_v52  ;;  %v2749_v52 = vmov 28  }
 0x75e   :  { %v479_v54 = vmul.f32 0.5, %v478_v53 }
 0x760   :  { %v480_v56 = vsub.f32 1.5, %v479_v54 }
 0x762   :  { %v481_v57 = vmul.f32 %v2679_v51, %v480_v56 }
 0x764   :  { %v485_v60 = vsel %vm484_vm7, %v2679_v51, %v481_v57  ;;  %vm1733_vm7 = vcmask 1043456  }
 0x765   :  { %v486_v62 = vmul.f32 %v485_v60, %v474_v58 }
 0x767   :  { %v489_v63 = vmul.f32 %v2630_v59, %v486_v62 }
 0x769   :  { %v492_v0 = vadd.f32 %v2631_v61, %v489_v63 }
 0x76b   :  { %v494_v3 = vmul.f32 0.044715, %v492_v0  ;;  %v493_v9 = vmul.f32 0.5, %v492_v0 }
 0x76d   :  { %v495_v4 = vmul.f32 %v494_v3, %v492_v0 }
 0x76f   :  { %v496_v5 = vmul.f32 %v495_v4, %v492_v0 }
 0x771   :  { %v497_v6 = vadd.f32 %v496_v5, %v492_v0 }
 0x773   :  { %v498_v7 = vmul.f32 0.7978846, %v497_v6 }
 0x775   :  { %2680 = vtanh.f32 %v498_v7 }
 0x77b   :  { %v2681_v8 = vpop.eup %2680 }
 0x77c   :  { %v500_v10 = vadd.f32 1.0, %v2681_v8 }
 0x77e   :  { %v2920_v11 = vmul.f32 %v500_v10, %v493_v9 }
 0x780   :  { %532 = vperm.xlu2 %2591, %v2920_v11   ;;  %521 = vperm.xlu1 %2590, %v2920_v11  }
 0x781   :  { %510 = vperm.xlu0 %2589, %v2920_v11  }
 0x788   :  { %2595 = vset.pattern.permute.xlu2 %v2722_v12  ;;  %2593 = vset.pattern.permute.xlu1 %v2723_v13 }
 0x789   :  { %2592 = vset.pattern.permute.xlu0 %v2724_v14  ;;  %585 = vperm.xlu2 %2595, %v2920_v11  }
 0x78a   :  { %559 = vperm.xlu1 %2593, %v2920_v11   ;;  %549 = vperm.xlu0 %2592, %v2920_v11  }
 0x791   :  { %2597 = vset.pattern.permute.xlu2 %v2725_v15 }
 0x792   :  { %2596 = vset.pattern.permute.xlu1 %v2726_v16  ;;  %2594 = vset.pattern.permute.xlu0 %v2727_v17 }
 0x793   :  { %605 = vperm.xlu2 %2597, %v2920_v11   ;;  %595 = vperm.xlu1 %2596, %v2920_v11  }
 0x794   :  { %569 = vperm.xlu0 %2594, %v2920_v11  }
 0x79b   :  { %2600 = vset.pattern.permute.xlu2 %v2728_v18  ;;  %2598 = vset.pattern.permute.xlu1 %v2729_v19 }
 0x79c   :  { %2599 = vset.pattern.permute.xlu0 %v2730_v20  ;;  %641 = vperm.xlu2 %2600, %v2920_v11  }
 0x79d   :  { %621 = vperm.xlu1 %2598, %v2920_v11   ;;  %631 = vperm.xlu0 %2599, %v2920_v11  }
 0x7a4   :  { %2602 = vset.pattern.permute.xlu2 %v2731_v21 }
 0x7a5   :  { %2601 = vset.pattern.permute.xlu1 %v2732_v22  ;;  %2604 = vset.pattern.permute.xlu0 %v2733_v23  ;;  %v2467_v22 = vld [vmem:[%s3425_s3 + $0xb8] sm:$0xff] }
 0x7a6   :  { %667 = vperm.xlu2 %2602, %v2920_v11   ;;  %657 = vperm.xlu1 %2601, %v2920_v11  }
 0x7a7   :  { %693 = vperm.xlu0 %2604, %v2920_v11   ;;  %1324 = vmatpush.bf16.msra.mxu2 %v2467_v22  ;;  %v2495_v22 = vld [vmem:[%s3425_s3 + $0x198] sm:$0xff] }
 0x7ae   :  { %2605 = vset.pattern.permute.xlu2 %v2734_v24  ;;  %2603 = vset.pattern.permute.xlu1 %v2735_v25 }
 0x7af   :  { %2609 = vset.pattern.permute.xlu0 %v2736_v26  ;;  %703 = vperm.xlu2 %2605, %v2920_v11  }
 0x7b0   :  { %677 = vperm.xlu1 %2603, %v2920_v11   ;;  %749 = vperm.xlu0 %2609, %v2920_v11  }
 0x7b7   :  { %2607 = vset.pattern.permute.xlu2 %v2737_v27 }
 0x7b8   :  { %2606 = vset.pattern.permute.xlu1 %v2738_v28  ;;  %2614 = vset.pattern.permute.xlu0 %v2739_v29  ;;  %v2466_v28 = vld [vmem:[%s3425_s3 + $0xb0] sm:$0xff]  ;;  %v2475_v29 = vld [vmem:[%s3425_s3 + $0xf8] sm:$0xff] }
 0x7b9   :  { %729 = vperm.xlu2 %2607, %v2920_v11   ;;  %713 = vperm.xlu1 %2606, %v2920_v11  }
 0x7ba   :  { %543 = vperm.xlu0 %2614, %v2920_v11   ;;  %1325 = vmatpush.bf16.msra.mxu2 %v2466_v28  ;;  %v2494_v28 = vld [vmem:[%s3425_s3 + $0x190] sm:$0xff] }
 0x7bb   :  { %1337 = vmatpush.bf16.msra.mxu3 %v2475_v29  ;;  %v2515_v29 = vld [vmem:[%s3425_s3 + $0x238] sm:$0xff] }
 0x7c1   :  { %2610 = vset.pattern.permute.xlu2 %v2740_v30  ;;  %2608 = vset.pattern.permute.xlu1 %v2741_v31 }
 0x7c2   :  { %2616 = vset.pattern.permute.xlu0 %v2742_v32  ;;  %765 = vperm.xlu2 %2610, %v2920_v11   ;;  %v2465_v32 = vld [vmem:[%s3425_s3 + $0xa8] sm:$0xff] }
 0x7c3   :  { %739 = vperm.xlu1 %2608, %v2920_v11   ;;  %615 = vperm.xlu0 %2616, %v2920_v11  }
 0x7c4   :  { %1326 = vmatpush.bf16.msra.mxu2 %v2465_v32  ;;  %v2514_v32 = vld [vmem:[%s3425_s3 + $0x230] sm:$0xff] }
 0x7ca   :  { %2612 = vset.pattern.permute.xlu2 %v2743_v33 }
 0x7cb   :  { %2611 = vset.pattern.permute.xlu1 %v2744_v34  ;;  %2618 = vset.pattern.permute.xlu0 %v2745_v35 }
 0x7cc   :  { %785 = vperm.xlu2 %2612, %v2920_v11   ;;  %775 = vperm.xlu1 %2611, %v2920_v11  }
 0x7cd   :  { %687 = vperm.xlu0 %2618, %v2920_v11  }
 0x7d4   :  { %2617 = vset.pattern.permute.xlu2 %v2746_v36  ;;  %2613 = vset.pattern.permute.xlu1 %v2719_v2 }
 0x7d5   :  { %651 = vperm.xlu2 %2617, %v2920_v11   ;;  %504 = vperm.xlu1 %2613, %v2920_v11  }
 0x7d6   :  { %2620 = vset.pattern.permute.xlu0 %v2749_v52 }
 0x7da   :  { %v533_v37 = vpop.permute.xlu2 %532 }
 0x7db   :  { %v535_v46 = vmul.f32 %v533_v37, %v2793_v1  ;;  %v2464_v37 = vld [vmem:[%s3425_s3 + $0xa0] sm:$0xff] }
 0x7dc   :  { %1327 = vmatpush.bf16.msra.mxu2 %v2464_v37 }
 0x7dd   :  { %2615 = vset.pattern.permute.xlu1 %v2747_v38  ;;  %v2474_v38 = vld [vmem:[%s3425_s3 + $0xf0] sm:$0xff] }
 0x7de   :  { %579 = vperm.xlu1 %2615, %v2920_v11   ;;  %1338 = vmatpush.bf16.msra.mxu3 %v2474_v38  ;;  %v2492_v38 = vld [vmem:[%s3425_s3 + $0x180] sm:$0xff] }
 0x7e3   :  { %v586_v39 = vpop.permute.xlu2 %585 }
 0x7e4   :  { %v588_v58 = vmul.f32 %v586_v39, %v2793_v1  ;;  %v2483_v39 = vld [vmem:[%s3425_s3 + $0x138] sm:$0xff] }
 0x7e5   :  { %1350 = vmatpush.bf16.msrb.mxu1 %v2483_v39  ;;  %v2513_v39 = vld [vmem:[%s3425_s3 + $0x228] sm:$0xff] }
 0x7e6   :  { %2619 = vset.pattern.permute.xlu1 %v2748_v40  ;;  %v2473_v40 = vld [vmem:[%s3425_s3 + $0xe8] sm:$0xff] }
 0x7e7   :  { %723 = vperm.xlu1 %2619, %v2920_v11   ;;  %1339 = vmatpush.bf16.msra.mxu3 %v2473_v40  ;;  %v2502_v40 = vld [vmem:[%s3425_s3 + $0x1d0] sm:$0xff] }
 0x7ed   :  { %v606_v41 = vpop.permute.xlu2 %605 }
 0x7ee   :  { %v608_v0 = vmul.f32 %v606_v41, %v2793_v1  ;;  %v2463_v41 = vld [vmem:[%s3425_s3 + $0x98] sm:$0xff] }
 0x7ef   :  { %1328 = vmatpush.bf16.msra.mxu2 %v2463_v41  ;;  %v2523_v41 = vld [vmem:[%s3425_s3 + $0x278] sm:$0xff] }
 0x7f2   :  { %v522_v42 = vpop.permute.xlu1 %521 }
 0x7f3   :  { %v524_v43 = vmul.f32 %v522_v42, %v2793_v1  ;;  %v511_v44 = vpop.permute.xlu0 %510 }
 0x7f4   :  { %v513_v2 = vmul.f32 %v511_v44, %v2793_v1  ;;  %v3040_v44 = vld [vmem:[%s3424_s1] sm:$0xff] }
 0x7f5   :  { %526 = vrot.lane.b32.xlu1 %v524_v43, %s2717_s2 }
 0x7f6   :  { %v642_v45 = vpop.permute.xlu2 %641  ;;  %515 = vrot.lane.b32.xlu2 %v513_v2, %s2716_s7 }
 0x7f7   :  { %v644_v3 = vmul.f32 %v642_v45, %v2793_v1  ;;  %v2462_v45 = vld [vmem:[%s3425_s3 + $0x90] sm:$0xff] }
 0x7f8   :  { %1329 = vmatpush.bf16.msra.mxu2 %v2462_v45 }
 0x7fc   :  { %v560_v47 = vpop.permute.xlu1 %559  ;;  %v550_v48 = vpop.permute.xlu0 %549 }
 0x7fd   :  { %v562_v49 = vmul.f32 %v560_v47, %v2793_v1  ;;  %v552_v50 = vmul.f32 %v550_v48, %v2793_v1  ;;  %v2461_v47 = vld [vmem:[%s3425_s3 + $0x88] sm:$0xff]  ;;  %v2471_v48 = vld [vmem:[%s3425_s3 + $0xd8] sm:$0xff] }
 0x7fe   :  { %537 = vrot.lane.b32.xlu2 %v535_v46, %s2715_s20  ;;  %v2482_v46 = vld [vmem:[%s3425_s3 + $0x130] sm:$0xff]  ;;  %1330 = vmatpush.bf16.msra.mxu2 %v2461_v47 }
 0x7ff   :  { %564 = vrot.lane.b32.xlu0 %v562_v49, %s2717_s2  ;;  %554 = vrot.lane.b32.xlu1 %v552_v50, %s2716_s7  ;;  %v2481_v49 = vld [vmem:[%s3425_s3 + $0x128] sm:$0xff] }
 0x800   :  { %v668_v51 = vpop.permute.xlu2 %667  ;;  %1351 = vmatpush.bf16.msrb.mxu1 %v2482_v46 }
 0x801   :  { %v670_v9 = vmul.f32 %v668_v51, %v2793_v1 }
 0x804   :  { %1352 = vmatpush.bf16.msrb.mxu1 %v2481_v49  ;;  %v2511_v49 = vld [vmem:[%s3425_s3 + $0x218] sm:$0xff] }
 0x805   :  { %v596_v53 = vpop.permute.xlu1 %595 }
 0x806   :  { %v598_v54 = vmul.f32 %v596_v53, %v2793_v1  ;;  %v570_v55 = vpop.permute.xlu0 %569  ;;  %v2460_v53 = vld [vmem:[%s3425_s3 + $0x80] sm:$0xff] }
 0x807   :  { %v572_v56 = vmul.f32 %v570_v55, %v2793_v1  ;;  %v2480_v55 = vld [vmem:[%s3425_s3 + $0x120] sm:$0xff]  ;;  %1331 = vmatpush.bf16.msra.mxu2 %v2460_v53 }
 0x808   :  { %600 = vrot.lane.b32.xlu1 %v598_v54, %s2717_s2  ;;  %v2470_v54 = vld [vmem:[%s3425_s3 + $0xd0] sm:$0xff]  ;;  %1353 = vmatpush.bf16.msrb.mxu1 %v2480_v55 }
 0x809   :  { %v704_v57 = vpop.permute.xlu2 %703  ;;  %574 = vrot.lane.b32.xlu2 %v572_v56, %s2715_s20  ;;  %v2491_v56 = vld [vmem:[%s3425_s3 + $0x178] sm:$0xff] }
 0x80a   :  { %v706_v4 = vmul.f32 %v704_v57, %v2793_v1  ;;  %v2469_v57 = vld [vmem:[%s3425_s3 + $0xc8] sm:$0xff]  ;;  %1363 = vmatpush.bf16.msrb.mxu0 %v2491_v56 }
 0x80f   :  { %v622_v59 = vpop.permute.xlu1 %621  ;;  %v632_v60 = vpop.permute.xlu0 %631 }
 0x810   :  { %v624_v61 = vmul.f32 %v622_v59, %v2793_v1  ;;  %v634_v62 = vmul.f32 %v632_v60, %v2793_v1 }
 0x811   :  { %590 = vrot.lane.b32.xlu2 %v588_v58, %s2716_s7  ;;  %v2479_v58 = vld [vmem:[%s3425_s3 + $0x118] sm:$0xff] }
 0x812   :  { %626 = vrot.lane.b32.xlu1 %v624_v61, %s2716_s7  ;;  %636 = vrot.lane.b32.xlu0 %v634_v62, %s2717_s2  ;;  %v2468_v62 = vld [vmem:[%s3425_s3 + $0xc0] sm:$0xff] }
 0x813   :  { %v730_v63 = vpop.permute.xlu2 %729  ;;  %1354 = vmatpush.bf16.msrb.mxu1 %v2479_v58  ;;  %v2519_v58 = vld [vmem:[%s3425_s3 + $0x258] sm:$0xff] }
 0x814   :  { %v732_v27 = vmul.f32 %v730_v63, %v2793_v1  ;;  %v2478_v63 = vld [vmem:[%s3425_s3 + $0x110] sm:$0xff] }
 0x817   :  { %1355 = vmatpush.bf16.msrb.mxu1 %v2478_v63 }
 0x818   :  { %v658_v5 = vpop.permute.xlu1 %657 }
 0x819   :  { %v694_v6 = vpop.permute.xlu0 %693  ;;  %610 = vrot.lane.b32.xlu2 %v608_v0, %s2715_s20  ;;  %v660_v8 = vmul.f32 %v658_v5, %v2793_v1  ;;  %v2490_v0 = vld [vmem:[%s3425_s3 + $0x170] sm:$0xff]  ;;  %v2489_v5 = vld [vmem:[%s3425_s3 + $0x168] sm:$0xff] }
 0x81a   :  { %646 = vrot.lane.b32.xlu1 %v644_v3, %s2715_s20  ;;  %708 = vrot.lane.b32.xlu0 %v706_v4, %s2717_s2  ;;  %v696_v15 = vmul.f32 %v694_v6, %v2793_v1  ;;  %v2499_v3 = vld [vmem:[%s3425_s3 + $0x1b8] sm:$0xff]  ;;  %v2477_v4 = vld [vmem:[%s3425_s3 + $0x108] sm:$0xff] }
 0x81b   :  { %1364 = vmatpush.bf16.msrb.mxu0 %v2490_v0  ;;  %1376 = vmatpush.bf16.msrb.mxu2 %v2499_v3 }
 0x81c   :  { %v766_v7 = vpop.permute.xlu2 %765  ;;  %1356 = vmatpush.bf16.msrb.mxu1 %v2477_v4 }
 0x81d   :  { %v768_v30 = vmul.f32 %v766_v7, %v2793_v1  ;;  %v2476_v7 = vld [vmem:[%s3425_s3 + $0x100] sm:$0xff] }
 0x81f   :  { %1365 = vmatpush.bf16.msrb.mxu0 %v2489_v5  ;;  %v2517_v5 = vld [vmem:[%s3425_s3 + $0x248] sm:$0xff] }
 0x820   :  { %1357 = vmatpush.bf16.msrb.mxu1 %v2476_v7 }
 0x821   :  { %662 = vrot.lane.b32.xlu2 %v660_v8, %s2716_s7  ;;  %v2488_v8 = vld [vmem:[%s3425_s3 + $0x160] sm:$0xff] }
 0x822   :  { %v678_v10 = vpop.permute.xlu1 %677  ;;  %v750_v12 = vpop.permute.xlu0 %749  ;;  %672 = vrot.lane.b32.xlu1 %v670_v9, %s2717_s2  ;;  %759 = vperm.xlu0 %2620, %v2920_v11   ;;  %v2498_v9 = vld [vmem:[%s3425_s3 + $0x1b0] sm:$0xff] }
 0x823   :  { %v680_v14 = vmul.f32 %v678_v10, %v2793_v1  ;;  %v752_v33 = vmul.f32 %v750_v12, %v2793_v1  ;;  %v2507_v12 = vld [vmem:[%s3425_s3 + $0x1f8] sm:$0xff]  ;;  %1366 = vmatpush.bf16.msrb.mxu0 %v2488_v8  ;;  %1377 = vmatpush.bf16.msrb.mxu2 %v2498_v9 }
 0x824   :  { %1402 = vmatpush.bf16.msra.mxu1 %v2515_v29  ;;  %v2525_v29 = vld [vmem:[%s3425_s3 + $0x288] sm:$0xff] }
 0x826   :  { %v786_v13 = vpop.permute.xlu2 %785 }
 0x827   :  { %v788_v42 = vmul.f32 %v786_v13, %v2793_v1  ;;  %v2487_v13 = vld [vmem:[%s3425_s3 + $0x158] sm:$0xff] }
 0x828   :  { %1367 = vmatpush.bf16.msrb.mxu0 %v2487_v13  ;;  %1403 = vmatpush.bf16.msra.mxu1 %v2514_v32 }
 0x829   :  { %682 = vrot.lane.b32.xlu2 %v680_v14, %s2715_s20  ;;  %v2497_v14 = vld [vmem:[%s3425_s3 + $0x1a8] sm:$0xff] }
 0x82a   :  { %698 = vrot.lane.b32.xlu1 %v696_v15, %s2716_s7  ;;  %1378 = vmatpush.bf16.msrb.mxu2 %v2497_v14 }
 0x82b   :  { %v714_v16 = vpop.permute.xlu1 %713 }
 0x82c   :  { %v544_v17 = vpop.permute.xlu0 %543  ;;  %v716_v19 = vmul.f32 %v714_v16, %v2793_v1  ;;  %v2486_v16 = vld [vmem:[%s3425_s3 + $0x150] sm:$0xff]  ;;  %1404 = vmatpush.bf16.msra.mxu1 %v2513_v39 }
 0x82d   :  { %v546_v18 = vmul.f32 %v544_v17, %v2793_v1  ;;  %v2496_v17 = vld [vmem:[%s3425_s3 + $0x1a0] sm:$0xff]  ;;  %1368 = vmatpush.bf16.msrb.mxu0 %v2486_v16 }
 0x82e   :  { %1379 = vmatpush.bf16.msrb.mxu2 %v2496_v17 }
 0x82f   :  { %547 = vst.msk [vmem:[#allocation2 + $0x8] sm:$0xff] %vm31_vm0, %v546_v18  ;;  %v652_v20 = vpop.permute.xlu2 %651  ;;  %v2506_v18 = vld [vmem:[%s3425_s3 + $0x1f0] sm:$0xff] }
 0x830   :  { %v654_v21 = vmul.f32 %v652_v20, %v2793_v1 }
 0x831   :  { %718 = vrot.lane.b32.xlu2 %v716_v19, %s2715_s20  ;;  %v2505_v19 = vld [vmem:[%s3425_s3 + $0x1e8] sm:$0xff] }
 0x832   :  { %655 = vst.msk [vmem:[#allocation2 + $0x20] sm:$0xff] %vm31_vm0, %v654_v21  ;;  %v2485_v21 = vld [vmem:[%s3425_s3 + $0x148] sm:$0xff]  ;;  %1380 = vmatpush.bf16.msrb.mxu2 %v2495_v22 }
 0x833   :  { %1369 = vmatpush.bf16.msrb.mxu0 %v2485_v21 }
 0x835   :  { %v740_v23 = vpop.permute.xlu1 %739  ;;  %v616_v24 = vpop.permute.xlu0 %615 }
 0x836   :  { %v742_v25 = vmul.f32 %v740_v23, %v2793_v1  ;;  %v618_v26 = vmul.f32 %v616_v24, %v2793_v1  ;;  %1381 = vmatpush.bf16.msrb.mxu2 %v2494_v28 }
 0x838   :  { %619 = vst.msk [vmem:[#allocation2 + $0x18] sm:$0xff] %vm31_vm0, %v618_v26  ;;  %744 = vrot.lane.b32.xlu1 %v742_v25, %s2717_s2 }
 0x839   :  { %734 = vrot.lane.b32.xlu2 %v732_v27, %s2716_s7  ;;  %v2484_v27 = vld [vmem:[%s3425_s3 + $0x140] sm:$0xff] }
 0x83a   :  { %1370 = vmatpush.bf16.msrb.mxu0 %v2484_v27 }
 0x83e   :  { %v776_v31 = vpop.permute.xlu1 %775  ;;  %1415 = vmatpush.bf16.msra.mxu0 %v2523_v41 }
 0x83f   :  { %v778_v34 = vmul.f32 %v776_v31, %v2793_v1  ;;  %v688_v35 = vpop.permute.xlu0 %687  ;;  %v2493_v31 = vld [vmem:[%s3425_s3 + $0x188] sm:$0xff] }
 0x840   :  { %v690_v36 = vmul.f32 %v688_v35, %v2793_v1  ;;  %770 = vrot.lane.b32.xlu1 %v768_v30, %s2716_s7  ;;  %v2472_v1 = vld [vmem:[%s3425_s3 + $0xe0] sm:$0xff]  ;;  %1382 = vmatpush.bf16.msrb.mxu2 %v2493_v31 }
 0x841   :  { %780 = vrot.lane.b32.xlu0 %v778_v34, %s2717_s2  ;;  %754 = vrot.lane.b32.xlu2 %v752_v33, %s2715_s20  ;;  %v2504_v30 = vld [vmem:[%s3425_s3 + $0x1e0] sm:$0xff]  ;;  %v2503_v33 = vld [vmem:[%s3425_s3 + $0x1d8] sm:$0xff] }
 0x842   :  { %691 = vst.msk [vmem:[#allocation2 + $0x28] sm:$0xff] %vm31_vm0, %v690_v36  ;;  %1340 = vmatpush.bf16.msra.mxu3 %v2472_v1  ;;  %v2524_v31 = vld [vmem:[%s3425_s3 + $0x280] sm:$0xff] }
 0x844   :  { %1383 = vmatpush.bf16.msrb.mxu2 %v2492_v38 }
 0x846   :  { %1341 = vmatpush.bf16.msra.mxu3 %v2471_v48 }
 0x847   :  { %v505_v43 = vpop.permute.xlu1 %504 }
 0x848   :  { %v507_v2 = vmul.f32 %v3040_v44, %v505_v43  ;;  %v2501_v43 = vld [vmem:[%s3425_s3 + $0x1c8] sm:$0xff] }
 0x849   :  { %790 = vrot.lane.b32.xlu2 %v788_v42, %s2715_s20  ;;  %v2512_v42 = vld [vmem:[%s3425_s3 + $0x220] sm:$0xff] }
 0x84a   :  { %508 = vst.msk [vmem:[#allocation2] sm:$0xff] %vm31_vm0, %v507_v2  ;;  %1342 = vmatpush.bf16.msra.mxu3 %v2470_v54  ;;  %v2522_v2 = vld [vmem:[%s3425_s3 + $0x270] sm:$0xff]  ;;  %1405 = vmatpush.bf16.msra.mxu1 %v2512_v42  ;;  %v2520_v54 = vld [vmem:[%s3425_s3 + $0x260] sm:$0xff] }
 0x84b   :  { %1416 = vmatpush.bf16.msra.mxu0 %v2522_v2 }
 0x84e   :  { %1343 = vmatpush.bf16.msra.mxu3 %v2469_v57  ;;  %1406 = vmatpush.bf16.msra.mxu1 %v2511_v49  ;;  %v2509_v57 = vld [vmem:[%s3425_s3 + $0x208] sm:$0xff] }
 0x850   :  { %v580_v50 = vpop.permute.xlu1 %579  ;;  %v516_v51 = vpop.permute.xlu2 %515 }
 0x851   :  { %v582_v52 = vmul.f32 %v3040_v44, %v580_v50  ;;  %519 = vst.msk [vmem:[#allocation2] sm:$0xff] %vm518_vm8, %v516_v51  ;;  %v2500_v50 = vld [vmem:[%s3425_s3 + $0x1c0] sm:$0xff]  ;;  %v2521_v51 = vld [vmem:[%s3425_s3 + $0x268] sm:$0xff] }
 0x852   :  { %1344 = vmatpush.bf16.msra.mxu3 %v2468_v62  ;;  %1417 = vmatpush.bf16.msra.mxu0 %v2521_v51  ;;  %v2633_v51 = vld [vmem:[%s3426_s4 + $0x58] ss:$0 sm:$0xff] }
 0x853   :  { %583 = vst.msk [vmem:[#allocation2 + $0x10] sm:$0xff] %vm31_vm0, %v582_v52  ;;  %v2510_v52 = vld [vmem:[%s3425_s3 + $0x210] sm:$0xff] }
 0x854   :  { %1407 = vmatpush.bf16.msra.mxu1 %v2510_v52 }
 0x856   :  { %1389 = vmatpush.bf16.msrb.mxu3 %v2507_v12  ;;  %1418 = vmatpush.bf16.msra.mxu0 %v2520_v54 }
 0x858   :  { %v538_v61 = vpop.permute.xlu2 %537  ;;  %1408 = vmatpush.bf16.msra.mxu1 %v2509_v57 }
 0x859   :  { %v724_v59 = vpop.permute.xlu1 %723 }
 0x85a   :  { %v726_v60 = vmul.f32 %v3040_v44, %v724_v59  ;;  %1390 = vmatpush.bf16.msrb.mxu3 %v2506_v18  ;;  %1419 = vmatpush.bf16.msra.mxu0 %v2519_v58  ;;  %v2508_v59 = vld [vmem:[%s3425_s3 + $0x200] sm:$0xff] }
 0x85c   :  { %727 = vst.msk [vmem:[#allocation2 + $0x30] sm:$0xff] %vm31_vm0, %v726_v60  ;;  %1409 = vmatpush.bf16.msra.mxu1 %v2508_v59 }
 0x85e   :  { %1391 = vmatpush.bf16.msrb.mxu3 %v2505_v19 }
 0x862   :  { %1392 = vmatpush.bf16.msrb.mxu3 %v2504_v30 }
 0x863   :  { %v575_v6 = vpop.permute.xlu2 %574 }
 0x866   :  { %1393 = vmatpush.bf16.msrb.mxu3 %v2503_v33  ;;  %v2632_v33 = vld [vmem:[%s3426_s4 + $0x50] ss:$0 sm:$0xff] }
 0x867   :  { %v527_v10 = vpop.permute.xlu1 %526 }
 0x868   :  { %530 = vst.msk [vmem:[#allocation2] sm:$0xff] %vm529_vm9, %v527_v10 }
 0x869   :  { %541 = vst.msk [vmem:[#allocation2] sm:$0xff] %vm540_vm10, %v538_v61  ;;  %v2518_v61 = vld [vmem:[%s3425_s3 + $0x250] sm:$0xff] }
 0x86a   :  { %1394 = vmatpush.bf16.msrb.mxu3 %v2502_v40  ;;  %1420 = vmatpush.bf16.msra.mxu0 %v2518_v61 }
 0x86b   :  { %v591_v15 = vpop.permute.xlu2 %590 }
 0x86c   :  { %593 = vst.msk [vmem:[#allocation2 + $0x10] sm:$0xff] %vm518_vm8, %v591_v15 }
 0x86e   :  { %1395 = vmatpush.bf16.msrb.mxu3 %v2501_v43  ;;  %1421 = vmatpush.bf16.msra.mxu0 %v2517_v5 }
 0x870   :  { %v794_v20 = vld [vmem:[#allocation2] sm:$0xff] }
 0x871   :  { %v555_v23 = vpop.permute.xlu1 %554  ;;  %v565_v24 = vpop.permute.xlu0 %564  ;;  %v930_v25 = vpack.c.bf16 %v794_v20, %v794_v20 }
 0x872   :  { %557 = vst.msk [vmem:[#allocation2 + $0x8] sm:$0xff] %vm518_vm8, %v555_v23  ;;  %1396 = vmatpush.bf16.msrb.mxu3 %v2500_v50 }
 0x873   :  { %567 = vst.msk [vmem:[#allocation2 + $0x8] sm:$0xff] %vm529_vm9, %v565_v24  ;;  %v611_v26 = vpop.permute.xlu2 %610  ;;  %1332 = vmatmul.bf16.vlgmr.msra.gmra.mxu2 %v930_v25 }
 0x874   :  { %577 = vst.msk [vmem:[#allocation2 + $0x8] sm:$0xff] %vm540_vm10, %v575_v6  ;;  %v2516_v6 = vld [vmem:[%s3425_s3 + $0x240] sm:$0xff]  ;;  %1458 = vmatpush.bf16.msra.mxu2 %v2525_v29  ;;  %v1506_v29 = vmul.f32 0.3, %v3040_v44 }
 0x875   :  { %1422 = vmatpush.bf16.msra.mxu0 %v2516_v6 }
 0x878   :  { %1459 = vmatpush.bf16.msra.mxu2 %v2524_v31 }
 0x87a   :  { %v601_v34 = vpop.permute.xlu1 %600 }
 0x87b   :  { %603 = vst.msk [vmem:[#allocation2 + $0x10] sm:$0xff] %vm529_vm9, %v601_v34  ;;  %v663_v35 = vpop.permute.xlu2 %662  ;;  %v795_v36 = vld [vmem:[#allocation2 + $0x8] sm:$0xff] }
 0x87c   :  { %613 = vst.msk [vmem:[#allocation2 + $0x10] sm:$0xff] %vm540_vm10, %v611_v26  ;;  %v931_v37 = vpack.c.bf16 %v795_v36, %v795_v36 }
 0x87d   :  { %665 = vst.msk [vmem:[#allocation2 + $0x20] sm:$0xff] %vm518_vm8, %v663_v35 }
 0x87e   :  { %1345 = vmatmul.bf16.vlgmr.msra.gmra.mxu3 %v931_v37 }
 0x883   :  { %v683_v45 = vpop.permute.xlu2 %682  ;;  %v796_v1 = vld [vmem:[#allocation2 + $0x10] sm:$0xff] }
 0x884   :  { %v627_v46 = vpop.permute.xlu1 %626  ;;  %v637_v47 = vpop.permute.xlu0 %636  ;;  %v932_v48 = vpack.c.bf16 %v796_v1, %v796_v1 }
 0x885   :  { %629 = vst.msk [vmem:[#allocation2 + $0x18] sm:$0xff] %vm518_vm8, %v627_v46 }
 0x886   :  { %639 = vst.msk [vmem:[#allocation2 + $0x18] sm:$0xff] %vm529_vm9, %v637_v47  ;;  %1358 = vmatmul.bf16.vlgmr.msrb.gmra.mxu1 %v932_v48 }
 0x88b   :  { %v719_v53 = vpop.permute.xlu2 %718 }
 0x88c   :  { %v647_v55 = vpop.permute.xlu1 %646  ;;  %v709_v56 = vpop.permute.xlu0 %708 }
 0x88d   :  { %649 = vst.msk [vmem:[#allocation2 + $0x18] sm:$0xff] %vm540_vm10, %v647_v55 }
 0x893   :  { %v735_v60 = vpop.permute.xlu2 %734 }
 0x894   :  { %737 = vst.msk [vmem:[#allocation2 + $0x30] sm:$0xff] %vm518_vm8, %v735_v60  ;;  %v673_v62 = vpop.permute.xlu1 %672  ;;  %v760_v63 = vpop.permute.xlu0 %759  ;;  %v797_v0 = vld [vmem:[#allocation2 + $0x18] sm:$0xff] }
 0x895   :  { %675 = vst.msk [vmem:[#allocation2 + $0x20] sm:$0xff] %vm529_vm9, %v673_v62  ;;  %v762_v3 = vmul.f32 %v3040_v44, %v760_v63  ;;  %v933_v4 = vpack.c.bf16 %v797_v0, %v797_v0  ;;  %v2527_v60 = vld [vmem:[%s3425_s3 + $0x298] sm:$0xff]  ;;  %v2526_v0 = vld [vmem:[%s3425_s3 + $0x290] sm:$0xff]  ;;  %v2529_v44 = vld [vmem:[%s3425_s3 + $0x2a8] sm:$0xff] }
 0x896   :  { %685 = vst.msk [vmem:[#allocation2 + $0x20] sm:$0xff] %vm540_vm10, %v683_v45  ;;  %1536 = vmatpush.bf16.msra.mxu3 %v2527_v60 }
 0x897   :  { %763 = vst.msk [vmem:[#allocation2 + $0x38] sm:$0xff] %vm31_vm0, %v762_v3  ;;  %1371 = vmatmul.bf16.vlgmr.msrb.gmra.mxu0 %v933_v4 }
 0x89a   :  { %1537 = vmatpush.bf16.msra.mxu3 %v2526_v0 }
 0x89b   :  { %v755_v13 = vpop.permute.xlu2 %754 }
 0x89c   :  { %v699_v7 = vpop.permute.xlu1 %698 }
 0x89d   :  { %701 = vst.msk [vmem:[#allocation2 + $0x28] sm:$0xff] %vm518_vm8, %v699_v7  ;;  %v798_v8 = vld [vmem:[#allocation2 + $0x20] sm:$0xff] }
 0x89e   :  { %711 = vst.msk [vmem:[#allocation2 + $0x28] sm:$0xff] %vm529_vm9, %v709_v56  ;;  %v934_v9 = vpack.c.bf16 %v798_v8, %v798_v8 }
 0x89f   :  { %721 = vst.msk [vmem:[#allocation2 + $0x28] sm:$0xff] %vm540_vm10, %v719_v53 }
 0x8a0   :  { %1384 = vmatmul.bf16.vlgmr.msrb.gmra.mxu2 %v934_v9 }
 0x8a1   :  { %1611 = vmatpush.bf16.msrb.mxu2 %v2529_v44 }
 0x8a3   :  { %v791_v18 = vpop.permute.xlu2 %790 }
 0x8a6   :  { %v799_v10 = vld [vmem:[#allocation2 + $0x28] sm:$0xff] }
 0x8a7   :  { %v935_v12 = vpack.c.bf16 %v799_v10, %v799_v10 }
 0x8a9   :  { %1397 = vmatmul.bf16.vlgmr.msrb.gmra.mxu3 %v935_v12 }
 0x8aa   :  { %v745_v14 = vpop.permute.xlu1 %744 }
 0x8ab   :  { %747 = vst.msk [vmem:[#allocation2 + $0x30] sm:$0xff] %vm529_vm9, %v745_v14 }
 0x8ac   :  { %757 = vst.msk [vmem:[#allocation2 + $0x30] sm:$0xff] %vm540_vm10, %v755_v13  ;;  %v2634_v13 = vld [vmem:[%s3426_s4 + $0x60] ss:$0 sm:$0xff] }
 0x8b2   :  { %v771_v15 = vpop.permute.xlu1 %770 }
 0x8b3   :  { %773 = vst.msk [vmem:[#allocation2 + $0x38] sm:$0xff] %vm518_vm8, %v771_v15  ;;  %v781_v16 = vpop.permute.xlu0 %780  ;;  %v800_v17 = vld [vmem:[#allocation2 + $0x30] sm:$0xff]  ;;  %v2635_v15 = vld [vmem:[%s3426_s4 + $0x68] ss:$0 sm:$0xff] }
 0x8b4   :  { %783 = vst.msk [vmem:[#allocation2 + $0x38] sm:$0xff] %vm529_vm9, %v781_v16  ;;  %v936_v19 = vpack.c.bf16 %v800_v17, %v800_v17 }
 0x8b5   :  { %793 = vst.msk [vmem:[#allocation2 + $0x38] sm:$0xff] %vm540_vm10, %v791_v18 }
 0x8b6   :  { %1410 = vmatmul.bf16.vlgmr.msra.gmra.mxu1 %v936_v19 }
 0x8bc   :  { %v801_v20 = vld [vmem:[#allocation2 + $0x38] sm:$0xff] }
 0x8bd   :  { %v937_v21 = vpack.c.bf16 %v801_v20, %v801_v20 }
 0x8bf   :  { %1423 = vmatmul.bf16.vlgmr.msra.gmra.mxu0 %v937_v21 }
 0x8f6   :  { %v1333_v22 = vpop.f32.mrf.mxu2 }
 0x8f7   :  { %v1334_v36 = vadd.f32 %v2632_v33, %v1333_v22  ;;  %v2636_v33 = vld [vmem:[%s3426_s4 + $0x70] ss:$0 sm:$0xff] }
 0x8fe   :  { %v1335_v23 = vpop.f32.mrf.mxu2 }
 0x901   :  { %v1346_v24 = vpop.f32.mrf.mxu3 }
 0x902   :  { %v1347_v37 = vadd.f32 %v1346_v24, %v1334_v36 }
 0x903   :  { %v1359_v25 = vpop.f32.mrf.mxu1 }
 0x904   :  { %v1360_v38 = vadd.f32 %v1359_v25, %v1347_v37 }
 0x909   :  { %v1348_v26 = vpop.f32.mrf.mxu3 }
 0x90b   :  { %v1361_v27 = vpop.f32.mrf.mxu1 }
 0x914   :  { %v1372_v28 = vpop.f32.mrf.mxu0 }
 0x915   :  { %v1373_v41 = vadd.f32 %v1372_v28, %v1360_v38  ;;  %v1504_v28 = vmul.f32 0.7, %v2920_v11 }
 0x91c   :  { %v1374_v30 = vpop.f32.mrf.mxu0 }
 0x923   :  { %v1385_v32 = vpop.f32.mrf.mxu2 }
 0x924   :  { %v1386_v42 = vadd.f32 %v1385_v32, %v1373_v41  ;;  %v2528_v41 = vld [vmem:[%s3425_s3 + $0x2a0] sm:$0xff] }
 0x925   :  { %1612 = vmatpush.bf16.msrb.mxu2 %v2528_v41 }
 0x92b   :  { %v1387_v34 = vpop.f32.mrf.mxu2 }
 0x92c   :  { %v1398_v35 = vpop.f32.mrf.mxu3 }
 0x92d   :  { %v1399_v43 = vadd.f32 %v1398_v35, %v1386_v42 }
 0x933   :  { %v1411_v39 = vpop.f32.mrf.mxu1 }
 0x934   :  { %v1400_v40 = vpop.f32.mrf.mxu3  ;;  %v1412_v2 = vadd.f32 %v1411_v39, %v1399_v43 }
 0x93b   :  { %v1413_v45 = vpop.f32.mrf.mxu1 }
 0x93c   :  { %v1424_v1 = vpop.f32.mrf.mxu0 }
 0x93d   :  { %v1425_v46 = vadd.f32 %v1424_v1, %v1412_v2 }
 0x93f   :  { %v1428_v47 = vmul.f32 0.2, %v1425_v46 }
 0x941   :  { %v1429_v48 = vadd.f32 %v1428_v47, %v2920_v11 }
 0x943   :  { %v1434_v49 = vpack.c.bf16 %v1429_v48, %v1429_v48 }
 0x944   :  { %v1426_v50 = vpop.f32.mrf.mxu0 }
 0x945   :  { %2399 = vmatmul.msk.bf16.vlgmr.msra.gmra.mxu2 %vm31_vm0, %v1434_v49 }
 0x9c8   :  { %v1461_v52 = vpop.f32.mrf.mxu2 }
 0x9c9   :  { %v1462_v53 = vadd.f32 %v2633_v51, %v1461_v52 }
 0x9cb   :  { %v1465_v54 = vsel %vm31_vm0, %v1462_v53, 0.0  ;;  %v1469_v55 = vmul.f32 %v1462_v53, %v1462_v53 }
 0x9cc   :  { %1466 = vadd.xlane.f32.xlu1 %v1465_v54 }
 0x9cd   :  { %v1470_v56 = vsel %vm31_vm0, %v1469_v55, 0.0  ;;  %v2638_v55 = vld [vmem:[%s3426_s4 + $0x80] ss:$0 sm:$0xff] }
 0x9ce   :  { %1471 = vadd.xlane.f32.xlu0 %v1470_v56 }
 0x9d0   :  { %v1463_v57 = vpop.f32.mrf.mxu2 }
 0xa3f   :  { %v1467_v58 = vpop.xlane.xlu1 %1466 }
 0xa40   :  { %v1468_v59 = vmul.f32 0.03125, %v1467_v58 }
 0xa41   :  { %v1472_v61 = vpop.xlane.xlu0 %1471 }
 0xa42   :  { %v1474_v62 = vmul.f32 %v1468_v59, %v1468_v59  ;;  %v1473_v63 = vmul.f32 0.03125, %v1472_v61  ;;  %v1476_v12 = vsub.f32 %v1462_v53, %v1468_v59  ;;  %v2637_v53 = vld [vmem:[%s3426_s4 + $0x78] ss:$0 sm:$0xff] }
 0xa44   :  { %v1475_v3 = vsub.f32 %v1473_v63, %v1474_v62 }
 0xa46   :  { %v1477_v4 = vadd.f32 1e-05, %v1475_v3 }
 0xa48   :  { %2682 = vrsqrt.f32 %v1477_v4  ;;  %vm1484_vm12 = vweird.f32 %v1477_v4 }
 0xa4e   :  { %v2683_v5 = vpop.eup %2682 }
 0xa4f   :  { %v1479_v6 = vmul.f32 %v2683_v5, %v1477_v4  ;;  %vm1485_vm11 = vweird.f32 %v2683_v5 }
 0xa50   :  { %vm1486_vm13 = vmor %vm1484_vm12, %vm1485_vm11 }
 0xa51   :  { %v1480_v7 = vmul.f32 %v2683_v5, %v1479_v6 }
 0xa53   :  { %v1481_v8 = vmul.f32 0.5, %v1480_v7 }
 0xa55   :  { %v1482_v9 = vsub.f32 1.5, %v1481_v8 }
 0xa57   :  { %v1483_v10 = vmul.f32 %v2683_v5, %v1482_v9 }
 0xa59   :  { %v1487_v14 = vsel %vm1486_vm13, %v2683_v5, %v1483_v10  ;;  %v2639_v10 = vld [vmem:[%s3426_s4 + $0x88] ss:$0 sm:$0xff] }
 0xa5a   :  { %v1488_v16 = vmul.f32 %v1487_v14, %v1476_v12 }
 0xa5c   :  { %v1491_v17 = vmul.f32 %v2634_v13, %v1488_v16 }
 0xa5e   :  { %v1494_v18 = vadd.f32 %v2635_v15, %v1491_v17 }
 0xa60   :  { %v1496_v19 = vmul.f32 0.044715, %v1494_v18  ;;  %v1495_v25 = vmul.f32 0.5, %v1494_v18 }
 0xa62   :  { %v1497_v20 = vmul.f32 %v1496_v19, %v1494_v18 }
 0xa64   :  { %v1498_v21 = vmul.f32 %v1497_v20, %v1494_v18 }
 0xa66   :  { %v1499_v22 = vadd.f32 %v1498_v21, %v1494_v18  ;;  %v2530_v18 = vld [vmem:[%s3425_s3 + $0x2b0] sm:$0xff] }
 0xa67   :  { %1680 = vmatpush.bf16.msrb.mxu3 %v2530_v18 }
 0xa68   :  { %v1500_v23 = vmul.f32 0.7978846, %v1499_v22 }
 0xa6a   :  { %2684 = vtanh.f32 %v1500_v23 }
 0xa70   :  { %v2685_v24 = vpop.eup %2684 }
 0xa71   :  { %v1502_v26 = vadd.f32 1.0, %v2685_v24 }
 0xa73   :  { %v1503_v27 = vmul.f32 %v1502_v26, %v1495_v25 }
 0xa75   :  { %v1505_v30 = vadd.f32 %v1504_v28, %v1503_v27 }
 0xa77   :  { %v1507_v31 = vadd.f32 %v1506_v29, %v1505_v30 }
 0xa79   :  { %v1512_v32 = vpack.c.bf16 %v1507_v31, %v1507_v31  ;;  %v1583_v7 = vmul.f32 0.3, %v1507_v31 }
 0xa7b   :  { %2408 = vmatmul.msk.bf16.vlgmr.msra.gmra.mxu3 %vm31_vm0, %v1512_v32 }
 0xafe   :  { %v1539_v34 = vpop.f32.mrf.mxu3 }
 0xaff   :  { %v1540_v35 = vadd.f32 %v2636_v33, %v1539_v34  ;;  %v2640_v33 = vld [vmem:[%s3426_s4 + $0x90] ss:$0 sm:$0xff] }
 0xb01   :  { %v1543_v36 = vsel %vm31_vm0, %v1540_v35, 0.0  ;;  %v1547_v37 = vmul.f32 %v1540_v35, %v1540_v35 }
 0xb02   :  { %1544 = vadd.xlane.f32.xlu2 %v1543_v36 }
 0xb03   :  { %v1548_v38 = vsel %vm31_vm0, %v1547_v37, 0.0 }
 0xb04   :  { %1549 = vadd.xlane.f32.xlu1 %v1548_v38 }
 0xb06   :  { %v1541_v11 = vpop.f32.mrf.mxu3 }
 0xb75   :  { %v1545_v39 = vpop.xlane.xlu2 %1544 }
 0xb76   :  { %v1546_v40 = vmul.f32 0.03125, %v1545_v39 }
 0xb77   :  { %v1550_v42 = vpop.xlane.xlu1 %1549 }
 0xb78   :  { %v1552_v43 = vmul.f32 %v1546_v40, %v1546_v40  ;;  %v1551_v2 = vmul.f32 0.03125, %v1550_v42  ;;  %v1554_v52 = vsub.f32 %v1540_v35, %v1546_v40  ;;  %v2641_v35 = vld [vmem:[%s3426_s4 + $0x98] ss:$0 sm:$0xff] }
 0xb7a   :  { %v1553_v45 = vsub.f32 %v1551_v2, %v1552_v43 }
 0xb7c   :  { %v1555_v1 = vadd.f32 1e-05, %v1553_v45 }
 0xb7e   :  { %2686 = vrsqrt.f32 %v1555_v1  ;;  %vm1562_vm15 = vweird.f32 %v1555_v1 }
 0xb84   :  { %v2687_v46 = vpop.eup %2686 }
 0xb85   :  { %v1557_v47 = vmul.f32 %v2687_v46, %v1555_v1  ;;  %vm1563_vm14 = vweird.f32 %v2687_v46 }
 0xb86   :  { %vm1564_vm2 = vmor %vm1562_vm15, %vm1563_vm14 }
 0xb87   :  { %v1558_v48 = vmul.f32 %v2687_v46, %v1557_v47 }
 0xb89   :  { %v1559_v49 = vmul.f32 0.5, %v1558_v48 }
 0xb8b   :  { %v1560_v50 = vsub.f32 1.5, %v1559_v49 }
 0xb8d   :  { %v1561_v51 = vmul.f32 %v2687_v46, %v1560_v50 }
 0xb8f   :  { %v1565_v54 = vsel %vm1564_vm2, %v2687_v46, %v1561_v51  ;;  %v2642_v46 = vld [vmem:[%s3426_s4 + $0xa0] ss:$0 sm:$0xff] }
 0xb90   :  { %v1566_v56 = vmul.f32 %v1565_v54, %v1554_v52 }
 0xb92   :  { %v1569_v57 = vmul.f32 %v2637_v53, %v1566_v56  ;;  %v1728_v53 = vld [vmem:[%s3425_s3 + $0x2b8] sm:$0xf] }
 0xb94   :  { %v1572_v58 = vadd.f32 %v2638_v55, %v1569_v57  ;;  %v1735_v55 = vsel %vm1733_vm7, %v1728_v53, 0 }
 0xb95   :  { %1744 = vmatpush.bf16.msrb.mxu1 %v1735_v55 }
 0xb96   :  { %v1574_v59 = vmul.f32 0.044715, %v1572_v58  ;;  %v1573_v3 = vmul.f32 0.5, %v1572_v58 }
 0xb98   :  { %v1575_v60 = vmul.f32 %v1574_v59, %v1572_v58 }
 0xb9a   :  { %v1576_v61 = vmul.f32 %v1575_v60, %v1572_v58 }
 0xb9c   :  { %v1577_v62 = vadd.f32 %v1576_v61, %v1572_v58 }
 0xb9e   :  { %v1578_v63 = vmul.f32 0.7978846, %v1577_v62 }
 0xba0   :  { %2688 = vtanh.f32 %v1578_v63 }
 0xba6   :  { %v2689_v0 = vpop.eup %2688 }
 0xba7   :  { %v1580_v4 = vadd.f32 1.0, %v2689_v0 }
 0xba9   :  { %v1581_v5 = vmul.f32 %v1580_v4, %v1573_v3 }
 0xbab   :  { %v1582_v6 = vmul.f32 0.7, %v1581_v5 }
 0xbad   :  { %v3288_v8 = vadd.f32 %v1583_v7, %v1582_v6  ;;  %v2643_v7 = vld [vmem:[%s3426_s4 + $0xa8] ss:$0 sm:$0xff] }
 0xbaf   :  { %v1589_v9 = vpack.c.bf16 %v3288_v8, %v3288_v8 }
 0xbb1   :  { %2417 = vmatmul.msk.bf16.vlgmr.msrb.gmra.mxu2 %vm31_vm0, %v1589_v9 }
 0xc34   :  { %v1614_v12 = vpop.f32.mrf.mxu2 }
 0xc35   :  { %v1620_v13 = vadd.f32 %v2639_v10, %v1614_v12  ;;  %v2644_v10 = vld [vmem:[%s3426_s4 + $0xb0] ss:$0 sm:$0xff] }
 0xc37   :  { %v1622_v14 = vsel %vm1621_vm3, %v1620_v13, 0.0  ;;  %v1626_v15 = vmul.f32 %v1620_v13, %v1620_v13 }
 0xc38   :  { %1623 = vadd.xlane.f32.xlu0 %v1622_v14 }
 0xc39   :  { %v1627_v16 = vsel %vm1621_vm3, %v1626_v15, 0.0 }
 0xc3a   :  { %1628 = vadd.xlane.f32.xlu2 %v1627_v16 }
 0xc3c   :  { %v1616_v17 = vpop.f32.mrf.mxu2 }
 0xcab   :  { %v1624_v19 = vpop.xlane.xlu0 %1623 }
 0xcac   :  { %v1625_v20 = vmul.f32 0.0625, %v1624_v19 }
 0xcad   :  { %v1629_v21 = vpop.xlane.xlu2 %1628 }
 0xcae   :  { %v1631_v22 = vmul.f32 %v1625_v20, %v1625_v20  ;;  %v1630_v23 = vmul.f32 0.0625, %v1629_v21  ;;  %v1633_v32 = vsub.f32 %v1620_v13, %v1625_v20 }
 0xcb0   :  { %v1632_v24 = vsub.f32 %v1630_v23, %v1631_v22 }
 0xcb2   :  { %v1634_v25 = vadd.f32 1e-05, %v1632_v24 }
 0xcb4   :  { %2690 = vrsqrt.f32 %v1634_v25  ;;  %vm1641_vm5 = vweird.f32 %v1634_v25 }
 0xcba   :  { %v2691_v26 = vpop.eup %2690 }
 0xcbb   :  { %v1636_v27 = vmul.f32 %v2691_v26, %v1634_v25  ;;  %vm1642_vm4 = vweird.f32 %v2691_v26  ;;  %v2645_v25 = vld [vmem:[%s3426_s4 + $0xb8] ss:$0 sm:$0xff] }
 0xcbc   :  { %vm1643_vm6 = vmor %vm1641_vm5, %vm1642_vm4  ;;  %vm2058_vm5 = vcmask 7168  }
 0xcbd   :  { %v1637_v28 = vmul.f32 %v2691_v26, %v1636_v27 }
 0xcbf   :  { %v1638_v29 = vmul.f32 0.5, %v1637_v28 }
 0xcc1   :  { %v1639_v30 = vsub.f32 1.5, %v1638_v29 }
 0xcc3   :  { %v1640_v31 = vmul.f32 %v2691_v26, %v1639_v30 }
 0xcc5   :  { %v1644_v34 = vsel %vm1643_vm6, %v2691_v26, %v1640_v31 }
 0xcc6   :  { %v1645_v36 = vmul.f32 %v1644_v34, %v1633_v32  ;;  %v2531_v32 = vld [vmem:[%s3425_s3 + $0x2bc] sm:$0xff] }
 0xcc7   :  { %1813 = vmatpush.bf16.msrb.mxu0 %v2531_v32 }
 0xcc8   :  { %v1648_v37 = vmul.f32 %v2640_v33, %v1645_v36 }
 0xcca   :  { %v1651_v38 = vadd.f32 %v2641_v35, %v1648_v37 }
 0xccc   :  { %v1653_v11 = vmul.f32 0.044715, %v1651_v38  ;;  %v1652_v43 = vmul.f32 0.5, %v1651_v38 }
 0xcce   :  { %v1654_v44 = vmul.f32 %v1653_v11, %v1651_v38 }
 0xcd0   :  { %v1655_v39 = vmul.f32 %v1654_v44, %v1651_v38 }
 0xcd2   :  { %v1656_v40 = vadd.f32 %v1655_v39, %v1651_v38 }
 0xcd4   :  { %v1657_v41 = vmul.f32 0.7978846, %v1656_v40 }
 0xcd6   :  { %2692 = vtanh.f32 %v1657_v41 }
 0xcdc   :  { %v2693_v42 = vpop.eup %2692 }
 0xcdd   :  { %v1659_v2 = vadd.f32 1.0, %v2693_v42 }
 0xcdf   :  { %v1660_v45 = vmul.f32 %v1659_v2, %v1652_v43  ;;  %v2648_v2 = vld [vmem:[%s3426_s4 + $0x130] ss:$0 sm:$0xff] }
 0xce1   :  { %v1663_v1 = vpack.c.bf16 %v1660_v45, %v1660_v45  ;;  %v2534_v45 = vld [vmem:[%s3425_s3 + $0x2d4] sm:$0xff] }
 0xce2   :  { %1961 = vmatpush.bf16.msra.mxu3 %v2534_v45 }
 0xce3   :  { %2422 = vmatmul.msk.bf16.vlgmr.msrb.gmra.mxu3 %vm1621_vm3, %v1663_v1  ;;  %v3340_v1 = vld [vmem:[%s3427_s0] sm:$0xff]  ;;  %s2755_s0 = smov 55  }
 0xd66   :  { %v1682_v47 = vpop.f32.mrf.mxu3 }
 0xd67   :  { %v1688_v48 = vadd.f32 %v2642_v46, %v1682_v47  ;;  %v2646_v47 = vld [vmem:[%s3426_s4 + $0xc0] ss:$0 sm:$0xff] }
 0xd69   :  { %v1689_v49 = vsel %vm56_vm1, %v1688_v48, 0.0  ;;  %v1693_v50 = vmul.f32 %v1688_v48, %v1688_v48 }
 0xd6a   :  { %1690 = vadd.xlane.f32.xlu1 %v1689_v49 }
 0xd6b   :  { %v1694_v51 = vsel %vm56_vm1, %v1693_v50, 0.0  ;;  %v2647_v50 = vld [vmem:[%s3426_s4 + $0xc8] ss:$0 sm:$0xff] }
 0xd6c   :  { %1695 = vadd.xlane.f32.xlu0 %v1694_v51 }
 0xd6e   :  { %v1684_v52 = vpop.f32.mrf.mxu3 }
 0xddd   :  { %v1691_v54 = vpop.xlane.xlu1 %1690 }
 0xdde   :  { %v1692_v56 = vmul.f32 0.125, %v1691_v54 }
 0xddf   :  { %v1696_v57 = vpop.xlane.xlu0 %1695 }
 0xde0   :  { %v1698_v58 = vmul.f32 %v1692_v56, %v1692_v56  ;;  %v1697_v59 = vmul.f32 0.125, %v1696_v57  ;;  %v1700_v6 = vsub.f32 %v1688_v48, %v1692_v56  ;;  %v1944_v48 = vpack.c.bf16 %v3340_v1, %v3340_v1 }
 0xde2   :  { %v1699_v60 = vsub.f32 %v1697_v59, %v1698_v58  ;;  %2442 = vmatmul.msk.bf16.vlgmr.msra.gmra.mxu3 %vm1621_vm3, %v1944_v48 }
 0xde4   :  { %v1701_v61 = vadd.f32 1e-05, %v1699_v60 }
 0xde6   :  { %2694 = vrsqrt.f32 %v1701_v61  ;;  %vm1708_vm9 = vweird.f32 %v1701_v61 }
 0xdec   :  { %v2695_v62 = vpop.eup %2694 }
 0xded   :  { %v1703_v63 = vmul.f32 %v2695_v62, %v1701_v61  ;;  %vm1709_vm8 = vweird.f32 %v2695_v62 }
 0xdee   :  { %vm1710_vm10 = vmor %vm1708_vm9, %vm1709_vm8 }
 0xdef   :  { %v1704_v0 = vmul.f32 %v2695_v62, %v1703_v63 }
 0xdf1   :  { %v1705_v3 = vmul.f32 0.5, %v1704_v0  ;;  %v2649_v0 = vld [vmem:[%s3426_s4 + $0xd0] ss:$0 sm:$0xff] }
 0xdf3   :  { %v1706_v4 = vsub.f32 1.5, %v1705_v3 }
 0xdf5   :  { %v1707_v5 = vmul.f32 %v2695_v62, %v1706_v4 }
 0xdf7   :  { %v1711_v9 = vsel %vm1710_vm10, %v2695_v62, %v1707_v5 }
 0xdf8   :  { %v1712_v12 = vmul.f32 %v1711_v9, %v1700_v6 }
 0xdfa   :  { %v1715_v13 = vmul.f32 %v2643_v7, %v1712_v12 }
 0xdfc   :  { %v1718_v14 = vadd.f32 %v2644_v10, %v1715_v13 }
 0xdfe   :  { %v1720_v15 = vmul.f32 0.044715, %v1718_v14  ;;  %v1719_v21 = vmul.f32 0.5, %v1718_v14 }
 0xe00   :  { %v1721_v16 = vmul.f32 %v1720_v15, %v1718_v14 }
 0xe02   :  { %v1722_v17 = vmul.f32 %v1721_v16, %v1718_v14  ;;  %v2533_v16 = vld [vmem:[%s3425_s3 + $0x2cc] sm:$0xff] }
 0xe03   :  { %1887 = vmatpush.bf16.msra.mxu2 %v2533_v16 }
 0xe04   :  { %v1723_v18 = vadd.f32 %v1722_v17, %v1718_v14  ;;  %v2753_v14 = vmov 64  }
 0xe05   :  { %2621 = vset.pattern.permute.xlu0 %v2753_v14 }
 0xe06   :  { %v1724_v19 = vmul.f32 0.7978846, %v1723_v18 }
 0xe08   :  { %2696 = vtanh.f32 %v1724_v19  ;;  %v2532_v19 = vld [vmem:[%s3425_s3 + $0x2c4] sm:$0xff] }
 0xe09   :  { %1888 = vmatpush.bf16.msra.mxu2 %v2532_v19 }
 0xe0e   :  { %v2697_v20 = vpop.eup %2696 }
 0xe0f   :  { %v1726_v22 = vadd.f32 1.0, %v2697_v20 }
 0xe11   :  { %v1727_v23 = vmul.f32 %v1726_v22, %v1719_v21 }
 0xe13   :  { %v1729_v24 = vpack.c.bf16 %v1727_v23, %v1727_v23 }
 0xe15   :  { %2423 = vmatmul.msk.bf16.vlgmr.msrb.gmra.mxu1 %vm56_vm1, %v1729_v24 }
 0xe65   :  { %v1963_v13 = vpop.f32.mrf.mxu3 }
 0xe6d   :  { %v1965_v15 = vpop.f32.mrf.mxu3 }
 0xe92   :  { %v1746_v26 = vpop.f32.mrf.mxu1 }
 0xe93   :  { %v1752_v27 = vadd.f32 %v2645_v25, %v1746_v26 }
 0xe95   :  { %v1753_v28 = vsel %vm1621_vm3, %v1752_v27, 0.0  ;;  %v1757_v29 = vmul.f32 %v1752_v27, %v1752_v27 }
 0xe96   :  { %1754 = vadd.xlane.f32.xlu2 %v1753_v28 }
 0xe97   :  { %v1758_v30 = vsel %vm1621_vm3, %v1757_v29, 0.0 }
 0xe98   :  { %1759 = vadd.xlane.f32.xlu1 %v1758_v30 }
 0xe9a   :  { %v1748_v31 = vpop.f32.mrf.mxu1 }
 0xeb1   :  { %2024 = vrot.lane.b32.xlu1 %v2648_v2, %s2750_s8 }
 0xf09   :  { %v1755_v33 = vpop.xlane.xlu2 %1754 }
 0xf0a   :  { %v1756_v34 = vmul.f32 0.0625, %v1755_v33 }
 0xf0b   :  { %v1760_v35 = vpop.xlane.xlu1 %1759 }
 0xf0c   :  { %v1762_v36 = vmul.f32 %v1756_v34, %v1756_v34  ;;  %v1761_v37 = vmul.f32 0.0625, %v1760_v35  ;;  %v1764_v46 = vsub.f32 %v1752_v27, %v1756_v34 }
 0xf0e   :  { %v1763_v38 = vsub.f32 %v1761_v37, %v1762_v36 }
 0xf10   :  { %v1765_v11 = vadd.f32 1e-05, %v1763_v38  ;;  %v2650_v38 = vld [vmem:[%s3426_s4 + $0xd8] ss:$0 sm:$0xff] }
 0xf12   :  { %2698 = vrsqrt.f32 %v1765_v11  ;;  %vm1772_vm12 = vweird.f32 %v1765_v11 }
 0xf18   :  { %v2699_v44 = vpop.eup %2698 }
 0xf19   :  { %v1767_v39 = vmul.f32 %v2699_v44, %v1765_v11  ;;  %vm1773_vm11 = vweird.f32 %v2699_v44 }
 0xf1a   :  { %vm1774_vm13 = vmor %vm1772_vm12, %vm1773_vm11 }
 0xf1b   :  { %v1768_v40 = vmul.f32 %v2699_v44, %v1767_v39 }
 0xf1d   :  { %v1769_v41 = vmul.f32 0.5, %v1768_v40 }
 0xf1f   :  { %v1770_v42 = vsub.f32 1.5, %v1769_v41 }
 0xf21   :  { %v1771_v43 = vmul.f32 %v2699_v44, %v1770_v42 }
 0xf23   :  { %v1775_v49 = vsel %vm1774_vm13, %v2699_v44, %v1771_v43  ;;  %v2025_v10 = vpop.permute.xlu1 %2024  ;;  %v2651_v44 = vld [vmem:[%s3426_s4 + $0xe0] ss:$0 sm:$0xff] }
 0xf24   :  { %v1776_v51 = vmul.f32 %v1775_v49, %v1764_v46  ;;  %v2027_v12 = vmul.f32 %v2025_v10, %v3340_v1 }
 0xf26   :  { %v1779_v52 = vmul.f32 %v2646_v47, %v1776_v51 }
 0xf28   :  { %v1782_v53 = vadd.f32 %v2647_v50, %v1779_v52  ;;  %v1859_v52 = vmul.f32 0.2, %v3288_v8 }
 0xf2a   :  { %v1784_v54 = vmul.f32 0.044715, %v1782_v53  ;;  %v1783_v60 = vmul.f32 0.5, %v1782_v53 }
 0xf2c   :  { %v1785_v55 = vmul.f32 %v1784_v54, %v1782_v53 }
 0xf2e   :  { %v1786_v56 = vmul.f32 %v1785_v55, %v1782_v53 }
 0xf30   :  { %v1787_v57 = vadd.f32 %v1786_v56, %v1782_v53  ;;  %v2652_v53 = vld [vmem:[%s3426_s4 + $0x100] ss:$0 sm:$0xff] }
 0xf32   :  { %v1788_v58 = vmul.f32 0.7978846, %v1787_v57 }
 0xf34   :  { %2700 = vtanh.f32 %v1788_v58 }
 0xf3a   :  { %v2701_v59 = vpop.eup %2700 }
 0xf3b   :  { %v1790_v61 = vadd.f32 1.0, %v2701_v59  ;;  %v2655_v59 = vld [vmem:[%s3426_s4 + $0x138] ss:$0 sm:$0xff] }
 0xf3d   :  { %v1791_v62 = vmul.f32 %v1790_v61, %v1783_v60  ;;  %v2653_v61 = vld [vmem:[%s3426_s4 + $0x110] ss:$0 sm:$0xff] }
 0xf3f   :  { %v1794_v63 = vpack.c.bf16 %v1791_v62, %v1791_v62 }
 0xf41   :  { %2428 = vmatmul.msk.bf16.vlgmr.msrb.gmra.mxu0 %vm1621_vm3, %v1794_v63  ;;  %v2654_v63 = vld [vmem:[%s3426_s4 + $0x118] ss:$0 sm:$0xff] }
 0xfbe   :  { %v1815_v3 = vpop.f32.mrf.mxu0 }
 0xfbf   :  { %v1816_v4 = vadd.f32 %v2649_v0, %v1815_v3  ;;  %v2656_v3 = vld [vmem:[%s3426_s4 + $0x140] ss:$0 sm:$0xff] }
 0xfc1   :  { %v1819_v5 = vsel %vm31_vm0, %v1816_v4, 0.0  ;;  %v1823_v6 = vmul.f32 %v1816_v4, %v1816_v4 }
 0xfc2   :  { %1820 = vadd.xlane.f32.xlu0 %v1819_v5 }
 0xfc3   :  { %v1824_v7 = vsel %vm31_vm0, %v1823_v6, 0.0 }
 0xfc4   :  { %1825 = vadd.xlane.f32.xlu2 %v1824_v7 }
 0xfc6   :  { %v1817_v9 = vpop.f32.mrf.mxu0 }
 0xfd6   :  { %1925 = vrot.lane.b32.xlu0 %v3340_v1, %s2751_s12 }
 0xfdc   :  { %2029 = vrot.lane.b32.xlu2 %v2027_v12, %s2752_s13 }
 0xfde   :  { %1976 = vperm.xlu0 %2621, %v3340_v1  }
0x1035   :  { %v1821_v17 = vpop.xlane.xlu0 %1820 }
0x1036   :  { %v1822_v18 = vmul.f32 0.03125, %v1821_v17 }
0x1037   :  { %v1826_v20 = vpop.xlane.xlu2 %1825 }
0x1038   :  { %v1828_v21 = vmul.f32 %v1822_v18, %v1822_v18  ;;  %v1827_v22 = vmul.f32 0.03125, %v1826_v20  ;;  %v1830_v37 = vsub.f32 %v1816_v4, %v1822_v18  ;;  %v2660_v20 = vld [vmem:[%s3426_s4 + $0x120] ss:$0 sm:$0xff] }
0x103a   :  { %v1829_v23 = vsub.f32 %v1827_v22, %v1828_v21 }
0x103c   :  { %v1831_v24 = vadd.f32 1e-05, %v1829_v23  ;;  %v2659_v23 = vld [vmem:[%s3426_s4 + $0xe8] ss:$0 sm:$0xff] }
0x103e   :  { %2702 = vrsqrt.f32 %v1831_v24  ;;  %vm1838_vm15 = vweird.f32 %v1831_v24 }
0x103f   :  { %v2030_v25 = vpop.permute.xlu2 %2029 }
0x1040   :  { %v2032_v26 = vsel %vm56_vm1, %v2030_v25, 0.0 }
0x1041   :  { %2033 = vadd.xlane.f32.xlu1 %v2032_v26 }
0x1044   :  { %v2703_v27 = vpop.eup %2702 }
0x1045   :  { %v1833_v28 = vmul.f32 %v2703_v27, %v1831_v24  ;;  %vm1839_vm14 = vweird.f32 %v2703_v27 }
0x1046   :  { %vm1840_vm2 = vmor %vm1838_vm15, %vm1839_vm14 }
0x1047   :  { %v1834_v29 = vmul.f32 %v2703_v27, %v1833_v28 }
0x1048   :  { %v1926_v30 = vpop.permute.xlu0 %1925 }
0x1049   :  { %v1835_v31 = vmul.f32 0.5, %v1834_v29  ;;  %v1928_v32 = vmul.f32 %v1926_v30, %v3340_v1  ;;  %v1967_v33 = vmul.f32 %v1963_v13, %v1926_v30 }
0x104b   :  { %v1836_v34 = vsub.f32 1.5, %v1835_v31  ;;  %1930 = vrot.lane.b32.xlu0 %v1928_v32, %s2715_s20  ;;  %v1968_v35 = vsel %vm1621_vm3, %v1967_v33, 0.0  ;;  %v1936_v58 = vsel %vm1621_vm3, %v1928_v32, 0.0 }
0x104c   :  { %1969 = vadd.xlane.f32.xlu2 %v1968_v35  ;;  %v2661_v35 = vld [vmem:[%s3426_s4 + $0xf0] ss:$0 sm:$0xff] }
0x104d   :  { %v1837_v36 = vmul.f32 %v2703_v27, %v1836_v34 }
0x104f   :  { %v1841_v11 = vsel %vm1840_vm2, %v2703_v27, %v1837_v36 }
0x1050   :  { %v1842_v39 = vmul.f32 %v1841_v11, %v1830_v37  ;;  %v1977_v8 = vpop.permute.xlu0 %1976 }
0x1051   :  { %v1980_v0 = vmul.f32 %v2653_v61, %v1977_v8 }
0x1052   :  { %v1845_v40 = vmul.f32 %v2650_v38, %v1842_v39 }
0x1053   :  { %v1983_v4 = vadd.f32 %v2654_v63, %v1980_v0 }
0x1054   :  { %v1848_v41 = vadd.f32 %v2651_v44, %v1845_v40 }
0x1055   :  { %v1985_v10 = vmul.f32 0.044715, %v1983_v4  ;;  %v1984_v17 = vmul.f32 0.5, %v1983_v4 }
0x1056   :  { %v1850_v42 = vmul.f32 0.044715, %v1848_v41  ;;  %v1849_v48 = vmul.f32 0.5, %v1848_v41 }
0x1057   :  { %v1986_v12 = vmul.f32 %v1985_v10, %v1983_v4 }
0x1058   :  { %v1851_v43 = vmul.f32 %v1850_v42, %v1848_v41 }
0x1059   :  { %v1987_v13 = vmul.f32 %v1986_v12, %v1983_v4 }
0x105a   :  { %v1852_v2 = vmul.f32 %v1851_v43, %v1848_v41 }
0x105b   :  { %v1988_v14 = vadd.f32 %v1987_v13, %v1983_v4 }
0x105c   :  { %v1853_v45 = vadd.f32 %v1852_v2, %v1848_v41  ;;  %v2662_v41 = vld [vmem:[%s3426_s4 + $0x128] ss:$0 sm:$0xff] }
0x105d   :  { %v1989_v15 = vmul.f32 0.7978846, %v1988_v14 }
0x105e   :  { %v1854_v46 = vmul.f32 0.7978846, %v1853_v45 }
0x1060   :  { %2704 = vtanh.f32 %v1854_v46 }
0x1061   :  { %2706 = vtanh.f32 %v1989_v15 }
0x1066   :  { %v2705_v47 = vpop.eup %2704 }
0x1067   :  { %v1856_v49 = vadd.f32 1.0, %v2705_v47  ;;  %v2707_v16 = vpop.eup %2706 }
0x1068   :  { %v1991_v18 = vadd.f32 1.0, %v2707_v16 }
0x1069   :  { %v1857_v50 = vmul.f32 %v1856_v49, %v1849_v48 }
0x106a   :  { %v1992_v19 = vmul.f32 %v1991_v18, %v1984_v17 }
0x106b   :  { %v1858_v51 = vmul.f32 0.8, %v1857_v50 }
0x106c   :  { %v1995_v21 = vmul.f32 %v2660_v20, %v1992_v19 }
0x106d   :  { %v1860_v54 = vadd.f32 %v1859_v52, %v1858_v51 }
0x106e   :  { %v1996_v22 = vsel %vm56_vm1, %v1995_v21, 0.0 }
0x106f   :  { %v1865_v55 = vpack.c.bf16 %v1860_v54, %v1860_v54  ;;  %v1917_v56 = vmul.f32 %v2652_v53, %v1860_v54  ;;  %v2657_v53 = vld [vmem:[%s3426_s4 + $0x108] ss:$0 sm:$0xff] }
0x1071   :  { %2437 = vmatmul.msk.bf16.vlgmr.msra.gmra.mxu2 %vm31_vm0, %v1865_v55  ;;  %v1918_v57 = vsel %vm31_vm0, %v1917_v56, 0.0 }
0x1072   :  { %1919 = vadd.xlane.f32.xlu2 %v1918_v57 }
0x107a   :  { %1937 = vadd.xlane.f32.xlu2 %v1936_v58 }
0x10b4   :  { %v2034_v60 = vpop.xlane.xlu1 %2033 }
0x10b5   :  { %v2037_v62 = vadd.f32 %v2655_v59, %v2034_v60  ;;  %v2658_v60 = vld [vmem:[%s3426_s4 + $0x148] ss:$0 sm:$0xff] }
0x10b7   :  { %2039 = vrot.lane.b32.xlu0 %v2037_v62, %s2754_s25 }
0x10bd   :  { %v1931_v5 = vpop.permute.xlu0 %1930 }
0x10be   :  { %v1933_v6 = vsel %vm1621_vm3, %v1931_v5, 0.0 }
0x10bf   :  { %1934 = vadd.xlane.f32.xlu1 %v1933_v6  ;;  %v1970_v7 = vpop.xlane.xlu2 %1969 }
0x10c0   :  { %v1973_v9 = vadd.f32 %v2656_v3, %v1970_v7 }
0x10c2   :  { %2044 = vrot.lane.b32.xlu0 %v1973_v9, %s2754_s25 }
0x10e5   :  { %v1920_v51 = vpop.xlane.xlu2 %1919 }
0x10e6   :  { %v1923_v56 = vadd.f32 %v2657_v53, %v1920_v51 }
0x10ec   :  { %1997 = vadd.xlane.f32.xlu0 %v1996_v22 }
0x10ed   :  { %v1938_v61 = vpop.xlane.xlu2 %1937 }
0x10ee   :  { %v1941_v3 = vmul.f32 %v2658_v60, %v1938_v61 }
0x10f4   :  { %v1890_v24 = vpop.f32.mrf.mxu2 }
0x10f5   :  { %v1896_v25 = vadd.f32 %v2659_v23, %v1890_v24 }
0x10f7   :  { %v1898_v26 = vmul.f32 0.044715, %v1896_v25  ;;  %v1897_v33 = vmul.f32 0.5, %v1896_v25 }
0x10f9   :  { %v1899_v27 = vmul.f32 %v1898_v26, %v1896_v25 }
0x10fb   :  { %v1900_v28 = vmul.f32 %v1899_v27, %v1896_v25 }
0x10fc   :  { %v1892_v29 = vpop.f32.mrf.mxu2 }
0x10fd   :  { %v1901_v30 = vadd.f32 %v1900_v28, %v1896_v25 }
0x10ff   :  { %v1902_v31 = vmul.f32 0.7978846, %v1901_v30 }
0x1101   :  { %2708 = vtanh.f32 %v1902_v31 }
0x1107   :  { %v2709_v32 = vpop.eup %2708 }
0x1108   :  { %v1904_v34 = vadd.f32 1.0, %v2709_v32 }
0x110a   :  { %v1905_v36 = vmul.f32 %v1904_v34, %v1897_v33 }
0x110c   :  { %v1908_v37 = vmul.f32 %v2661_v35, %v1905_v36 }
0x110e   :  { %v1909_v38 = vsel %vm1621_vm3, %v1908_v37, 0.0 }
0x110f   :  { %1910 = vadd.xlane.f32.xlu1 %v1909_v38 }
0x1129   :  { %v2040_v11 = vpop.permute.xlu0 %2039 }
0x112a   :  { %v2042_v44 = vadd.f32 %v2040_v11, %v3340_v1  ;;  %v2663_v1 = vld [vmem:[%s3426_s4 + $0xf8] ss:$0 sm:$0xff] }
0x1132   :  { %v1935_v48 = vpop.xlane.xlu1 %1934 }
0x1134   :  { %v2045_v39 = vpop.permute.xlu0 %2044 }
0x1135   :  { %v2047_v40 = vadd.f32 %v2045_v39, %v2042_v44 }
0x1137   :  { %2052 = vrot.lane.b32.xlu1 %v2047_v40, %s2755_s0 }
0x115f   :  { %v1998_v42 = vpop.xlane.xlu0 %1997 }
0x1160   :  { %v2001_v43 = vadd.f32 %v2662_v41, %v1998_v42 }
0x1162   :  { %v2443_v2 = vmul.f32 -1.442695, %v2001_v43 }
0x1164   :  { %2710 = vpow2.f32 %v2443_v2 }
0x116a   :  { %v2711_v45 = vpop.eup %2710 }
0x116b   :  { %v2005_v46 = vadd.f32 1.0, %v2711_v45 }
0x116d   :  { %2712 = vrcp.f32 %v2005_v46  ;;  %vm2011_vm0 = vweird.f32 %v2005_v46  ;;  %v2017_v57 = vand.u32 2147483648, %v2005_v46  ;;  %v2015_v8 = vand.u32 2147483647, %v2005_v46 }
0x116f   :  { %v2018_v62 = vor.u32 1.1754944e-38, %v2017_v57  ;;  %vm2016_vm4 = vcmp.eq.f32.partialorder %v2015_v8, 8.507059e+37 }
0x1173   :  { %v2713_v47 = vpop.eup %2712 }
0x1174   :  { %v2007_v49 = vmul.f32 %v2713_v47, %v2005_v46  ;;  %vm2012_vm1 = vweird.f32 %v2713_v47 }
0x1175   :  { %vm2013_vm3 = vmor %vm2011_vm0, %vm2012_vm1 }
0x1176   :  { %v2008_v50 = vsub.f32 1.0, %v2007_v49 }
0x1178   :  { %v2009_v55 = vmul.f32 %v2713_v47, %v2008_v50 }
0x117a   :  { %v2010_v59 = vadd.f32 %v2713_v47, %v2009_v55 }
0x117c   :  { %v2014_v63 = vsel %vm2013_vm3, %v2713_v47, %v2010_v59 }
0x117d   :  { %v2019_v4 = vsel %vm2016_vm4, %v2018_v62, %v2014_v63 }
0x117e   :  { %v2056_v9 = vmul.f32 0.15, %v2019_v4 }
0x1182   :  { %v1911_v52 = vpop.xlane.xlu1 %1910 }
0x1183   :  { %v1914_v54 = vadd.f32 %v2663_v1, %v1911_v52 }
0x1185   :  { %v2048_v58 = vadd.f32 %v1923_v56, %v1914_v54 }
0x1187   :  { %v2049_v0 = vadd.f32 %v2048_v58, %v1935_v48 }
0x1189   :  { %v2050_v5 = vadd.f32 %v2049_v0, %v1941_v3 }
0x11a9   :  { %v2053_v6 = vpop.permute.xlu1 %2052 }
0x11aa   :  { %v2055_v7 = vadd.f32 %v2053_v6, %v2050_v5 }
0x11ac   :  { %v2057_v10 = vadd.f32 %v2056_v9, %v2055_v7 }
0x11ae   :  { %2059 = vst.msk [vmem:[%s3428_s5] sm:$0xff] %vm2058_vm5, %v2057_v10 }

</bundles_post_ra>
